<compile_context>
chip_gen: v6e
topology: v6e:2x2x1
jax: 0.10.0
libtpu: 0.0.40
codegen_flags: <defaults>
</compile_context>

<pallas_src>
import functools

import jax
import jax.numpy as jnp
from jax.experimental import pallas as pl
from jax.experimental.pallas import tpu as pltpu

# Matmul operand dtype: bf16 is native on the MXU of all three generations
# (~2x throughput vs multi-pass f32, half the operand bytes).  Accumulation is
# always f32 via preferred_element_type; elementwise math stays f32.
MATMUL_DTYPE = jnp.bfloat16


def _silu(x):
    return x * jax.nn.sigmoid(x)


@functools.lru_cache(maxsize=None)
def _vmem_limit_bytes():
    """Generation-aware scoped-VMEM budget (~3/4 of physical VMEM)."""
    default = 48 * 1024 * 1024
    try:
        info = pltpu.get_tpu_info()
        cap = int(getattr(info, "vmem_capacity_bytes", 0) or 0)
        if cap > 0:
            return min((cap * 3) // 4, 112 * 1024 * 1024)
    except Exception:
        pass
    return default


def _cparams(*sems):
    return pltpu.CompilerParams(dimension_semantics=sems,
                                vmem_limit_bytes=_vmem_limit_bytes())


# ---------------------------------------------------------------------------
# Fused MBConv kernel: expand -> depthwise -> SE -> project (+ residual).
# One grid step per image (grid over N, "parallel").
# ---------------------------------------------------------------------------
def _mbconv_kernel(x_ref, *rest, K, stride, pad, Ho, Wo, do_expand, add_res):
    if do_expand:
        (w_exp_ref, s1_ref, b1_ref,
         w_dw_ref, s2_ref, b2_ref,
         w_se1_ref, b_se1_ref, w_se2_ref, b_se2_ref,
         w_prj_ref, s3_ref, b3_ref,
         o_ref, pad_sc) = rest
    else:
        (w_dw_ref, s2_ref, b2_ref,
         w_se1_ref, b_se1_ref, w_se2_ref, b_se2_ref,
         w_prj_ref, s3_ref, b3_ref,
         o_ref, pad_sc) = rest

    H, W, Cin = x_ref.shape
    Hp, Wp, Chid = pad_sc.shape
    Cout = o_ref.shape[-1]

    x = x_ref[...].astype(jnp.float32)                          # (H, W, Cin)

    # ---- 1) expand: 1x1 conv (MXU, bf16 operands) + folded BN + SiLU -------
    if do_expand:
        h1 = jnp.dot(x.reshape(H * W, Cin).astype(MATMUL_DTYPE),
                     w_exp_ref[...],                             # pre-cast bf16
                     preferred_element_type=jnp.float32)
        h1 = _silu(h1 * s1_ref[...] + b1_ref[...]).reshape(H, W, Chid)
    else:
        h1 = x                                                   # Chid == Cin

    # ---- 2) depthwise KxK conv via zero-padded VMEM scratch ----------------
    # Zero only the thin pad border (per step -> no cross-step scratch state,
    # megacore-safe); the interior is fully overwritten every step.
    if pad > 0:
        pad_sc[0:pad, :, :] = jnp.zeros((pad, Wp, Chid), jnp.float32)
        pad_sc[pad + H:Hp, :, :] = jnp.zeros((Hp - pad - H, Wp, Chid),
                                             jnp.float32)
        pad_sc[pad:pad + H, 0:pad, :] = jnp.zeros((H, pad, Chid), jnp.float32)
        pad_sc[pad:pad + H, pad + W:Wp, :] = jnp.zeros((H, Wp - pad - W, Chid),
                                                       jnp.float32)
    pad_sc[pad:pad + H, pad:pad + W, :] = h1

    w_dw = w_dw_ref[...]                                         # (K*K, Chid) f32
    # TODO(synk): on v6e/v7x this VALU-bound MAC could run in packed bf16 for
    # ~2x VPU throughput (validate accuracy); kept f32 for v5e parity.
    acc = jnp.zeros((Ho, Wo, Chid), jnp.float32)
    for kh in range(K):
        for kw in range(K):
            if stride == 1:
                # Contiguous slice of the scratch ref (no padded-value temp).
                patch = pad_sc[kh:kh + Ho, kw:kw + Wo, :]
            else:
                # TODO(synk): for stride==2, deinterleave W into even/odd phase
                # buffers once so every tap becomes a contiguous slice.
                patch = pad_sc[pl.ds(kh, Ho, stride), pl.ds(kw, Wo, stride), :]
            acc = acc + patch * w_dw[kh * K + kw]
    h2 = _silu(acc * s2_ref[...] + b2_ref[...])                  # (Ho, Wo, Chid)

    # ---- 3) SqueezeExcitation gate ------------------------------------------
    pooled = jnp.mean(h2.reshape(Ho * Wo, Chid), axis=0, keepdims=True)
    se = jnp.dot(pooled.astype(MATMUL_DTYPE), w_se1_ref[...],
                 preferred_element_type=jnp.float32) + b_se1_ref[...]
    se = _silu(se)
    se = jnp.dot(se.astype(MATMUL_DTYPE), w_se2_ref[...],
                 preferred_element_type=jnp.float32) + b_se2_ref[...]
    gate = jax.nn.sigmoid(se).reshape(1, 1, Chid)

    # ---- 4) SE scale -> project 1x1 conv + folded BN (+ residual) ----------
    hs = (h2 * gate).reshape(Ho * Wo, Chid).astype(MATMUL_DTYPE)
    y = jnp.dot(hs, w_prj_ref[...], preferred_element_type=jnp.float32)
    y = (y * s3_ref[...] + b3_ref[...]).reshape(Ho, Wo, Cout)
    if add_res:
        # stride == 1 and Cin == Cout; StochasticDepth(p=0.0) is identity.
        y = y + x
    o_ref[...] = y.astype(o_ref.dtype)


def mbconv_pallas(x_nhwc, params, *, kernel_size, stride, expand_ratio,
                  use_res):
    N, H, W, Cin = x_nhwc.shape
    K = kernel_size
    pad = K // 2
    Ho = (H + 2 * pad - K) // stride + 1
    Wo = (W + 2 * pad - K) // stride + 1
    Hp, Wp = H + 2 * pad, W + 2 * pad
    do_expand = expand_ratio != 1
    Chid = params["w_dw"].shape[1]
    Csq = params["w_se1"].shape[1]
    Cout = params["w_proj"].shape[1]
    add_res = bool(use_res)
    f32 = jnp.float32

    args = [x_nhwc]
    in_specs = [pl.BlockSpec((None, H, W, Cin), lambda n: (n, 0, 0, 0))]

    def add_full(a):
        # Small weights / folded-BN scale & bias: untiled (block == full
        # array), VMEM-resident across the whole grid.
        nd = a.ndim
        args.append(a)
        in_specs.append(pl.BlockSpec(a.shape, lambda n, _nd=nd: (0,) * _nd))

    if do_expand:
        s1, b1 = params["bn1"]
        add_full(params["w_exp"].astype(MATMUL_DTYPE))   # pre-cast once here
        add_full(s1.reshape(1, Chid).astype(f32))
        add_full(b1.reshape(1, Chid).astype(f32))
    s2, b2 = params["bn2"]
    add_full(params["w_dw"].astype(f32))                 # depthwise stays f32 (VPU)
    add_full(s2.reshape(1, Chid).astype(f32))
    add_full(b2.reshape(1, Chid).astype(f32))
    add_full(params["w_se1"].astype(MATMUL_DTYPE))
    add_full(params["b_se1"].reshape(1, Csq).astype(f32))
    add_full(params["w_se2"].astype(MATMUL_DTYPE))
    add_full(params["b_se2"].reshape(1, Chid).astype(f32))
    s3, b3 = params["bn3"]
    add_full(params["w_proj"].astype(MATMUL_DTYPE))
    add_full(s3.reshape(1, Cout).astype(f32))
    add_full(b3.reshape(1, Cout).astype(f32))

    return pl.pallas_call(
        functools.partial(_mbconv_kernel, K=K, stride=stride, pad=pad,
                          Ho=Ho, Wo=Wo, do_expand=do_expand, add_res=add_res),
        grid=(N,),
        in_specs=in_specs,
        out_specs=pl.BlockSpec((None, Ho, Wo, Cout), lambda n: (n, 0, 0, 0)),
        out_shape=jax.ShapeDtypeStruct((N, Ho, Wo, Cout), x_nhwc.dtype),
        scratch_shapes=[pltpu.VMEM((Hp, Wp, Chid), jnp.float32)],
        compiler_params=_cparams("parallel"),
    )(*args)


# ---------------------------------------------------------------------------
# Parameter construction + MBConv forward wrapper
# ---------------------------------------------------------------------------
def fold_bn(gamma, beta, mean, var, eps=1e-5):
    scale = gamma / jnp.sqrt(var + eps)
    bias = beta - mean * scale
    return scale, bias


def init_mbconv_params(key, in_ch, out_ch, kernel_size, expand_ratio,
                       se_ratio=0.25):
    hidden = in_ch * expand_ratio
    squeezed = int(in_ch * se_ratio)
    keys = jax.random.split(key, 16)

    def bn_params(k, c):
        k1, k2, k3, k4 = jax.random.split(k, 4)
        gamma = jax.random.uniform(k1, (c,), jnp.float32, 0.5, 1.5)
        beta = jax.random.normal(k2, (c,), jnp.float32) * 0.1
        mean = jax.random.normal(k3, (c,), jnp.float32) * 0.1
        var = jax.random.uniform(k4, (c,), jnp.float32, 0.5, 1.5)
        return fold_bn(gamma, beta, mean, var)

    return {
        # expand 1x1 conv: torch weight (hidden, in, 1, 1) -> (in, hidden)
        "w_exp": jax.random.normal(keys[0], (in_ch, hidden), jnp.float32) * 0.1,
        "bn1": bn_params(keys[1], hidden),
        # depthwise conv: torch weight (hidden, 1, K, K) -> (K*K, hidden)
        "w_dw": jax.random.normal(
            keys[2], (kernel_size * kernel_size, hidden), jnp.float32) * 0.1,
        "bn2": bn_params(keys[3], hidden),
        # SE fc1: torch (squeezed, hidden, 1, 1) -> (hidden, squeezed), bias
        "w_se1": jax.random.normal(keys[4], (hidden, squeezed), jnp.float32) * 0.1,
        "b_se1": jax.random.normal(keys[5], (squeezed,), jnp.float32) * 0.1,
        # SE fc2: torch (hidden, squeezed, 1, 1) -> (squeezed, hidden), bias
        "w_se2": jax.random.normal(keys[6], (squeezed, hidden), jnp.float32) * 0.1,
        "b_se2": jax.random.normal(keys[7], (hidden,), jnp.float32) * 0.1,
        # project 1x1 conv: torch (out, hidden, 1, 1) -> (hidden, out)
        "w_proj": jax.random.normal(keys[8], (hidden, out_ch), jnp.float32) * 0.1,
        "bn3": bn_params(keys[9], out_ch),
    }


def mbconv_forward(x_nchw, params, *, in_ch, out_ch, kernel_size, stride,
                   expand_ratio):
    """MBConv forward. Input/output in PyTorch NCHW layout."""
    use_res = (stride == 1) and (in_ch == out_ch)
    x = jnp.transpose(x_nchw, (0, 2, 3, 1))                      # NCHW -> NHWC
    out = mbconv_pallas(x, params, kernel_size=kernel_size, stride=stride,
                        expand_ratio=expand_ratio, use_res=use_res)
    return jnp.transpose(out, (0, 3, 1, 2))                      # NHWC -> NCHW


# ---------------------------------------------------------------------------
# Pure-JAX reference (same NHWC math, matching bf16 matmul operands) used for
# the correctness check.
# ---------------------------------------------------------------------------
def _mm(a, b):
    return jnp.dot(a.astype(MATMUL_DTYPE), b.astype(MATMUL_DTYPE),
                   preferred_element_type=jnp.float32)


def mbconv_reference(x_nchw, params, *, in_ch, out_ch, kernel_size, stride,
                     expand_ratio):
    use_res = (stride == 1) and (in_ch == out_ch)
    x = jnp.transpose(x_nchw, (0, 2, 3, 1)).astype(jnp.float32)
    h = x
    if expand_ratio != 1:
        s1, b1 = params["bn1"]
        N_, H_, W_, C_ = h.shape
        h = _mm(h.reshape(-1, C_), params["w_exp"]).reshape(N_, H_, W_, -1)
        h = _silu(h * s1 + b1)
    K, pad = kernel_size, kernel_size // 2
    N_, H_, W_, C_ = h.shape
    Ho = (H_ + 2 * pad - K) // stride + 1
    Wo = (W_ + 2 * pad - K) // stride + 1
    hp = jnp.pad(h, ((0, 0), (pad, pad), (pad, pad), (0, 0)))
    acc = jnp.zeros((N_, Ho, Wo, C_), jnp.float32)
    for kh in range(K):
        for kw in range(K):
            acc = acc + hp[:, kh:kh + (Ho - 1) * stride + 1:stride,
                              kw:kw + (Wo - 1) * stride + 1:stride, :] \
                        * params["w_dw"][kh * K + kw]
    s2, b2 = params["bn2"]
    h = _silu(acc * s2 + b2)
    pooled = jnp.mean(h, axis=(1, 2))
    g = _silu(_mm(pooled, params["w_se1"]) + params["b_se1"])
    g = jax.nn.sigmoid(_mm(g, params["w_se2"]) + params["b_se2"])
    h = h * g[:, None, None, :]
    s3, b3 = params["bn3"]
    Nn, Hh, Ww, Cc = h.shape
    out = _mm(h.reshape(-1, Cc), params["w_proj"]).reshape(Nn, Hh, Ww, -1)
    out = out * s3 + b3
    if use_res:
        out = out + x
    return jnp.transpose(out, (0, 3, 1, 2))


if __name__ == "__main__":
    key = jax.random.PRNGKey(0)
    N, H, W = 2, 16, 16

    configs = [
        # expand stage + residual branch active
        dict(in_ch=4, out_ch=4, kernel_size=3, stride=1, expand_ratio=4),
        # no expand stage, no residual (in_ch != out_ch)
        dict(in_ch=8, out_ch=16, kernel_size=3, stride=1, expand_ratio=1),
        # larger depthwise kernel (K=5 halo), expand + residual
        dict(in_ch=8, out_ch=8, kernel_size=5, stride=1, expand_ratio=2),
    ]

    for i, cfg in enumerate(configs):
        kx, kp, key = jax.random.split(key, 3)
        x = jax.random.normal(kx, (N, cfg["in_ch"], H, W), jnp.float32)  # NCHW
        params = init_mbconv_params(kp, cfg["in_ch"], cfg["out_ch"],
                                    cfg["kernel_size"], cfg["expand_ratio"])

        fwd = jax.jit(functools.partial(mbconv_forward, **cfg))
        out = jax.block_until_ready(fwd(x, params))

        ref = mbconv_reference(x, params, **cfg)
        assert out.shape == ref.shape == (N, cfg["out_ch"], H, W), out.shape
        # Tolerance accounts for bf16 MXU operands (reference uses matching
        # bf16 operands, so the residual difference is accumulation-order).
        assert jnp.allclose(out, ref, atol=5e-3, rtol=5e-3), (
            f"config {i}: max abs err {float(jnp.max(jnp.abs(out - ref))):.3e}")

    print("KERNEL_OK")
</pallas_src>

<mosaic_0001>
module attributes {stable_mosaic.version = 11 : i64} {
  func.func @_mbconv_kernel(%arg0: i32, %arg1: memref<1x16x16x4xf32, #tpu.memory_space<vmem>>, %arg2: memref<4x16xbf16, #tpu.memory_space<vmem>>, %arg3: memref<1x16xf32, #tpu.memory_space<vmem>>, %arg4: memref<1x16xf32, #tpu.memory_space<vmem>>, %arg5: memref<9x16xf32, #tpu.memory_space<vmem>>, %arg6: memref<1x16xf32, #tpu.memory_space<vmem>>, %arg7: memref<1x16xf32, #tpu.memory_space<vmem>>, %arg8: memref<16x1xbf16, #tpu.memory_space<vmem>>, %arg9: memref<1x1xf32, #tpu.memory_space<vmem>>, %arg10: memref<1x16xbf16, #tpu.memory_space<vmem>>, %arg11: memref<1x16xf32, #tpu.memory_space<vmem>>, %arg12: memref<16x4xbf16, #tpu.memory_space<vmem>>, %arg13: memref<1x4xf32, #tpu.memory_space<vmem>>, %arg14: memref<1x4xf32, #tpu.memory_space<vmem>>, %arg15: memref<1x16x16x4xf32, #tpu.memory_space<vmem>>, %arg16: memref<18x18x16xf32, #tpu.memory_space<vmem>>) attributes {dimension_semantics = [#tpu.dimension_semantics<parallel>], iteration_bounds = array<i64: 2>, scalar_prefetch = 0 : i64, scratch_operands = 1 : i64, tpu.core_type = #tpu.core_type<tc>, window_params = [{transform_indices = @transform_0, window_bounds = array<i64: 1, 16, 16, 4>}, {pipeline_mode = #tpu.pipeline_mode<synchronous>, transform_indices = @transform_1, window_bounds = array<i64: 4, 16>}, {pipeline_mode = #tpu.pipeline_mode<synchronous>, transform_indices = @transform_2, window_bounds = array<i64: 1, 16>}, {pipeline_mode = #tpu.pipeline_mode<synchronous>, transform_indices = @transform_3, window_bounds = array<i64: 1, 16>}, {pipeline_mode = #tpu.pipeline_mode<synchronous>, transform_indices = @transform_4, window_bounds = array<i64: 9, 16>}, {pipeline_mode = #tpu.pipeline_mode<synchronous>, transform_indices = @transform_5, window_bounds = array<i64: 1, 16>}, {pipeline_mode = #tpu.pipeline_mode<synchronous>, transform_indices = @transform_6, window_bounds = array<i64: 1, 16>}, {pipeline_mode = #tpu.pipeline_mode<synchronous>, transform_indices = @transform_7, window_bounds = array<i64: 16, 1>}, {pipeline_mode = #tpu.pipeline_mode<synchronous>, transform_indices = @transform_8, window_bounds = array<i64: 1, 1>}, {pipeline_mode = #tpu.pipeline_mode<synchronous>, transform_indices = @transform_9, window_bounds = array<i64: 1, 16>}, {pipeline_mode = #tpu.pipeline_mode<synchronous>, transform_indices = @transform_10, window_bounds = array<i64: 1, 16>}, {pipeline_mode = #tpu.pipeline_mode<synchronous>, transform_indices = @transform_11, window_bounds = array<i64: 16, 4>}, {pipeline_mode = #tpu.pipeline_mode<synchronous>, transform_indices = @transform_12, window_bounds = array<i64: 1, 4>}, {pipeline_mode = #tpu.pipeline_mode<synchronous>, transform_indices = @transform_13, window_bounds = array<i64: 1, 4>}, {transform_indices = @transform_14, window_bounds = array<i64: 1, 16, 16, 4>}]} {
    %c0 = arith.constant 0 : index
    %c0_0 = arith.constant 0 : index
    %c0_1 = arith.constant 0 : index
    %c0_2 = arith.constant 0 : index
    %0 = vector.load %arg1[%c0, %c0_0, %c0_1, %c0_2] : memref<1x16x16x4xf32, #tpu.memory_space<vmem>>, vector<1x16x16x4xf32>
    %1 = vector.shape_cast %0 : vector<1x16x16x4xf32> to vector<16x16x4xf32>
    %2 = vector.shape_cast %1 : vector<16x16x4xf32> to vector<256x4xf32>
    %3 = arith.truncf %2 : vector<256x4xf32> to vector<256x4xbf16>
    %c0_3 = arith.constant 0 : index
    %c0_4 = arith.constant 0 : index
    %4 = vector.load %arg2[%c0_3, %c0_4] : memref<4x16xbf16, #tpu.memory_space<vmem>>, vector<4x16xbf16>
    %cst = arith.constant dense<0.000000e+00> : vector<256x16xf32>
    %5 = tpu.matmul %3, %4, %cst {dimension_numbers = #tpu.dot_dimension_numbers<[1], [0], [0], [1], [0, 0, 1, 1], [], []>} : vector<256x4xbf16>, vector<4x16xbf16>, vector<256x16xf32> -> vector<256x16xf32>
    %c0_5 = arith.constant 0 : index
    %c0_6 = arith.constant 0 : index
    %6 = vector.load %arg3[%c0_5, %c0_6] : memref<1x16xf32, #tpu.memory_space<vmem>>, vector<1x16xf32>
    %7 = vector.broadcast %6 : vector<1x16xf32> to vector<256x16xf32>
    %8 = arith.mulf %5, %7 : vector<256x16xf32>
    %c0_7 = arith.constant 0 : index
    %c0_8 = arith.constant 0 : index
    %9 = vector.load %arg4[%c0_7, %c0_8] : memref<1x16xf32, #tpu.memory_space<vmem>>, vector<1x16xf32>
    %10 = vector.broadcast %9 : vector<1x16xf32> to vector<256x16xf32>
    %11 = arith.addf %8, %10 : vector<256x16xf32>
    %12 = arith.negf %11 : vector<256x16xf32>
    %13 = math.exp %12 : vector<256x16xf32>
    %cst_9 = arith.constant 1.000000e+00 : f32
    %14 = vector.broadcast %cst_9 : f32 to vector<256x16xf32>
    %15 = arith.addf %14, %13 : vector<256x16xf32>
    %16 = arith.divf %14, %15 : vector<256x16xf32>
    %17 = arith.mulf %11, %16 : vector<256x16xf32>
    %18 = vector.shape_cast %17 : vector<256x16xf32> to vector<16x16x16xf32>
    %cst_10 = arith.constant 0.000000e+00 : f32
    %19 = vector.broadcast %cst_10 : f32 to vector<1x18x16xf32>
    %c0_11 = arith.constant 0 : index
    %c0_12 = arith.constant 0 : index
    %c0_13 = arith.constant 0 : index
    %20 = vector.load %arg16[%c0_11, %c0_12, %c0_13] : memref<18x18x16xf32, #tpu.memory_space<vmem>>, vector<1x18x16xf32>
    tpu.vector_store %arg16[%c0_11, %c0_12, %c0_13], %19 {strides = array<i32>} : memref<18x18x16xf32, #tpu.memory_space<vmem>>, vector<1x18x16xf32>,
    %cst_14 = arith.constant 0.000000e+00 : f32
    %21 = vector.broadcast %cst_14 : f32 to vector<1x18x16xf32>
    %c17 = arith.constant 17 : index
    %c0_15 = arith.constant 0 : index
    %c0_16 = arith.constant 0 : index
    %22 = vector.load %arg16[%c17, %c0_15, %c0_16] : memref<18x18x16xf32, #tpu.memory_space<vmem>>, vector<1x18x16xf32>
    tpu.vector_store %arg16[%c17, %c0_15, %c0_16], %21 {strides = array<i32>} : memref<18x18x16xf32, #tpu.memory_space<vmem>>, vector<1x18x16xf32>,
    %cst_17 = arith.constant 0.000000e+00 : f32
    %23 = vector.broadcast %cst_17 : f32 to vector<16x1x16xf32>
    %c1 = arith.constant 1 : index
    %c0_18 = arith.constant 0 : index
    %c0_19 = arith.constant 0 : index
    %24 = vector.load %arg16[%c1, %c0_18, %c0_19] : memref<18x18x16xf32, #tpu.memory_space<vmem>>, vector<16x1x16xf32>
    tpu.vector_store %arg16[%c1, %c0_18, %c0_19], %23 {strides = array<i32>} : memref<18x18x16xf32, #tpu.memory_space<vmem>>, vector<16x1x16xf32>,
    %cst_20 = arith.constant 0.000000e+00 : f32
    %25 = vector.broadcast %cst_20 : f32 to vector<16x1x16xf32>
    %c1_21 = arith.constant 1 : index
    %c17_22 = arith.constant 17 : index
    %c0_23 = arith.constant 0 : index
    %26 = vector.load %arg16[%c1_21, %c17_22, %c0_23] : memref<18x18x16xf32, #tpu.memory_space<vmem>>, vector<16x1x16xf32>
    tpu.vector_store %arg16[%c1_21, %c17_22, %c0_23], %25 {strides = array<i32>} : memref<18x18x16xf32, #tpu.memory_space<vmem>>, vector<16x1x16xf32>,
    %c1_24 = arith.constant 1 : index
    %c1_25 = arith.constant 1 : index
    %c0_26 = arith.constant 0 : index
    %27 = vector.load %arg16[%c1_24, %c1_25, %c0_26] : memref<18x18x16xf32, #tpu.memory_space<vmem>>, vector<16x16x16xf32>
    tpu.vector_store %arg16[%c1_24, %c1_25, %c0_26], %18 {strides = array<i32>} : memref<18x18x16xf32, #tpu.memory_space<vmem>>, vector<16x16x16xf32>,
    %c0_27 = arith.constant 0 : index
    %c0_28 = arith.constant 0 : index
    %28 = vector.load %arg5[%c0_27, %c0_28] : memref<9x16xf32, #tpu.memory_space<vmem>>, vector<9x16xf32>
    %cst_29 = arith.constant 0.000000e+00 : f32
    %29 = vector.broadcast %cst_29 : f32 to vector<16x16x16xf32>
    %c0_30 = arith.constant 0 : index
    %c0_31 = arith.constant 0 : index
    %c0_32 = arith.constant 0 : index
    %30 = vector.load %arg16[%c0_30, %c0_31, %c0_32] : memref<18x18x16xf32, #tpu.memory_space<vmem>>, vector<16x16x16xf32>
    %31 = vector.extract_strided_slice %28 {offsets = [0, 0], sizes = [1, 16], strides = [1, 1]} : vector<9x16xf32> to vector<1x16xf32>
    %32 = vector.shape_cast %31 : vector<1x16xf32> to vector<16xf32>
    %33 = vector.shape_cast %32 : vector<16xf32> to vector<1x1x16xf32>
    %34 = vector.broadcast %33 : vector<1x1x16xf32> to vector<16x16x16xf32>
    %35 = arith.mulf %30, %34 : vector<16x16x16xf32>
    %36 = arith.addf %29, %35 : vector<16x16x16xf32>
    %c0_33 = arith.constant 0 : index
    %c1_34 = arith.constant 1 : index
    %c0_35 = arith.constant 0 : index
    %37 = vector.load %arg16[%c0_33, %c1_34, %c0_35] : memref<18x18x16xf32, #tpu.memory_space<vmem>>, vector<16x16x16xf32>
    %38 = vector.extract_strided_slice %28 {offsets = [1, 0], sizes = [1, 16], strides = [1, 1]} : vector<9x16xf32> to vector<1x16xf32>
    %39 = vector.shape_cast %38 : vector<1x16xf32> to vector<16xf32>
    %40 = vector.shape_cast %39 : vector<16xf32> to vector<1x1x16xf32>
    %41 = vector.broadcast %40 : vector<1x1x16xf32> to vector<16x16x16xf32>
    %42 = arith.mulf %37, %41 : vector<16x16x16xf32>
    %43 = arith.addf %36, %42 : vector<16x16x16xf32>
    %c0_36 = arith.constant 0 : index
    %c2 = arith.constant 2 : index
    %c0_37 = arith.constant 0 : index
    %44 = vector.load %arg16[%c0_36, %c2, %c0_37] : memref<18x18x16xf32, #tpu.memory_space<vmem>>, vector<16x16x16xf32>
    %45 = vector.extract_strided_slice %28 {offsets = [2, 0], sizes = [1, 16], strides = [1, 1]} : vector<9x16xf32> to vector<1x16xf32>
    %46 = vector.shape_cast %45 : vector<1x16xf32> to vector<16xf32>
    %47 = vector.shape_cast %46 : vector<16xf32> to vector<1x1x16xf32>
    %48 = vector.broadcast %47 : vector<1x1x16xf32> to vector<16x16x16xf32>
    %49 = arith.mulf %44, %48 : vector<16x16x16xf32>
    %50 = arith.addf %43, %49 : vector<16x16x16xf32>
    %c1_38 = arith.constant 1 : index
    %c0_39 = arith.constant 0 : index
    %c0_40 = arith.constant 0 : index
    %51 = vector.load %arg16[%c1_38, %c0_39, %c0_40] : memref<18x18x16xf32, #tpu.memory_space<vmem>>, vector<16x16x16xf32>
    %52 = vector.extract_strided_slice %28 {offsets = [3, 0], sizes = [1, 16], strides = [1, 1]} : vector<9x16xf32> to vector<1x16xf32>
    %53 = vector.shape_cast %52 : vector<1x16xf32> to vector<16xf32>
    %54 = vector.shape_cast %53 : vector<16xf32> to vector<1x1x16xf32>
    %55 = vector.broadcast %54 : vector<1x1x16xf32> to vector<16x16x16xf32>
    %56 = arith.mulf %51, %55 : vector<16x16x16xf32>
    %57 = arith.addf %50, %56 : vector<16x16x16xf32>
    %c1_41 = arith.constant 1 : index
    %c1_42 = arith.constant 1 : index
    %c0_43 = arith.constant 0 : index
    %58 = vector.load %arg16[%c1_41, %c1_42, %c0_43] : memref<18x18x16xf32, #tpu.memory_space<vmem>>, vector<16x16x16xf32>
    %59 = vector.extract_strided_slice %28 {offsets = [4, 0], sizes = [1, 16], strides = [1, 1]} : vector<9x16xf32> to vector<1x16xf32>
    %60 = vector.shape_cast %59 : vector<1x16xf32> to vector<16xf32>
    %61 = vector.shape_cast %60 : vector<16xf32> to vector<1x1x16xf32>
    %62 = vector.broadcast %61 : vector<1x1x16xf32> to vector<16x16x16xf32>
    %63 = arith.mulf %58, %62 : vector<16x16x16xf32>
    %64 = arith.addf %57, %63 : vector<16x16x16xf32>
    %c1_44 = arith.constant 1 : index
    %c2_45 = arith.constant 2 : index
    %c0_46 = arith.constant 0 : index
    %65 = vector.load %arg16[%c1_44, %c2_45, %c0_46] : memref<18x18x16xf32, #tpu.memory_space<vmem>>, vector<16x16x16xf32>
    %66 = vector.extract_strided_slice %28 {offsets = [5, 0], sizes = [1, 16], strides = [1, 1]} : vector<9x16xf32> to vector<1x16xf32>
    %67 = vector.shape_cast %66 : vector<1x16xf32> to vector<16xf32>
    %68 = vector.shape_cast %67 : vector<16xf32> to vector<1x1x16xf32>
    %69 = vector.broadcast %68 : vector<1x1x16xf32> to vector<16x16x16xf32>
    %70 = arith.mulf %65, %69 : vector<16x16x16xf32>
    %71 = arith.addf %64, %70 : vector<16x16x16xf32>
    %c2_47 = arith.constant 2 : index
    %c0_48 = arith.constant 0 : index
    %c0_49 = arith.constant 0 : index
    %72 = vector.load %arg16[%c2_47, %c0_48, %c0_49] : memref<18x18x16xf32, #tpu.memory_space<vmem>>, vector<16x16x16xf32>
    %73 = vector.extract_strided_slice %28 {offsets = [6, 0], sizes = [1, 16], strides = [1, 1]} : vector<9x16xf32> to vector<1x16xf32>
    %74 = vector.shape_cast %73 : vector<1x16xf32> to vector<16xf32>
    %75 = vector.shape_cast %74 : vector<16xf32> to vector<1x1x16xf32>
    %76 = vector.broadcast %75 : vector<1x1x16xf32> to vector<16x16x16xf32>
    %77 = arith.mulf %72, %76 : vector<16x16x16xf32>
    %78 = arith.addf %71, %77 : vector<16x16x16xf32>
    %c2_50 = arith.constant 2 : index
    %c1_51 = arith.constant 1 : index
    %c0_52 = arith.constant 0 : index
    %79 = vector.load %arg16[%c2_50, %c1_51, %c0_52] : memref<18x18x16xf32, #tpu.memory_space<vmem>>, vector<16x16x16xf32>
    %80 = vector.extract_strided_slice %28 {offsets = [7, 0], sizes = [1, 16], strides = [1, 1]} : vector<9x16xf32> to vector<1x16xf32>
    %81 = vector.shape_cast %80 : vector<1x16xf32> to vector<16xf32>
    %82 = vector.shape_cast %81 : vector<16xf32> to vector<1x1x16xf32>
    %83 = vector.broadcast %82 : vector<1x1x16xf32> to vector<16x16x16xf32>
    %84 = arith.mulf %79, %83 : vector<16x16x16xf32>
    %85 = arith.addf %78, %84 : vector<16x16x16xf32>
    %c2_53 = arith.constant 2 : index
    %c2_54 = arith.constant 2 : index
    %c0_55 = arith.constant 0 : index
    %86 = vector.load %arg16[%c2_53, %c2_54, %c0_55] : memref<18x18x16xf32, #tpu.memory_space<vmem>>, vector<16x16x16xf32>
    %87 = vector.extract_strided_slice %28 {offsets = [8, 0], sizes = [1, 16], strides = [1, 1]} : vector<9x16xf32> to vector<1x16xf32>
    %88 = vector.shape_cast %87 : vector<1x16xf32> to vector<16xf32>
    %89 = vector.shape_cast %88 : vector<16xf32> to vector<1x1x16xf32>
    %90 = vector.broadcast %89 : vector<1x1x16xf32> to vector<16x16x16xf32>
    %91 = arith.mulf %86, %90 : vector<16x16x16xf32>
    %92 = arith.addf %85, %91 : vector<16x16x16xf32>
    %c0_56 = arith.constant 0 : index
    %c0_57 = arith.constant 0 : index
    %93 = vector.load %arg6[%c0_56, %c0_57] : memref<1x16xf32, #tpu.memory_space<vmem>>, vector<1x16xf32>
    %94 = vector.shape_cast %93 : vector<1x16xf32> to vector<1x1x16xf32>
    %95 = vector.broadcast %94 : vector<1x1x16xf32> to vector<16x16x16xf32>
    %96 = arith.mulf %92, %95 : vector<16x16x16xf32>
    %c0_58 = arith.constant 0 : index
    %c0_59 = arith.constant 0 : index
    %97 = vector.load %arg7[%c0_58, %c0_59] : memref<1x16xf32, #tpu.memory_space<vmem>>, vector<1x16xf32>
    %98 = vector.shape_cast %97 : vector<1x16xf32> to vector<1x1x16xf32>
    %99 = vector.broadcast %98 : vector<1x1x16xf32> to vector<16x16x16xf32>
    %100 = arith.addf %96, %99 : vector<16x16x16xf32>
    %101 = arith.negf %100 : vector<16x16x16xf32>
    %102 = math.exp %101 : vector<16x16x16xf32>
    %cst_60 = arith.constant 1.000000e+00 : f32
    %103 = vector.broadcast %cst_60 : f32 to vector<16x16x16xf32>
    %104 = arith.addf %103, %102 : vector<16x16x16xf32>
    %105 = arith.divf %103, %104 : vector<16x16x16xf32>
    %106 = arith.mulf %100, %105 : vector<16x16x16xf32>
    %107 = vector.shape_cast %106 : vector<16x16x16xf32> to vector<256x16xf32>
    %cst_61 = arith.constant dense<0.000000e+00> : vector<16xf32>
    %108 = vector.multi_reduction <add>, %107, %cst_61 [0] : vector<256x16xf32> to vector<16xf32>
    %109 = vector.shape_cast %108 : vector<16xf32> to vector<1x16xf32>
    %cst_62 = arith.constant 2.560000e+02 : f32
    %110 = vector.broadcast %cst_62 : f32 to vector<1x16xf32>
    %111 = arith.divf %109, %110 : vector<1x16xf32>
    %112 = arith.truncf %111 : vector<1x16xf32> to vector<1x16xbf16>
    %c0_63 = arith.constant 0 : index
    %c0_64 = arith.constant 0 : index
    %113 = vector.load %arg8[%c0_63, %c0_64] : memref<16x1xbf16, #tpu.memory_space<vmem>>, vector<16x1xbf16>
    %cst_65 = arith.constant dense<0.000000e+00> : vector<1x1xf32>
    %114 = tpu.matmul %112, %113, %cst_65 {dimension_numbers = #tpu.dot_dimension_numbers<[1], [0], [0], [1], [0, 0, 1, 1], [], []>} : vector<1x16xbf16>, vector<16x1xbf16>, vector<1x1xf32> -> vector<1x1xf32>
    %c0_66 = arith.constant 0 : index
    %c0_67 = arith.constant 0 : index
    %115 = vector.load %arg9[%c0_66, %c0_67] : memref<1x1xf32, #tpu.memory_space<vmem>>, vector<1x1xf32>
    %116 = arith.addf %114, %115 : vector<1x1xf32>
    %117 = arith.negf %116 : vector<1x1xf32>
    %118 = math.exp %117 : vector<1x1xf32>
    %cst_68 = arith.constant 1.000000e+00 : f32
    %119 = vector.broadcast %cst_68 : f32 to vector<1x1xf32>
    %120 = arith.addf %119, %118 : vector<1x1xf32>
    %121 = arith.divf %119, %120 : vector<1x1xf32>
    %122 = arith.mulf %116, %121 : vector<1x1xf32>
    %123 = arith.truncf %122 : vector<1x1xf32> to vector<1x1xbf16>
    %c0_69 = arith.constant 0 : index
    %c0_70 = arith.constant 0 : index
    %124 = vector.load %arg10[%c0_69, %c0_70] : memref<1x16xbf16, #tpu.memory_space<vmem>>, vector<1x16xbf16>
    %cst_71 = arith.constant dense<0.000000e+00> : vector<1x16xf32>
    %125 = tpu.matmul %123, %124, %cst_71 {dimension_numbers = #tpu.dot_dimension_numbers<[1], [0], [0], [1], [0, 0, 1, 1], [], []>} : vector<1x1xbf16>, vector<1x16xbf16>, vector<1x16xf32> -> vector<1x16xf32>
    %c0_72 = arith.constant 0 : index
    %c0_73 = arith.constant 0 : index
    %126 = vector.load %arg11[%c0_72, %c0_73] : memref<1x16xf32, #tpu.memory_space<vmem>>, vector<1x16xf32>
    %127 = arith.addf %125, %126 : vector<1x16xf32>
    %128 = arith.negf %127 : vector<1x16xf32>
    %129 = math.exp %128 : vector<1x16xf32>
    %cst_74 = arith.constant 1.000000e+00 : f32
    %130 = vector.broadcast %cst_74 : f32 to vector<1x16xf32>
    %131 = arith.addf %130, %129 : vector<1x16xf32>
    %132 = arith.divf %130, %131 : vector<1x16xf32>
    %133 = vector.shape_cast %132 : vector<1x16xf32> to vector<1x1x16xf32>
    %134 = vector.broadcast %133 : vector<1x1x16xf32> to vector<16x16x16xf32>
    %135 = arith.mulf %106, %134 : vector<16x16x16xf32>
    %136 = vector.shape_cast %135 : vector<16x16x16xf32> to vector<256x16xf32>
    %137 = arith.truncf %136 : vector<256x16xf32> to vector<256x16xbf16>
    %c0_75 = arith.constant 0 : index
    %c0_76 = arith.constant 0 : index
    %138 = vector.load %arg12[%c0_75, %c0_76] : memref<16x4xbf16, #tpu.memory_space<vmem>>, vector<16x4xbf16>
    %cst_77 = arith.constant dense<0.000000e+00> : vector<256x4xf32>
    %139 = tpu.matmul %137, %138, %cst_77 {dimension_numbers = #tpu.dot_dimension_numbers<[1], [0], [0], [1], [0, 0, 1, 1], [], []>} : vector<256x16xbf16>, vector<16x4xbf16>, vector<256x4xf32> -> vector<256x4xf32>
    %c0_78 = arith.constant 0 : index
    %c0_79 = arith.constant 0 : index
    %140 = vector.load %arg13[%c0_78, %c0_79] : memref<1x4xf32, #tpu.memory_space<vmem>>, vector<1x4xf32>
    %141 = vector.broadcast %140 : vector<1x4xf32> to vector<256x4xf32>
    %142 = arith.mulf %139, %141 : vector<256x4xf32>
    %c0_80 = arith.constant 0 : index
    %c0_81 = arith.constant 0 : index
    %143 = vector.load %arg14[%c0_80, %c0_81] : memref<1x4xf32, #tpu.memory_space<vmem>>, vector<1x4xf32>
    %144 = vector.broadcast %143 : vector<1x4xf32> to vector<256x4xf32>
    %145 = arith.addf %142, %144 : vector<256x4xf32>
    %146 = vector.shape_cast %145 : vector<256x4xf32> to vector<16x16x4xf32>
    %147 = arith.addf %146, %1 : vector<16x16x4xf32>
    %c0_82 = arith.constant 0 : index
    %c0_83 = arith.constant 0 : index
    %c0_84 = arith.constant 0 : index
    %c0_85 = arith.constant 0 : index
    %148 = vector.load %arg15[%c0_82, %c0_83, %c0_84, %c0_85] : memref<1x16x16x4xf32, #tpu.memory_space<vmem>>, vector<1x16x16x4xf32>
    %149 = vector.shape_cast %148 : vector<1x16x16x4xf32> to vector<16x16x4xf32>
    %150 = vector.shape_cast %147 : vector<16x16x4xf32> to vector<1x16x16x4xf32>
    tpu.vector_store %arg15[%c0_82, %c0_83, %c0_84, %c0_85], %150 {strides = array<i32>} : memref<1x16x16x4xf32, #tpu.memory_space<vmem>>, vector<1x16x16x4xf32>,
    return
  }
  func.func @transform_0(%arg0: i32) -> (i32, i32, i32, i32) {
    %c0_i32 = arith.constant 0 : i32
    %c0_i32_0 = arith.constant 0 : i32
    %c0_i32_1 = arith.constant 0 : i32
    %c0_i32_2 = arith.constant 0 : i32
    return %arg0, %c0_i32, %c0_i32_0, %c0_i32_1 : i32, i32, i32, i32
  }
  func.func @transform_1(%arg0: i32) -> (i32, i32) {
    %c0_i32 = arith.constant 0 : i32
    %c0_i32_0 = arith.constant 0 : i32
    %c0_i32_1 = arith.constant 0 : i32
    return %c0_i32, %c0_i32_0 : i32, i32
  }
  func.func @transform_2(%arg0: i32) -> (i32, i32) {
    %c0_i32 = arith.constant 0 : i32
    %c0_i32_0 = arith.constant 0 : i32
    %c0_i32_1 = arith.constant 0 : i32
    return %c0_i32, %c0_i32_0 : i32, i32
  }
  func.func @transform_3(%arg0: i32) -> (i32, i32) {
    %c0_i32 = arith.constant 0 : i32
    %c0_i32_0 = arith.constant 0 : i32
    %c0_i32_1 = arith.constant 0 : i32
    return %c0_i32, %c0_i32_0 : i32, i32
  }
  func.func @transform_4(%arg0: i32) -> (i32, i32) {
    %c0_i32 = arith.constant 0 : i32
    %c0_i32_0 = arith.constant 0 : i32
    %c0_i32_1 = arith.constant 0 : i32
    return %c0_i32, %c0_i32_0 : i32, i32
  }
  func.func @transform_5(%arg0: i32) -> (i32, i32) {
    %c0_i32 = arith.constant 0 : i32
    %c0_i32_0 = arith.constant 0 : i32
    %c0_i32_1 = arith.constant 0 : i32
    return %c0_i32, %c0_i32_0 : i32, i32
  }
  func.func @transform_6(%arg0: i32) -> (i32, i32) {
    %c0_i32 = arith.constant 0 : i32
    %c0_i32_0 = arith.constant 0 : i32
    %c0_i32_1 = arith.constant 0 : i32
    return %c0_i32, %c0_i32_0 : i32, i32
  }
  func.func @transform_7(%arg0: i32) -> (i32, i32) {
    %c0_i32 = arith.constant 0 : i32
    %c0_i32_0 = arith.constant 0 : i32
    %c0_i32_1 = arith.constant 0 : i32
    return %c0_i32, %c0_i32_0 : i32, i32
  }
  func.func @transform_8(%arg0: i32) -> (i32, i32) {
    %c0_i32 = arith.constant 0 : i32
    %c0_i32_0 = arith.constant 0 : i32
    %c0_i32_1 = arith.constant 0 : i32
    return %c0_i32, %c0_i32_0 : i32, i32
  }
  func.func @transform_9(%arg0: i32) -> (i32, i32) {
    %c0_i32 = arith.constant 0 : i32
    %c0_i32_0 = arith.constant 0 : i32
    %c0_i32_1 = arith.constant 0 : i32
    return %c0_i32, %c0_i32_0 : i32, i32
  }
  func.func @transform_10(%arg0: i32) -> (i32, i32) {
    %c0_i32 = arith.constant 0 : i32
    %c0_i32_0 = arith.constant 0 : i32
    %c0_i32_1 = arith.constant 0 : i32
    return %c0_i32, %c0_i32_0 : i32, i32
  }
  func.func @transform_11(%arg0: i32) -> (i32, i32) {
    %c0_i32 = arith.constant 0 : i32
    %c0_i32_0 = arith.constant 0 : i32
    %c0_i32_1 = arith.constant 0 : i32
    return %c0_i32, %c0_i32_0 : i32, i32
  }
  func.func @transform_12(%arg0: i32) -> (i32, i32) {
    %c0_i32 = arith.constant 0 : i32
    %c0_i32_0 = arith.constant 0 : i32
    %c0_i32_1 = arith.constant 0 : i32
    return %c0_i32, %c0_i32_0 : i32, i32
  }
  func.func @transform_13(%arg0: i32) -> (i32, i32) {
    %c0_i32 = arith.constant 0 : i32
    %c0_i32_0 = arith.constant 0 : i32
    %c0_i32_1 = arith.constant 0 : i32
    return %c0_i32, %c0_i32_0 : i32, i32
  }
  func.func @transform_14(%arg0: i32) -> (i32, i32, i32, i32) {
    %c0_i32 = arith.constant 0 : i32
    %c0_i32_0 = arith.constant 0 : i32
    %c0_i32_1 = arith.constant 0 : i32
    %c0_i32_2 = arith.constant 0 : i32
    return %arg0, %c0_i32, %c0_i32_0, %c0_i32_1 : i32, i32, i32, i32
  }
}

</mosaic_0001>

<bundles_post_ra>
// kernel: mbconv_forward.1
= control target key start
LH: loop header
LB: loop body
LE: loop exit
PB: predicated region body
PF: predicated region fallthrough
CT: control target
= control target key end

     0   :  { %s3616_s15 = smov 0   ;;  %s5261_s0 = inlined_call_operand.vmem [shape: f32[2,16,16,4], index: 0, kind: input, shape index: {}]   ;;  %s5262_s1 = inlined_call_operand.vmem [shape: bf16[4,16], index: 1, kind: input, shape index: {}]   ;;  %s5263_s2 = inlined_call_operand.vmem [shape: f32[1,16], index: 2, kind: input, shape index: {}]   ;;  %s5264_s3 = inlined_call_operand.vmem [shape: f32[1,16], index: 3, kind: input, shape index: {}]   ;;  %s5265_s4 = inlined_call_operand.vmem [shape: f32[9,16], index: 4, kind: input, shape index: {}]   ;;  %s5266_s5 = inlined_call_operand.vmem [shape: f32[1,16], index: 5, kind: input, shape index: {}]   ;;  %s5267_s6 = inlined_call_operand.vmem [shape: f32[1,16], index: 6, kind: input, shape index: {}]   ;;  %s5268_s7 = inlined_call_operand.vmem [shape: bf16[16,1], index: 7, kind: input, shape index: {}]   ;;  %s5269_s8 = inlined_call_operand.<no memory space> [shape: f32[1,1], index: 8, kind: input, shape index: {}]   ;;  %s5270_s9 = inlined_call_operand.vmem [shape: bf16[1,16], index: 9, kind: input, shape index: {}]   ;;  %s5271_s10 = inlined_call_operand.vmem [shape: f32[1,16], index: 10, kind: input, shape index: {}]   ;;  %s5272_s11 = inlined_call_operand.vmem [shape: bf16[16,4], index: 11, kind: input, shape index: {}]   ;;  %s5273_s12 = inlined_call_operand.vmem [shape: f32[1,4], index: 12, kind: input, shape index: {}]   ;;  %s5274_s13 = inlined_call_operand.vmem [shape: f32[1,4], index: 13, kind: input, shape index: {}]   ;;  %s5275_s14 = inlined_call_operand.vmem [shape: f32[2,16,16,4], index: 14, kind: output, shape index: {}]  }
   0x1   :  { %v19_v0 = vstv %s5269_s8 }
   0x2   :  { %20 = vst [vmem:[#allocation3] sm:$0x1] %v19_v0 }
   0x3 LB: > { %s2972_s16 = sadd.s32 4294967295, %s3533_s15   ;;  %p2976_p0 = scmp.ge.s32.totalorder %s3533_s15, 1  ;;  %s3533_s15 = sphi %s3616_s15, %s26_s15  }
   0x4   : > { %p414_p1 = scmp.lt.s32.totalorder %s3533_s15, 3 }
   0x6   : > { %p415_p2 = pnand %p2976_p0, %p414_p1 }
   0x8   : > { %418 = sbr.rel (%p415_p2) target bundleno = 1277 (0x4fd), region = 76 }
   0xd   : > { %v519_v1 = vld [vmem:[%s5262_s1] sm:$0x3]  ;;  %vm569_vm0 = vcmask 1041408   ;;  %p460_p3 = scmp.lt.s32.totalorder %s2972_s16, 1  ;;  %vm520_vm1 = vcmask 31744   ;;  %vm1036_vm2 = vcmask 130048  }
   0xe   : > { %3212 = vmatprep.subr.msk.bf16.mxu0 %vm569_vm0, %v519_v1  ;;  %v571_v2 = vsel %vm569_vm0, %v519_v1, 0  ;;  %vm1046_vm3 = vcmask 122880   ;;  %v5277_v51 = vmov 0.0   ;;  %vm1039_vm4 = vcmask 123904   ;;  %v3764_v52 = vld [vmem:[%s5263_s2] ss:$0 sm:$0xff] }
   0xf   : > { %3133 = vmatpush3.bf16.msra.mxu0 %v571_v2  ;;  %s5383_s16 = smov (!%p460_p3, %s2972_s16), 1  ;;  %1037 = vst.msk [vmem:[#allocation2] sm:$0xff] %vm1036_vm2, %v5277_v51  ;;  %1038 = vst.msk [vmem:[#allocation2 + $0x8] sm:$0xff] %vm1036_vm2, %v5277_v51  ;;  %3172 = vmatprep.subr.bf16.mxu1 %v5277_v51  ;;  %v3769_v54 = vld [vmem:[%s5264_s3] ss:$0 sm:$0xff]  ;;  %vm3536_vm5 = vmmov 0  }
  0x10   : > { %s3092_s8 = sshll.u32 %s5383_s16, 8  ;;  %1042 = vst.msk [vmem:[#allocation2 + $0x198] sm:$0xff] %vm1036_vm2, %v5277_v51  ;;  %1043 = vst.msk [vmem:[#allocation2 + $0x1a0] sm:$0xff] %vm1036_vm2, %v5277_v51  ;;  %3166 = vmatprep.subr.bf16.mxu0 %v5277_v51  ;;  %vm2454_vm6 = vcmask 1040384   ;;  %vm2450_vm7 = vcmask 7168  }
  0x11   : > { %s3635_s21 = scalar_lea.vmem %s5261_s0, %s3092_s8  ;;  %1048 = vst.msk [vmem:[#allocation2 + $0x30] sm:$0x1] %vm1046_vm3, %v5277_v51  ;;  %1047 = vst.msk [vmem:[#allocation2 + $0x18] sm:$0x1] %vm1046_vm3, %v5277_v51  ;;  %s5099_s18 = scalar_lea.vmem %s5275_s14, %s3092_s8 }
  0x12   : > { %v471_v3 = vld [vmem:[%s3635_s21] sm:$0xff]  ;;  %v472_v4 = vld [vmem:[%s3635_s21 + $0x8] sm:$0xff]  ;;  %v473_v5 = vld [vmem:[%s3635_s21 + $0x10] sm:$0xff]  ;;  %1049 = vst.msk [vmem:[#allocation2 + $0x48] sm:$0x1] %vm1046_vm3, %v5277_v51 }
  0x13   : > { %v503_v6 = vpack.c.bf16 %v472_v4, %v471_v3  ;;  %v474_v7 = vld [vmem:[%s3635_s21 + $0x18] sm:$0xff]  ;;  %v475_v8 = vld [vmem:[%s3635_s21 + $0x20] sm:$0xff]  ;;  %v476_v9 = vld [vmem:[%s3635_s21 + $0x28] sm:$0xff]  ;;  %1050 = vst.msk [vmem:[#allocation2 + $0x60] sm:$0x1] %vm1046_vm3, %v5277_v51 }
  0x14   : > { %v504_v10 = vpack.c.bf16 %v474_v7, %v473_v5  ;;  %v505_v11 = vpack.c.bf16 %v476_v9, %v475_v8  ;;  %v477_v12 = vld [vmem:[%s3635_s21 + $0x30] sm:$0xff]  ;;  %v478_v13 = vld [vmem:[%s3635_s21 + $0x38] sm:$0xff]  ;;  %v479_v14 = vld [vmem:[%s3635_s21 + $0x40] sm:$0xff]  ;;  %1051 = vst.msk [vmem:[#allocation2 + $0x78] sm:$0x1] %vm1046_vm3, %v5277_v51 }
  0x15   : > { %3134 = vmatprep.mubr.msk.bf16.mxu0 %vm520_vm1, %v503_v6  ;;  %v480_v15 = vld [vmem:[%s3635_s21 + $0x48] sm:$0xff]  ;;  %v506_v16 = vpack.c.bf16 %v478_v13, %v477_v12  ;;  %v481_v18 = vld [vmem:[%s3635_s21 + $0x50] sm:$0xff]  ;;  %v482_v19 = vld [vmem:[%s3635_s21 + $0x58] sm:$0xff]  ;;  %1052 = vst.msk [vmem:[#allocation2 + $0x90] sm:$0x1] %vm1046_vm3, %v5277_v51 }
  0x16   : > { %3135 = vmatmul.mubr.msk.bf16.vlgmr.msra.gmra.mxu0 %vm520_vm1, %v504_v10  ;;  %v507_v17 = vpack.c.bf16 %v480_v15, %v479_v14  ;;  %v483_v20 = vld [vmem:[%s3635_s21 + $0x60] sm:$0xff]  ;;  %v484_v21 = vld [vmem:[%s3635_s21 + $0x68] sm:$0xff]  ;;  %v508_v22 = vpack.c.bf16 %v482_v19, %v481_v18  ;;  %v485_v24 = vld [vmem:[%s3635_s21 + $0x70] sm:$0xff]  ;;  %1053 = vst.msk [vmem:[#allocation2 + $0xa8] sm:$0x1] %vm1046_vm3, %v5277_v51 }
  0x17   : > { %3138 = vmatprep.mubr.msk.bf16.mxu0 %vm520_vm1, %v505_v11  ;;  %v509_v23 = vpack.c.bf16 %v484_v21, %v483_v20  ;;  %v486_v25 = vld [vmem:[%s3635_s21 + $0x78] sm:$0xff]  ;;  %v487_v26 = vld [vmem:[%s3635_s21 + $0x80] sm:$0xff]  ;;  %v488_v27 = vld [vmem:[%s3635_s21 + $0x88] sm:$0xff]  ;;  %1054 = vst.msk [vmem:[#allocation2 + $0xc0] sm:$0x1] %vm1046_vm3, %v5277_v51 }
  0x18   : > { %v510_v28 = vpack.c.bf16 %v486_v25, %v485_v24  ;;  %v511_v29 = vpack.c.bf16 %v488_v27, %v487_v26  ;;  %v489_v30 = vld [vmem:[%s3635_s21 + $0x90] sm:$0xff]  ;;  %v490_v31 = vld [vmem:[%s3635_s21 + $0x98] sm:$0xff]  ;;  %v491_v32 = vld [vmem:[%s3635_s21 + $0xa0] sm:$0xff]  ;;  %1055 = vst.msk [vmem:[#allocation2 + $0xd8] sm:$0x1] %vm1046_vm3, %v5277_v51 }
  0x19   : > { %v492_v33 = vld [vmem:[%s3635_s21 + $0xa8] sm:$0xff]  ;;  %v512_v34 = vpack.c.bf16 %v490_v31, %v489_v30  ;;  %v493_v36 = vld [vmem:[%s3635_s21 + $0xb0] sm:$0xff]  ;;  %v494_v37 = vld [vmem:[%s3635_s21 + $0xb8] sm:$0xff]  ;;  %1056 = vst.msk [vmem:[#allocation2 + $0xf0] sm:$0x1] %vm1046_vm3, %v5277_v51 }
  0x1a   : > { %v513_v35 = vpack.c.bf16 %v492_v33, %v491_v32  ;;  %v495_v38 = vld [vmem:[%s3635_s21 + $0xc0] sm:$0xff]  ;;  %v496_v39 = vld [vmem:[%s3635_s21 + $0xc8] sm:$0xff]  ;;  %v514_v40 = vpack.c.bf16 %v494_v37, %v493_v36  ;;  %v497_v42 = vld [vmem:[%s3635_s21 + $0xd0] sm:$0xff]  ;;  %1057 = vst.msk [vmem:[#allocation2 + $0x108] sm:$0x1] %vm1046_vm3, %v5277_v51 }
  0x1b   : > { %v515_v41 = vpack.c.bf16 %v496_v39, %v495_v38  ;;  %v498_v43 = vld [vmem:[%s3635_s21 + $0xd8] sm:$0xff]  ;;  %v499_v44 = vld [vmem:[%s3635_s21 + $0xe0] sm:$0xff]  ;;  %v500_v45 = vld [vmem:[%s3635_s21 + $0xe8] sm:$0xff]  ;;  %1058 = vst.msk [vmem:[#allocation2 + $0x120] sm:$0x1] %vm1046_vm3, %v5277_v51 }
  0x1c   : > { %v516_v46 = vpack.c.bf16 %v498_v43, %v497_v42  ;;  %v517_v47 = vpack.c.bf16 %v500_v45, %v499_v44  ;;  %v501_v48 = vld [vmem:[%s3635_s21 + $0xf0] sm:$0xff]  ;;  %v502_v49 = vld [vmem:[%s3635_s21 + $0xf8] sm:$0xff]  ;;  %1059 = vst.msk [vmem:[#allocation2 + $0x138] sm:$0x1] %vm1046_vm3, %v5277_v51  ;;  %1060 = vst.msk [vmem:[#allocation2 + $0x150] sm:$0x1] %vm1046_vm3, %v5277_v51 }
  0x1d   : > { %v518_v50 = vpack.c.bf16 %v502_v49, %v501_v48  ;;  %1061 = vst.msk [vmem:[#allocation2 + $0x168] sm:$0x1] %vm1046_vm3, %v5277_v51  ;;  %1062 = vst.msk [vmem:[#allocation2 + $0x180] sm:$0x1] %vm1046_vm3, %v5277_v51 }
  0x1e   : > { %3139 = vmatmul.mubr.msk.bf16.gmra.mxu0 %vm520_vm1, %v506_v16  ;;  %1063 = vst.msk [vmem:[#allocation2 + $0x29] sm:$0x1] %vm1046_vm3, %v5277_v51  ;;  %1064 = vst.msk [vmem:[#allocation2 + $0x41] sm:$0x1] %vm1046_vm3, %v5277_v51 }
  0x1f   : > { %3142 = vmatprep.mubr.msk.bf16.mxu0 %vm520_vm1, %v507_v17  ;;  %1065 = vst.msk [vmem:[#allocation2 + $0x59] sm:$0x1] %vm1046_vm3, %v5277_v51  ;;  %1066 = vst.msk [vmem:[#allocation2 + $0x71] sm:$0x1] %vm1046_vm3, %v5277_v51 }
  0x20   : > { %1067 = vst.msk [vmem:[#allocation2 + $0x89] sm:$0x1] %vm1046_vm3, %v5277_v51  ;;  %1068 = vst.msk [vmem:[#allocation2 + $0xa1] sm:$0x1] %vm1046_vm3, %v5277_v51 }
  0x21   : > { %1069 = vst.msk [vmem:[#allocation2 + $0xb9] sm:$0x1] %vm1046_vm3, %v5277_v51  ;;  %1070 = vst.msk [vmem:[#allocation2 + $0xd1] sm:$0x1] %vm1046_vm3, %v5277_v51 }
  0x22   : > { %1071 = vst.msk [vmem:[#allocation2 + $0xe9] sm:$0x1] %vm1046_vm3, %v5277_v51  ;;  %1072 = vst.msk [vmem:[#allocation2 + $0x101] sm:$0x1] %vm1046_vm3, %v5277_v51 }
  0x23   : > { %1073 = vst.msk [vmem:[#allocation2 + $0x119] sm:$0x1] %vm1046_vm3, %v5277_v51  ;;  %1074 = vst.msk [vmem:[#allocation2 + $0x131] sm:$0x1] %vm1046_vm3, %v5277_v51 }
  0x24   : > { %1075 = vst.msk [vmem:[#allocation2 + $0x149] sm:$0x1] %vm1046_vm3, %v5277_v51  ;;  %1076 = vst.msk [vmem:[#allocation2 + $0x161] sm:$0x1] %vm1046_vm3, %v5277_v51 }
  0x25   : > { %1077 = vst.msk [vmem:[#allocation2 + $0x179] sm:$0x1] %vm1046_vm3, %v5277_v51  ;;  %1078 = vst.msk [vmem:[#allocation2 + $0x191] sm:$0x1] %vm1046_vm3, %v5277_v51 }
  0x26   : > { %3143 = vmatmul.mubr.msk.bf16.gmra.mxu0 %vm520_vm1, %v508_v22  ;;  %1040 = vst.msk [vmem:[#allocation2 + $0x10] sm:$0x3] %vm1039_vm4, %v5277_v51  ;;  %1044 = vst.msk [vmem:[#allocation2 + $0x1a8] sm:$0x3] %vm1039_vm4, %v5277_v51 }
  0x27   : > { %3146 = vmatprep.mubr.msk.bf16.mxu0 %vm520_vm1, %v509_v23 }
  0x2e   : > { %3147 = vmatmul.mubr.msk.bf16.gmra.mxu0 %vm520_vm1, %v510_v28 }
  0x2f   : > { %3150 = vmatprep.mubr.msk.bf16.mxu0 %vm520_vm1, %v511_v29 }
  0x36   : > { %3151 = vmatmul.mubr.msk.bf16.gmra.mxu0 %vm520_vm1, %v512_v34 }
  0x37   : > { %3154 = vmatprep.mubr.msk.bf16.mxu0 %vm520_vm1, %v513_v35 }
  0x3e   : > { %3155 = vmatmul.mubr.msk.bf16.gmra.mxu0 %vm520_vm1, %v514_v40 }
  0x3f   : > { %3158 = vmatprep.mubr.msk.bf16.mxu0 %vm520_vm1, %v515_v41 }
  0x46   : > { %3159 = vmatmul.mubr.msk.bf16.gmra.mxu0 %vm520_vm1, %v516_v46 }
  0x47   : > { %3162 = vmatprep.mubr.msk.bf16.mxu0 %vm520_vm1, %v517_v47 }
  0x4e   : > { %3163 = vmatmul.mubr.msk.bf16.gmra.mxu0 %vm520_vm1, %v518_v50 }
  0xd6   : > { %v3136_v53 = vpop.f32.mrf.mxu0 }
  0xd7   : > { %v743_v55 = vmul.f32 %v3136_v53, %v3764_v52 }
  0xd8   : > { %v607_v56 = vpop.f32.mrf.mxu0 }
  0xd9   : > { %v3773_v57 = vadd.f32 %v3769_v54, %v743_v55  ;;  %v741_v58 = vmul.f32 %v3764_v52, %v607_v56 }
  0xda   : > { %v3137_v59 = vpop.f32.mrf.mxu0 }
  0xdb   : > { %v3001_v60 = vmul.f32 -1.442695, %v3773_v57  ;;  %v3778_v61 = vadd.f32 %v3769_v54, %v741_v58  ;;  %v744_v62 = vmul.f32 %v3137_v59, %v3764_v52 }
  0xdc   : > { %v610_v63 = vpop.f32.mrf.mxu0 }
  0xdd   : > { %3226 = vpow2.f32 %v3001_v60  ;;  %v2999_v0 = vmul.f32 -1.442695, %v3778_v61  ;;  %v3783_v1 = vadd.f32 %v3769_v54, %v744_v62  ;;  %v742_v2 = vmul.f32 %v3764_v52, %v610_v63 }
  0xde   : > { %v3140_v3 = vpop.f32.mrf.mxu0  ;;  %v1145_v60 = vlaneseq }
  0xdf   : > { %3228 = vpow2.f32 %v2999_v0  ;;  %v3002_v4 = vmul.f32 -1.442695, %v3783_v1  ;;  %v3788_v5 = vadd.f32 %v3769_v54, %v742_v2  ;;  %v747_v6 = vmul.f32 %v3140_v3, %v3764_v52 }
  0xe0   : > { %v623_v7 = vpop.f32.mrf.mxu0 }
  0xe1   : > { %3230 = vpow2.f32 %v3002_v4  ;;  %v3000_v8 = vmul.f32 -1.442695, %v3788_v5  ;;  %v3793_v9 = vadd.f32 %v3769_v54, %v747_v6  ;;  %v745_v10 = vmul.f32 %v3764_v52, %v623_v7 }
  0xe2   : > { %v3141_v11 = vpop.f32.mrf.mxu0  ;;  %v3838_v4 = vshrl.u32 %v1145_v60, 7 }
  0xe3   : > { %3232 = vpow2.f32 %v3000_v8  ;;  %v3005_v12 = vmul.f32 -1.442695, %v3793_v9  ;;  %v3798_v13 = vadd.f32 %v3769_v54, %v745_v10  ;;  %v748_v14 = vmul.f32 %v3141_v11, %v3764_v52 }
  0xe4   : > { %v626_v15 = vpop.f32.mrf.mxu0  ;;  %5310 = vst [vmem:[#allocation4_spill] sm:$0xff] %v3838_v4 }
  0xe5   : > { %3234 = vpow2.f32 %v3005_v12  ;;  %v3003_v16 = vmul.f32 -1.442695, %v3798_v13  ;;  %v3803_v17 = vadd.f32 %v3769_v54, %v748_v14  ;;  %v746_v18 = vmul.f32 %v3764_v52, %v626_v15 }
  0xe6   : > { %v3144_v19 = vpop.f32.mrf.mxu0  ;;  %v5276_v15 = vsub.s32 0, %v3838_v4 }
  0xe7   : > { %3236 = vpow2.f32 %v3003_v16  ;;  %v3006_v20 = vmul.f32 -1.442695, %v3803_v17  ;;  %v751_v21 = vmul.f32 %v3144_v19, %v3764_v52  ;;  %v3809_v22 = vadd.f32 %v3769_v54, %v746_v18 }
  0xe8   : > { %v639_v23 = vpop.f32.mrf.mxu0 }
  0xe9   : > { %3238 = vpow2.f32 %v3006_v20  ;;  %v749_v24 = vmul.f32 %v3764_v52, %v639_v23  ;;  %v3813_v26 = vadd.f32 %v3769_v54, %v751_v21  ;;  %v3004_v30 = vmul.f32 -1.442695, %v3809_v22 }
  0xea   : > { %v3227_v25 = vpop.eup %3226  ;;  %v3145_v27 = vpop.f32.mrf.mxu0 }
  0xeb   : > { %v910_v28 = vadd.f32 1.0, %v3227_v25  ;;  %v3817_v31 = vadd.f32 %v3769_v54, %v749_v24  ;;  %v752_v32 = vmul.f32 %v3145_v27, %v3764_v52  ;;  %v3009_v37 = vmul.f32 -1.442695, %v3813_v26  ;;  %v1114_v25 = vld [vmem:[#allocation2 + $0x8] sm:$0xff] }
  0xec   : > { %v3229_v29 = vpop.eup %3228  ;;  %v642_v33 = vpop.f32.mrf.mxu0  ;;  %v1214_v27 = vld [vmem:[#allocation2 + $0x9] sm:$0xff] }
  0xed   : > { %3240 = vrcp.f32 %v910_v28  ;;  %v908_v34 = vadd.f32 1.0, %v3229_v29  ;;  %v750_v35 = vmul.f32 %v3764_v52, %v642_v33  ;;  %v3823_v38 = vadd.f32 %v3769_v54, %v752_v32 }
  0xee   : > { %v3231_v36 = vpop.eup %3230  ;;  %v3148_v39 = vpop.f32.mrf.mxu0  ;;  %v3007_v43 = vmul.f32 -1.442695, %v3817_v31 }
  0xef   : > { %3242 = vrcp.f32 %v908_v34  ;;  %v911_v40 = vadd.f32 1.0, %v3231_v36  ;;  %v755_v41 = vmul.f32 %v3148_v39, %v3764_v52  ;;  %v3828_v44 = vadd.f32 %v3769_v54, %v750_v35  ;;  %v1113_v39 = vld [vmem:[#allocation2] sm:$0xff] }
  0xf0   : > { %v3233_v42 = vpop.eup %3232  ;;  %3244 = vpow2.f32 %v3004_v30  ;;  %v3010_v47 = vmul.f32 -1.442695, %v3823_v38  ;;  %v655_v63 = vpop.f32.mrf.mxu0 }
  0xf1   : > { %3246 = vrcp.f32 %v911_v40  ;;  %v909_v45 = vadd.f32 1.0, %v3233_v42  ;;  %v3832_v48 = vadd.f32 %v3769_v54, %v755_v41  ;;  %v3008_v53 = vmul.f32 -1.442695, %v3828_v44  ;;  %v1213_v40 = vld [vmem:[#allocation2 + $0x1] sm:$0xff] }
  0xf2   : > { %v3235_v46 = vpop.eup %3234  ;;  %3248 = vpow2.f32 %v3009_v37  ;;  %v3149_v8 = vpop.f32.mrf.mxu0  ;;  %v753_v29 = vmul.f32 %v3764_v52, %v655_v63 }
  0xf3   : > { %3250 = vrcp.f32 %v909_v45  ;;  %v914_v49 = vadd.f32 1.0, %v3235_v46  ;;  %v3013_v58 = vmul.f32 -1.442695, %v3832_v48  ;;  %v756_v34 = vmul.f32 %v3149_v8, %v3764_v52 }
  0xf4   : > { %v3237_v50 = vpop.eup %3236  ;;  %3252 = vpow2.f32 %v3007_v43  ;;  %v658_v19 = vpop.f32.mrf.mxu0  ;;  %v1447_v46 = vsub.s32 3, %v3838_v4 }
  0xf5   : > { %3254 = vrcp.f32 %v914_v49  ;;  %v912_v55 = vadd.f32 1.0, %v3237_v50  ;;  %v3873_v49 = vadd.f32 %v3769_v54, %v753_v29  ;;  %v754_v63 = vmul.f32 %v3764_v52, %v658_v19 }
  0xf6   : > { %v3239_v56 = vpop.eup %3238  ;;  %3256 = vpow2.f32 %v3010_v47  ;;  %v3152_v35 = vpop.f32.mrf.mxu0 }
  0xf7   : > { %3258 = vrcp.f32 %v912_v55  ;;  %v915_v59 = vadd.f32 1.0, %v3239_v56  ;;  %v3880_v55 = vadd.f32 %v3769_v54, %v756_v34  ;;  %v3897_v19 = vadd.f32 %v3769_v54, %v754_v63 }
  0xf8   : > { %3260 = vpow2.f32 %v3008_v53 }
  0xf9   : > { %3262 = vrcp.f32 %v915_v59  ;;  %v1313_v59 = vld [vmem:[#allocation2 + $0x2] sm:$0xff]  ;;  %v3012_v34 = vmul.f32 -1.442695, %v3897_v19 }
  0xfa   : > { %v3241_v62 = vpop.eup %3240  ;;  %3264 = vpow2.f32 %v3013_v58 }
  0xfb   : > { %v1006_v0 = vmul.f32 %v3241_v62, %v3773_v57  ;;  %v1247_v57 = vsub.s32 1, %v3838_v4 }
  0xfc   : > { %v3243_v2 = vpop.eup %3242 }
  0xfd   : > { %v3245_v3 = vpop.eup %3244  ;;  %1081 = vst.msk [vmem:[#allocation2 + $0x31] sm:$0xff] %vm1036_vm2, %v1006_v0  ;;  %v1004_v6 = vmul.f32 %v3243_v2, %v3778_v61  ;;  %v3850_v61 = vld [vmem:[%s5265_s4] sm:$0xff]  ;;  %v3011_v2 = vmul.f32 -1.442695, %v3873_v49 }
  0xfe   : > { %v3247_v7 = vpop.eup %3246  ;;  %v3857_v24 = vrot.slane %v3850_v61, %v5276_v15  ;;  %v913_v28 = vadd.f32 1.0, %v3245_v3  ;;  %v759_v3 = vmul.f32 %v3152_v35, %v3764_v52 }
  0xff   : > { %v3249_v10 = vpop.eup %3248  ;;  %1079 = vst.msk [vmem:[#allocation2 + $0x19] sm:$0xff] %vm1036_vm2, %v1004_v6  ;;  %v1007_v11 = vmul.f32 %v3247_v7, %v3783_v1  ;;  %v3889_v6 = vrot.slane %v3850_v61, %v1447_v46  ;;  %v3014_v7 = vmul.f32 -1.442695, %v3880_v55 }
 0x100   : > { %v3251_v12 = vpop.eup %3250  ;;  %v918_v33 = vadd.f32 1.0, %v3249_v10  ;;  %v1150_v41 = vmul.f32 %v3857_v24, %v1114_v25  ;;  %3266 = vrcp.f32 %v913_v28  ;;  %v1149_v56 = vmul.f32 %v3857_v24, %v1113_v39 }
 0x101   : > { %v3253_v14 = vpop.eup %3252  ;;  %1082 = vst.msk [vmem:[#allocation2 + $0x39] sm:$0xff] %vm1036_vm2, %v1007_v11  ;;  %v1005_v16 = vmul.f32 %v3251_v12, %v3788_v5  ;;  %v3860_v5 = vrot.slane %v3850_v61, %v1247_v57  ;;  %v1848_v25 = vsub.s32 7, %v3838_v4 }
 0x102   : > { %v3255_v18 = vpop.eup %3254  ;;  %v916_v37 = vadd.f32 1.0, %v3253_v14  ;;  %3268 = vrcp.f32 %v918_v33  ;;  %v1547_v14 = vsub.s32 4, %v3838_v4 }
 0x103   : > { %v3257_v20 = vpop.eup %3256  ;;  %1080 = vst.msk [vmem:[#allocation2 + $0x21] sm:$0xff] %vm1036_vm2, %v1005_v16  ;;  %v1010_v1 = vmul.f32 %v3255_v18, %v3793_v9  ;;  %v1347_v9 = vsub.s32 2, %v3838_v4  ;;  %v1250_v42 = vmul.f32 %v3860_v5, %v1214_v27  ;;  %v1249_v58 = vmul.f32 %v3860_v5, %v1213_v40 }
 0x104   : > { %v3259_v21 = vpop.eup %3258  ;;  %v919_v45 = vadd.f32 1.0, %v3257_v20  ;;  %3270 = vrcp.f32 %v916_v37  ;;  %v1748_v20 = vsub.s32 6, %v3838_v4 }
 0x105   : > { %v3261_v23 = vpop.eup %3260  ;;  %1085 = vst.msk [vmem:[#allocation2 + $0x61] sm:$0xff] %vm1036_vm2, %v1010_v1  ;;  %v1008_v32 = vmul.f32 %v3259_v21, %v3798_v13  ;;  %v1314_v13 = vld [vmem:[#allocation2 + $0xa] sm:$0xff]  ;;  %v3876_v50 = vrot.slane %v3850_v61, %v1347_v9  ;;  %v1282_v60 = vadd.f32 %v1250_v42, %v1150_v41  ;;  %v1281_v11 = vadd.f32 %v1249_v58, %v1149_v56 }
 0x106   : > { %v3263_v30 = vpop.eup %3262  ;;  %v917_v47 = vadd.f32 1.0, %v3261_v23  ;;  %3272 = vrcp.f32 %v919_v45  ;;  %v1115_v57 = vld [vmem:[#allocation2 + $0x18] sm:$0xff]  ;;  %v3901_v1 = vadd.f32 %v3769_v54, %v759_v3  ;;  %v3910_v9 = vrot.slane %v3850_v61, %v1547_v14 }
 0x107   : > { %v3265_v36 = vpop.eup %3264  ;;  %1083 = vst.msk [vmem:[#allocation2 + $0x49] sm:$0xff] %vm1036_vm2, %v1008_v32  ;;  %v1011_v43 = vmul.f32 %v3263_v30, %v3803_v17  ;;  %v671_v17 = vpop.f32.mrf.mxu0  ;;  %v1350_v62 = vmul.f32 %v3876_v50, %v1314_v13  ;;  %v1349_v12 = vmul.f32 %v3876_v50, %v1313_v59  ;;  %v1215_v27 = vld [vmem:[#allocation2 + $0x19] sm:$0xff]  ;;  %v1449_v29 = vmul.f32 %v3889_v6, %v1115_v57 }
 0x108   : > { %v922_v53 = vadd.f32 1.0, %v3265_v36  ;;  %3274 = vrcp.f32 %v917_v47  ;;  %v757_v8 = vmul.f32 %v3764_v52, %v671_v17  ;;  %v1647_v32 = vsub.s32 5, %v3838_v4  ;;  %v1117_v47 = vld [vmem:[#allocation2 + $0x30] sm:$0xff] }
 0x109   : > { %1086 = vst.msk [vmem:[#allocation2 + $0x69] sm:$0xff] %vm1036_vm2, %v1011_v43  ;;  %v3153_v10 = vpop.f32.mrf.mxu0  ;;  %v1382_v16 = vadd.f32 %v1350_v62, %v1282_v60  ;;  %v1381_v28 = vadd.f32 %v1349_v12, %v1281_v11  ;;  %v3915_v35 = vrot.slane %v3850_v61, %v1748_v20  ;;  %v3017_v37 = vmul.f32 -1.442695, %v3901_v1  ;;  %v1217_v62 = vld [vmem:[#allocation2 + $0x31] sm:$0xff] }
 0x10a   : > { %v1116_v0 = vld [vmem:[#allocation2 + $0x20] sm:$0xff]  ;;  %3276 = vrcp.f32 %v922_v53  ;;  %v760_v21 = vmul.f32 %v3153_v10, %v3764_v52  ;;  %v3905_v23 = vadd.f32 %v3769_v54, %v757_v8  ;;  %v1151_v41 = vmul.f32 %v3857_v24, %v1115_v57  ;;  %v1118_v20 = vld [vmem:[#allocation2 + $0x38] sm:$0xff] }
 0x10b   : > { %v1450_v18 = vmul.f32 %v3889_v6, %v1116_v0  ;;  %3278 = vpow2.f32 %v3011_v2  ;;  %v1216_v30 = vld [vmem:[#allocation2 + $0x21] sm:$0xff]  ;;  %v1251_v42 = vmul.f32 %v3860_v5, %v1215_v27  ;;  %v674_v46 = vpop.f32.mrf.mxu0  ;;  %v3926_v53 = vrot.slane %v3850_v61, %v1848_v25 }
 0x10c   : > { %3280 = vpow2.f32 %v3014_v7  ;;  %5311 = vst [vmem:[#allocation5_spill] sm:$0xff] %v3905_v23  ;;  %v1315_v36 = vld [vmem:[#allocation2 + $0x1a] sm:$0xff]  ;;  %v3919_v39 = vadd.f32 %v3769_v54, %v760_v21  ;;  %v1550_v43 = vmul.f32 %v3910_v9, %v1216_v30  ;;  %v3015_v45 = vmul.f32 -1.442695, %v3905_v23  ;;  %v1316_v59 = vld [vmem:[#allocation2 + $0x22] sm:$0xff] }
 0x10d   : > { %v1482_v33 = vadd.f32 %v1450_v18, %v1382_v16  ;;  %v3267_v40 = vpop.eup %3266  ;;  %5313 = vst [vmem:[#allocation7_spill] sm:$0xff] %v3926_v53  ;;  %v1481_v17 = vadd.f32 %v1449_v29, %v1381_v28  ;;  %v1152_v56 = vmul.f32 %v3857_v24, %v1116_v0  ;;  %v1252_v58 = vmul.f32 %v3860_v5, %v1216_v30  ;;  %v1218_v28 = vld [vmem:[#allocation2 + $0x39] sm:$0xff] }
 0x10e   : > { %5312 = vst [vmem:[#allocation6_spill] sm:$0xff] %v3919_v39  ;;  %v3931_v63 = vrot.slane %v3850_v61, %v1647_v32  ;;  %v1351_v2 = vmul.f32 %v3876_v50, %v1315_v36  ;;  %3282 = vpow2.f32 %v3012_v34  ;;  %v1549_v8 = vmul.f32 %v3910_v9, %v1215_v27  ;;  %v1317_v34 = vld [vmem:[#allocation2 + $0x32] sm:$0xff] }
 0x10f   : > { %v3269_v13 = vpop.eup %3268  ;;  %v1582_v3 = vadd.f32 %v1550_v43, %v1482_v33  ;;  %3284 = vpow2.f32 %v3017_v37  ;;  %v3936_v10 = vmul.f32 -1.442695, %v3919_v39  ;;  %v3939_v0 = vmul.f32 %v3764_v52, %v674_v46  ;;  %v4023_v39 = vld [vmem:[%s5267_s6] ss:$0 sm:$0xff] }
 0x110   : > { %v1153_v12 = vmul.f32 %v3857_v24, %v1117_v47  ;;  %v1283_v14 = vadd.f32 %v1251_v42, %v1151_v41  ;;  %v1650_v61 = vmul.f32 %v3931_v63, %v1316_v59  ;;  %3286 = vpow2.f32 %v3015_v45 }
 0x111   : > { %v3271_v60 = vpop.eup %3270  ;;  %v1253_v16 = vmul.f32 %v3860_v5, %v1217_v62  ;;  %v1581_v18 = vadd.f32 %v1549_v8, %v1481_v17  ;;  %v1284_v21 = vadd.f32 %v1252_v58, %v1152_v56  ;;  %v1649_v25 = vmul.f32 %v3931_v63, %v1315_v36  ;;  %v1318_v58 = vld [vmem:[#allocation2 + $0x3a] sm:$0xff] }
 0x112   : > { %v1451_v27 = vmul.f32 %v3889_v6, %v1117_v47  ;;  %v1383_v29 = vadd.f32 %v1351_v2, %v1283_v14  ;;  %v1682_v30 = vadd.f32 %v1650_v61, %v1582_v3  ;;  %v1009_v32 = vmul.f32 %v3267_v40, %v3809_v22  ;;  %v1221_v14 = vld [vmem:[#allocation2 + $0x61] sm:$0xff]  ;;  %v1219_v61 = vld [vmem:[#allocation2 + $0x49] sm:$0xff] }
 0x113   : > { %v3273_v7 = vpop.eup %3272  ;;  %v1551_v33 = vmul.f32 %v3910_v9, %v1217_v62  ;;  %v1352_v37 = vmul.f32 %v3876_v50, %v1316_v59  ;;  %v1014_v41 = vmul.f32 %v3269_v13, %v3813_v26  ;;  %v1012_v42 = vmul.f32 %v3271_v60, %v3817_v31  ;;  %v1119_v31 = vld [vmem:[#allocation2 + $0x48] sm:$0xff] }
 0x114   : > { %v1751_v45 = vmul.f32 %v3915_v35, %v1118_v20  ;;  %1084 = vst.msk [vmem:[#allocation2 + $0x51] sm:$0xff] %vm1036_vm2, %v1009_v32  ;;  %v1015_v36 = vmul.f32 %v3273_v7, %v3823_v38  ;;  %v1154_v17 = vmul.f32 %v3857_v24, %v1118_v20  ;;  %v1254_v56 = vmul.f32 %v3860_v5, %v1218_v28 }
 0x115   : > { %v3275_v11 = vpop.eup %3274  ;;  %v1384_v26 = vadd.f32 %v1352_v37, %v1284_v21  ;;  %v1681_v13 = vadd.f32 %v1649_v25, %v1581_v18  ;;  %1089 = vst.msk [vmem:[#allocation2 + $0x91] sm:$0xff] %vm1036_vm2, %v1014_v41  ;;  %1087 = vst.msk [vmem:[#allocation2 + $0x79] sm:$0xff] %vm1036_vm2, %v1012_v42  ;;  %v1750_v59 = vmul.f32 %v3915_v35, %v1117_v47 }
 0x116   : > { %v1013_v46 = vmul.f32 %v3275_v11, %v3828_v44  ;;  %v1353_v38 = vmul.f32 %v3876_v50, %v1317_v34  ;;  %v1483_v44 = vadd.f32 %v1451_v27, %v1383_v29  ;;  %v1783_v60 = vadd.f32 %v1751_v45, %v1682_v30  ;;  %1090 = vst.msk [vmem:[#allocation2 + $0x99] sm:$0xff] %vm1036_vm2, %v1015_v36  ;;  %v1121_v11 = vld [vmem:[#allocation2 + $0x60] sm:$0xff] }
 0x117   : > { %v3277_v57 = vpop.eup %3276  ;;  %v1850_v2 = vmul.f32 %v3926_v53, %v1217_v62  ;;  %v1452_v3 = vmul.f32 %v3889_v6, %v1118_v20  ;;  %v1354_v8 = vmul.f32 %v3876_v50, %v1318_v58  ;;  %v1851_v47 = vmul.f32 %v3926_v53, %v1218_v28 }
 0x118   : > { %v3279_v43 = vpop.eup %3278  ;;  %v1018_v22 = vmul.f32 %v3277_v57, %v3832_v48  ;;  %1088 = vst.msk [vmem:[#allocation2 + $0x81] sm:$0xff] %vm1036_vm2, %v1013_v46  ;;  %v1285_v48 = vadd.f32 %v1253_v16, %v1153_v12  ;;  %v1453_v57 = vmul.f32 %v3889_v6, %v1119_v31  ;;  %v3977_v12 = vld [vmem:[%s5265_s4 + $0x8] ss:$0 sm:$0xff]  ;;  %v1286_v62 = vadd.f32 %v1254_v56, %v1154_v17 }
 0x119   : > { %v3281_v40 = vpop.eup %3280  ;;  %v3967_v7 = vadd.f32 1.0, %v3279_v43  ;;  %v1552_v16 = vmul.f32 %v3910_v9, %v1218_v28  ;;  %v1484_v20 = vadd.f32 %v1452_v3, %v1384_v26  ;;  %v1782_v21 = vadd.f32 %v1750_v59, %v1681_v13  ;;  %v1122_v3 = vld [vmem:[#allocation2 + $0x68] sm:$0xff] }
 0x11a   : > { %1093 = vst.msk [vmem:[#allocation2 + $0xc1] sm:$0xff] %vm1036_vm2, %v1018_v22  ;;  %v3972_v18 = vadd.f32 1.0, %v3281_v40  ;;  %v1385_v25 = vadd.f32 %v1353_v38, %v1285_v48  ;;  %v1651_v27 = vmul.f32 %v3931_v63, %v1317_v34  ;;  %v1883_v29 = vadd.f32 %v1851_v47, %v1783_v60 }
 0x11b   : > { %v1583_v30 = vadd.f32 %v1551_v33, %v1483_v44  ;;  %v3981_v32 = vpop.eup %3282  ;;  %v1157_v37 = vmul.f32 %v3857_v24, %v1121_v11  ;;  %v1257_v41 = vmul.f32 %v3860_v5, %v1221_v14  ;;  %v1155_v42 = vmul.f32 %v3857_v24, %v1119_v31  ;;  %v1120_v45 = vld [vmem:[#allocation2 + $0x50] sm:$0xff] }
 0x11c   : > { %v1255_v43 = vmul.f32 %v3860_v5, %v1219_v61  ;;  %v3987_v36 = vpop.eup %3284  ;;  %v1652_v28 = vmul.f32 %v3931_v63, %v1318_v58  ;;  %v1950_v46 = vmul.f32 %v3977_v12, %v1317_v34  ;;  %v1951_v22 = vmul.f32 %v3977_v12, %v1318_v58  ;;  %v1319_v26 = vld [vmem:[#allocation2 + $0x4a] sm:$0xff] }
 0x11d   : > { %v1485_v33 = vadd.f32 %v1453_v57, %v1385_v25  ;;  %v3992_v40 = vpop.eup %3286  ;;  %v1386_v17 = vadd.f32 %v1354_v8, %v1286_v62  ;;  %v1882_v56 = vadd.f32 %v1850_v2, %v1782_v21  ;;  %v1454_v13 = vmul.f32 %v3889_v6, %v1120_v45  ;;  %v1222_v25 = vld [vmem:[#allocation2 + $0x69] sm:$0xff]  ;;  %v1220_v21 = vld [vmem:[#allocation2 + $0x51] sm:$0xff] }
 0x11e   : > { %v1584_v59 = vadd.f32 %v1552_v16, %v1484_v20  ;;  %v1983_v38 = vadd.f32 %v1951_v22, %v1883_v29  ;;  %v1455_v44 = vmul.f32 %v3889_v6, %v1121_v11  ;;  %v1553_v60 = vmul.f32 %v3910_v9, %v1219_v61  ;;  %v1321_v8 = vld [vmem:[#allocation2 + $0x62] sm:$0xff] }
 0x11f   : > { %v1683_v48 = vadd.f32 %v1651_v27, %v1583_v30  ;;  %v1289_v47 = vadd.f32 %v1257_v41, %v1157_v37  ;;  %v1555_v34 = vmul.f32 %v3910_v9, %v1221_v14  ;;  %v1754_v58 = vmul.f32 %v3915_v35, %v1121_v11  ;;  %v4005_v27 = vld [vmem:[%s5266_s5] ss:$0 sm:$0xff] }
 0x120   : > { %v1287_v57 = vadd.f32 %v1255_v43, %v1155_v42  ;;  %v1585_v2 = vadd.f32 %v1553_v60, %v1485_v33  ;;  %v1752_v62 = vmul.f32 %v3915_v35, %v1119_v31  ;;  %v1355_v16 = vmul.f32 %v3876_v50, %v1319_v26  ;;  %v1322_v43 = vld [vmem:[#allocation2 + $0x6a] sm:$0xff] }
 0x121   : > { %v1653_v20 = vmul.f32 %v3931_v63, %v1319_v26  ;;  %v1982_v29 = vadd.f32 %v1950_v46, %v1882_v56  ;;  %v1158_v30 = vmul.f32 %v3857_v24, %v1122_v3  ;;  %v1486_v11 = vadd.f32 %v1454_v13, %v1386_v17  ;;  %v1320_v17 = vld [vmem:[#allocation2 + $0x52] sm:$0xff] }
 0x122   : > { %v1684_v37 = vadd.f32 %v1652_v28, %v1584_v59  ;;  %v2022_v41 = vmul.f32 %v4005_v27, %v1983_v38  ;;  %v1784_v42 = vadd.f32 %v1752_v62, %v1683_v48  ;;  %v1258_v31 = vmul.f32 %v3860_v5, %v1222_v25 }
 0x123   : > { %v1357_v22 = vmul.f32 %v3876_v50, %v1321_v8  ;;  %v1156_v33 = vmul.f32 %v3857_v24, %v1120_v45  ;;  %v1256_v46 = vmul.f32 %v3860_v5, %v1220_v21  ;;  %v1554_v56 = vmul.f32 %v3910_v9, %v1220_v21 }
 0x124   : > { %v1753_v60 = vmul.f32 %v3915_v35, %v1120_v45  ;;  %v1854_v15 = vmul.f32 %v3926_v53, %v1221_v14  ;;  %v1852_v28 = vmul.f32 %v3926_v53, %v1219_v61  ;;  %v1387_v13 = vadd.f32 %v1355_v16, %v1287_v57 }
 0x125   : > { %v1685_v59 = vadd.f32 %v1653_v20, %v1585_v2  ;;  %v1358_v38 = vmul.f32 %v3876_v50, %v1322_v43  ;;  %v1456_v48 = vmul.f32 %v3889_v6, %v1122_v3  ;;  %v1586_v62 = vadd.f32 %v1554_v56, %v1486_v11  ;;  %v4030_v20 = vld [vmem:[#allocation2 + $0x78] sm:$0xff] }
 0x126   : > { %v1785_v51 = vadd.f32 %v1753_v60, %v1684_v37  ;;  %v2021_v4 = vmul.f32 %v4005_v27, %v1982_v29  ;;  %v1884_v45 = vadd.f32 %v1852_v28, %v1784_v42  ;;  %v1290_v14 = vadd.f32 %v1258_v31, %v1158_v30 }
 0x127   : > { %v1389_v23 = vadd.f32 %v1357_v22, %v1289_v47  ;;  %v4026_v61 = vadd.f32 %v4023_v39, %v2022_v41  ;;  %v1288_v57 = vadd.f32 %v1256_v46, %v1156_v33  ;;  %v1654_v2 = vmul.f32 %v3931_v63, %v1320_v17 }
 0x128   : > { %v1853_v16 = vmul.f32 %v3926_v53, %v1220_v21  ;;  %v1556_v29 = vmul.f32 %v3910_v9, %v1222_v25  ;;  %v1655_v11 = vmul.f32 %v3931_v63, %v1321_v8  ;;  %v1487_v37 = vadd.f32 %v1455_v44, %v1387_v13 }
 0x129   : > { %5314 = vst [vmem:[#allocation8_spill] sm:$0xff] %v4026_v61  ;;  %v1786_v56 = vadd.f32 %v1754_v58, %v1685_v59  ;;  %v1356_v42 = vmul.f32 %v3876_v50, %v1320_v17  ;;  %v1686_v30 = vadd.f32 %v1654_v2, %v1586_v62  ;;  %v1952_v41 = vmul.f32 %v3977_v12, %v1319_v26  ;;  %v4047_v2 = vld [vmem:[#allocation2 + $0x79] sm:$0xff] }
 0x12a   : > { %v1885_v47 = vadd.f32 %v1853_v16, %v1785_v51  ;;  %v4037_v31 = vadd.f32 %v4023_v39, %v2021_v4  ;;  %v1656_v22 = vmul.f32 %v3931_v63, %v1322_v43  ;;  %v1755_v21 = vmul.f32 %v3915_v35, %v1122_v3 }
 0x12b   : > { %v1457_v33 = vmul.f32 %v3889_v6, %v4030_v20  ;;  %v3035_v46 = vmul.f32 -1.442695, %v4026_v61  ;;  %v1388_v44 = vadd.f32 %v1356_v42, %v1288_v57  ;;  %v1953_v58 = vmul.f32 %v3977_v12, %v1320_v17 }
 0x12c   : > { %v1984_v60 = vadd.f32 %v1952_v41, %v1884_v45  ;;  %v1390_v28 = vadd.f32 %v1358_v38, %v1290_v14  ;;  %v1855_v51 = vmul.f32 %v3926_v53, %v1222_v25  ;;  %v1886_v26 = vadd.f32 %v1854_v15, %v1786_v56  ;;  %v4059_v14 = vld [vmem:[#allocation2 + $0x7a] sm:$0xff] }
 0x12d   : > { %v1587_v13 = vadd.f32 %v1555_v34, %v1487_v37  ;;  %v1954_v4 = vmul.f32 %v3977_v12, %v1321_v8  ;;  %v1787_v59 = vadd.f32 %v1755_v21, %v1686_v30  ;;  %v1985_v62 = vadd.f32 %v1953_v58, %v1885_v47  ;;  %v4054_v34 = vld [vmem:[#allocation2 + $0x80] sm:$0xff]  ;;  %v4089_v58 = vld [vmem:[#allocation2 + $0x98] sm:$0xff] }
 0x12e   : > { %v921_v3 = vadd.f32 1.0, %v3981_v32  ;;  %v1955_v16 = vmul.f32 %v3977_v12, %v1322_v43  ;;  %v1489_v61 = vadd.f32 %v1457_v33, %v1389_v23  ;;  %3288 = vrcp.f32 %v3967_v7  ;;  %v4064_v43 = vld [vmem:[#allocation2 + $0x81] sm:$0xff] }
 0x12f   : > { %v926_v17 = vadd.f32 1.0, %v3987_v36  ;;  %3290 = vpow2.f32 %v3035_v46  ;;  %v1488_v38 = vadd.f32 %v1456_v48, %v1388_v44  ;;  %v2023_v15 = vmul.f32 %v4005_v27, %v1984_v60 }
 0x130   : > { %v924_v25 = vadd.f32 1.0, %v3992_v40  ;;  %v1986_v8 = vadd.f32 %v1954_v4, %v1886_v26  ;;  %v1557_v45 = vmul.f32 %v3910_v9, %v4047_v2  ;;  %v1687_v32 = vadd.f32 %v1655_v11, %v1587_v13 }
 0x131   : > { %3292 = vrcp.f32 %v3972_v18  ;;  %v3034_v23 = vmul.f32 -1.442695, %v4037_v31  ;;  %v1887_v7 = vadd.f32 %v1855_v51, %v1787_v59  ;;  %v2024_v36 = vmul.f32 %v4005_v27, %v1985_v62  ;;  %v4073_v18 = vld [vmem:[#allocation2 + $0x82] sm:$0xff] }
 0x132   : > { %3294 = vrcp.f32 %v921_v3  ;;  %v1589_v48 = vadd.f32 %v1557_v45, %v1489_v61  ;;  %v1756_v40 = vmul.f32 %v3915_v35, %v4030_v20  ;;  %v1458_v57 = vmul.f32 %v3889_v6, %v4054_v34  ;;  %v4078_v61 = vld [vmem:[#allocation2 + $0x90] sm:$0xff] }
 0x133   : > { %3296 = vrcp.f32 %v926_v17  ;;  %v4071_v11 = vadd.f32 %v4023_v39, %v2023_v15  ;;  %v1588_v37 = vadd.f32 %v1556_v29, %v1488_v38  ;;  %v1657_v56 = vmul.f32 %v3931_v63, %v4059_v14  ;;  %v4101_v17 = vld [vmem:[#allocation2 + $0x91] sm:$0xff] }
 0x134   : > { %3298 = vrcp.f32 %v924_v25  ;;  %v2025_v42 = vmul.f32 %v4005_v27, %v1986_v8  ;;  %v1788_v30 = vadd.f32 %v1756_v40, %v1687_v32  ;;  %v1490_v47 = vadd.f32 %v1458_v57, %v1390_v28  ;;  %v4108_v25 = vld [vmem:[#allocation2 + $0x99] sm:$0xff] }
 0x135   : > { %v1558_v41 = vmul.f32 %v3910_v9, %v4064_v43  ;;  %v1987_v21 = vadd.f32 %v1955_v16, %v1887_v7  ;;  %v4083_v33 = vadd.f32 %v4023_v39, %v2024_v36  ;;  %v1688_v46 = vadd.f32 %v1656_v22, %v1588_v37  ;;  %v3156_v22 = vpop.f32.mrf.mxu0 }
 0x136   : > { %v1757_v29 = vmul.f32 %v3915_v35, %v4054_v34  ;;  %v1856_v44 = vmul.f32 %v3926_v53, %v4047_v2  ;;  %v1658_v28 = vmul.f32 %v3931_v63, %v4073_v18  ;;  %v1689_v51 = vadd.f32 %v1657_v56, %v1589_v48 }
 0x137   : > { %v1590_v60 = vadd.f32 %v1558_v41, %v1490_v47  ;;  %v1758_v26 = vmul.f32 %v3915_v35, %v4078_v61  ;;  %3300 = vpow2.f32 %v3936_v10  ;;  %v4097_v4 = vadd.f32 %v4023_v39, %v2025_v42  ;;  %v687_v57 = vpop.f32.mrf.mxu0  ;;  %v4123_v47 = vld [vmem:[#allocation2 + $0x92] sm:$0xff] }
 0x138   : > { %v1789_v13 = vadd.f32 %v1757_v29, %v1688_v46  ;;  %v3036_v59 = vmul.f32 -1.442695, %v4071_v11  ;;  %v1888_v62 = vadd.f32 %v1856_v44, %v1788_v30  ;;  %3302 = vpow2.f32 %v3034_v23  ;;  %v4133_v29 = vld [vmem:[#allocation2 + $0x9a] sm:$0xff] }
 0x139   : > { %v1690_v3 = vadd.f32 %v1658_v28, %v1590_v60  ;;  %v3037_v16 = vmul.f32 -1.442695, %v4083_v33  ;;  %v1759_v38 = vmul.f32 %v3915_v35, %v4089_v58  ;;  %v1857_v15 = vmul.f32 %v3926_v53, %v4064_v43 }
 0x13a   : > { %v2026_v10 = vmul.f32 %v4005_v27, %v1987_v21  ;;  %v1790_v8 = vadd.f32 %v1758_v26, %v1689_v51  ;;  %v1956_v45 = vmul.f32 %v3977_v12, %v4059_v14  ;;  %v4114_v32 = vadd.f32 %v3769_v54, %v3939_v0 }
 0x13b   : > { %v3289_v23 = vpop.eup %3288  ;;  %v1159_v7 = vmul.f32 %v3857_v24, %v4030_v20  ;;  %v1259_v36 = vmul.f32 %v3860_v5, %v4047_v2  ;;  %v1791_v48 = vadd.f32 %v1759_v38, %v1690_v3  ;;  %v1889_v40 = vadd.f32 %v1857_v15, %v1789_v13  ;;  %v3157_v15 = vpop.f32.mrf.mxu0 }
 0x13c   : > { %v3291_v37 = vpop.eup %3290  ;;  %3304 = vpow2.f32 %v3036_v59  ;;  %v3038_v56 = vmul.f32 -1.442695, %v4097_v4  ;;  %v1858_v42 = vmul.f32 %v3926_v53, %v4101_v17  ;;  %v1988_v30 = vadd.f32 %v1956_v45, %v1888_v62 }
 0x13d   : > { %3306 = vpow2.f32 %v3037_v16  ;;  %v1859_v20 = vmul.f32 %v3926_v53, %v4108_v25  ;;  %v1957_v2 = vmul.f32 %v3977_v12, %v4073_v18  ;;  %v763_v41 = vmul.f32 %v3156_v22, %v3764_v52 }
 0x13e   : > { %v3293_v0 = vpop.eup %3292  ;;  %v4131_v46 = vadd.f32 %v4023_v39, %v2026_v10  ;;  %v1359_v44 = vmul.f32 %v3876_v50, %v4059_v14  ;;  %v1890_v60 = vadd.f32 %v1858_v42, %v1790_v8  ;;  %v761_v28 = vmul.f32 %v3764_v52, %v687_v57  ;;  %v5315_v57 = vld [vmem:[#allocation5_spill] sm:$0xff] }
 0x13f   : > { %v3295_v21 = vpop.eup %3294  ;;  %v2189_v26 = vadd.f32 1.0, %v3291_v37  ;;  %v1291_v13 = vadd.f32 %v1259_v36, %v1159_v7  ;;  %v1891_v59 = vadd.f32 %v1859_v20, %v1791_v48  ;;  %v1989_v62 = vadd.f32 %v1957_v2, %v1889_v40 }
 0x140   : > { %v3297_v51 = vpop.eup %3296  ;;  %3308 = vpow2.f32 %v3038_v56  ;;  %v1958_v22 = vmul.f32 %v3977_v12, %v4123_v47  ;;  %v2027_v16 = vmul.f32 %v4005_v27, %v1988_v30  ;;  %v1016_v38 = vmul.f32 %v3289_v23, %v3873_v49  ;;  %v690_v30 = vpop.f32.mrf.mxu0 }
 0x141   : > { %v3299_v3 = vpop.eup %3298  ;;  %v1959_v14 = vmul.f32 %v3977_v12, %v4133_v29  ;;  %v1160_v10 = vmul.f32 %v3857_v24, %v4054_v34  ;;  %v1260_v8 = vmul.f32 %v3860_v5, %v4064_v43  ;;  %v1019_v45 = vmul.f32 %v3293_v0, %v3880_v55 }
 0x142   : > { %v3039_v7 = vmul.f32 -1.442695, %v4131_v46  ;;  %v1391_v36 = vadd.f32 %v1359_v44, %v1291_v13  ;;  %v1990_v48 = vadd.f32 %v1958_v22, %v1890_v60  ;;  %1091 = vst.msk [vmem:[#allocation2 + $0xa9] sm:$0xff] %vm1036_vm2, %v1016_v38  ;;  %v1017_v49 = vmul.f32 %v3295_v21, %v3897_v19 }
 0x143   : > { %v1991_v23 = vadd.f32 %v1959_v14, %v1891_v59  ;;  %v2028_v40 = vmul.f32 %v4005_v27, %v1989_v62  ;;  %1094 = vst.msk [vmem:[#allocation2 + $0xc9] sm:$0xff] %vm1036_vm2, %v1019_v45  ;;  %v1022_v34 = vmul.f32 %v3297_v51, %v3901_v1  ;;  %v1020_v37 = vmul.f32 %v3299_v3, %v5315_v57  ;;  %v3160_v62 = vpop.f32.mrf.mxu0 }
 0x144   : > { %v3301_v43 = vpop.eup %3300  ;;  %v1459_v55 = vmul.f32 %v3889_v6, %v4078_v61  ;;  %v4159_v56 = vadd.f32 %v4023_v39, %v2027_v16  ;;  %1092 = vst.msk [vmem:[#allocation2 + $0xb1] sm:$0xff] %vm1036_vm2, %v1017_v49  ;;  %v4163_v19 = vadd.f32 %v3769_v54, %v763_v41  ;;  %v4166_v42 = vadd.f32 %v3769_v54, %v761_v28 }
 0x145   : > { %3310 = vrcp.f32 %v2189_v26  ;;  %v1161_v1 = vmul.f32 %v3857_v24, %v4078_v61  ;;  %v1261_v0 = vmul.f32 %v3860_v5, %v4101_v17  ;;  %v1292_v20 = vadd.f32 %v1260_v8, %v1160_v10  ;;  %1097 = vst.msk [vmem:[#allocation2 + $0xf1] sm:$0xff] %vm1036_vm2, %v1022_v34  ;;  %1095 = vst.msk [vmem:[#allocation2 + $0xd9] sm:$0xff] %vm1036_vm2, %v1020_v37  ;;  %v3303_v2 = vpop.eup %3302  ;;  %v703_v34 = vpop.f32.mrf.mxu0 }
 0x146   : > { %3312 = vpow2.f32 %v3039_v7  ;;  %v1491_v41 = vadd.f32 %v1459_v55, %v1391_v36  ;;  %v2029_v21 = vmul.f32 %v4005_v27, %v1990_v48  ;;  %v4176_v54 = vmul.f32 -1.442695, %v4114_v32 }
 0x147   : > { %v1360_v44 = vmul.f32 %v3876_v50, %v4073_v18  ;;  %v2030_v61 = vmul.f32 %v4005_v27, %v1991_v23  ;;  %v4182_v60 = vadd.f32 %v4023_v39, %v2028_v40  ;;  %v764_v28 = vmul.f32 %v3157_v15, %v3764_v52 }
 0x148   : > { %v1559_v51 = vmul.f32 %v3910_v9, %v4101_v17  ;;  %v3040_v26 = vmul.f32 -1.442695, %v4159_v56  ;;  %v4188_v13 = vadd.f32 1.0, %v3301_v43  ;;  %v4191_v59 = vmul.f32 -1.442695, %v4163_v19 }
 0x149   : > { %v3305_v3 = vpop.eup %3304  ;;  %v2188_v18 = vadd.f32 1.0, %v3303_v2  ;;  %v1293_v22 = vadd.f32 %v1261_v0, %v1161_v1  ;;  %v1392_v16 = vadd.f32 %v1360_v44, %v1292_v20  ;;  %v4193_v38 = vld [vmem:[#allocation2 + $0xa8] sm:$0xff]  ;;  %v4196_v14 = vmul.f32 -1.442695, %v4166_v42 }
 0x14a   : > { %v3307_v52 = vpop.eup %3306  ;;  %v1162_v17 = vmul.f32 %v3857_v24, %v4089_v58  ;;  %v1361_v15 = vmul.f32 %v3876_v50, %v4123_v47  ;;  %v4203_v10 = vadd.f32 %v4023_v39, %v2029_v21  ;;  %v1591_v8 = vadd.f32 %v1559_v51, %v1491_v41 }
 0x14b   : > { %v1262_v45 = vmul.f32 %v3860_v5, %v4108_v25  ;;  %v1460_v7 = vmul.f32 %v3889_v6, %v4089_v58  ;;  %v4210_v36 = vadd.f32 %v4023_v39, %v2030_v61  ;;  %v3041_v48 = vmul.f32 -1.442695, %v4182_v60  ;;  %v4220_v58 = vld [vmem:[%s5264_s3] ss:$0 sm:$0xff]  ;;  %v4237_v61 = vld [vmem:[#allocation2 + $0xa9] sm:$0xff] }
 0x14c   : > { %v2190_v49 = vadd.f32 1.0, %v3305_v3  ;;  %v1659_v23 = vmul.f32 %v3931_v63, %v4123_v47  ;;  %3314 = vpow2.f32 %v3040_v26  ;;  %v1461_v40 = vmul.f32 %v3889_v6, %v4193_v38  ;;  %v4228_v47 = vld [vmem:[%s5263_s2] ss:$0 sm:$0xff]  ;;  %v3161_v26 = vpop.f32.mrf.mxu0 }
 0x14d   : > { %v3309_v57 = vpop.eup %3308  ;;  %v2191_v37 = vadd.f32 1.0, %v3307_v52  ;;  %v1492_v43 = vadd.f32 %v1460_v7, %v1392_v16  ;;  %v4223_v55 = vadd.f32 %v4220_v58, %v764_v28  ;;  %v4231_v1 = vmul.f32 %v4228_v47, %v690_v30 }
 0x14e   : > { %3316 = vrcp.f32 %v2188_v18  ;;  %v1393_v0 = vadd.f32 %v1361_v15, %v1293_v22  ;;  %v3042_v20 = vmul.f32 -1.442695, %v4203_v10  ;;  %v1691_v2 = vadd.f32 %v1659_v23, %v1591_v8  ;;  %v4251_v15 = vld [vmem:[#allocation2 + $0xb0] sm:$0xff] }
 0x14f   : > { %5316 = vst [vmem:[#allocation5_spill] sm:$0xff] %v4223_v55  ;;  %v1294_v41 = vadd.f32 %v1262_v45, %v1162_v17  ;;  %v1560_v21 = vmul.f32 %v3910_v9, %v4108_v25  ;;  %3318 = vpow2.f32 %v3041_v48  ;;  %v3043_v44 = vmul.f32 -1.442695, %v4210_v36 }
 0x150   : > { %v2192_v28 = vadd.f32 1.0, %v3309_v57  ;;  %3320 = vrcp.f32 %v2190_v49  ;;  %v1493_v51 = vadd.f32 %v1461_v40, %v1393_v0  ;;  %v1760_v30 = vmul.f32 %v3915_v35, %v4193_v38  ;;  %v5317_v57 = vld [vmem:[#allocation8_spill] sm:$0xff] }
 0x151   : > { %3322 = vrcp.f32 %v2191_v37  ;;  %v1592_v3 = vadd.f32 %v1560_v21, %v1492_v43  ;;  %v4242_v18 = vmul.f32 %v4228_v47, %v3160_v62  ;;  %v4245_v22 = vmul.f32 %v4228_v47, %v703_v34  ;;  %v4255_v62 = vld [vmem:[#allocation2 + $0xaa] sm:$0xff] }
 0x152   : > { %v3311_v25 = vpop.eup %3310  ;;  %v1362_v16 = vmul.f32 %v3876_v50, %v4133_v29  ;;  %3324 = vpow2.f32 %v3042_v20  ;;  %v1561_v52 = vmul.f32 %v3910_v9, %v4237_v61  ;;  %v1792_v17 = vadd.f32 %v1760_v30, %v1691_v2  ;;  %v4265_v34 = vld [vmem:[#allocation2 + $0xb1] sm:$0xff] }
 0x153   : > { %v3313_v8 = vpop.eup %3312  ;;  %v1660_v45 = vmul.f32 %v3931_v63, %v4133_v29  ;;  %3326 = vpow2.f32 %v3043_v44  ;;  %v4258_v7 = vmul.f32 -1.442695, %v4223_v55  ;;  %v4261_v48 = vmul.f32 %v4228_v47, %v3161_v26  ;;  %v4270_v29 = vld [vmem:[#allocation2 + $0xc0] sm:$0xff]  ;;  %v4289_v26 = vld [vmem:[#allocation2 + $0xc8] sm:$0xff] }
 0x154   : > { %3328 = vrcp.f32 %v2192_v28  ;;  %v1394_v49 = vadd.f32 %v1362_v16, %v1294_v41  ;;  %v1593_v23 = vadd.f32 %v1561_v52, %v1493_v51  ;;  %v1860_v40 = vmul.f32 %v3926_v53, %v4237_v61  ;;  %v4275_v41 = vld [vmem:[#allocation2 + $0xb2] sm:$0xff]  ;;  %v4280_v44 = vld [vmem:[#allocation2 + $0xc1] sm:$0xff] }
 0x155   : > { %v4268_v37 = vmul.f32 %v3311_v25, %v5317_v57  ;;  %v1462_v43 = vmul.f32 %v3889_v6, %v4251_v15  ;;  %v1692_v0 = vadd.f32 %v1660_v45, %v1592_v3  ;;  %3330 = vrcp.f32 %v4188_v13  ;;  %v4294_v16 = vld [vmem:[#allocation2 + $0xc2] sm:$0xff] }
 0x156   : > { %v2193_v20 = vadd.f32 1.0, %v3313_v8  ;;  %v1892_v2 = vadd.f32 %v1860_v40, %v1792_v17  ;;  %v1661_v21 = vmul.f32 %v3931_v63, %v4255_v62  ;;  %3332 = vpow2.f32 %v4176_v54 }
 0x157   : > { %5318 = vst [vmem:[#allocation8_spill] sm:$0xff] %v4268_v37  ;;  %v1494_v28 = vadd.f32 %v1462_v43, %v1394_v49  ;;  %v1562_v51 = vmul.f32 %v3910_v9, %v4265_v34  ;;  %v1761_v30 = vmul.f32 %v3915_v35, %v4251_v15  ;;  %3334 = vpow2.f32 %v4191_v59  ;;  %v4302_v49 = vld [vmem:[#allocation2 + $0xc9] sm:$0xff] }
 0x158   : > { %v1762_v13 = vmul.f32 %v3915_v35, %v4270_v29  ;;  %v1693_v3 = vadd.f32 %v1661_v21, %v1593_v23  ;;  %v1960_v54 = vmul.f32 %v3977_v12, %v4255_v62  ;;  %3336 = vpow2.f32 %v4196_v14 }
 0x159   : > { %v3315_v25 = vpop.eup %3314  ;;  %v1594_v52 = vadd.f32 %v1562_v51, %v1494_v28  ;;  %v1662_v17 = vmul.f32 %v3931_v63, %v4275_v41  ;;  %v1793_v8 = vadd.f32 %v1761_v30, %v1692_v0  ;;  %v1861_v59 = vmul.f32 %v3926_v53, %v4265_v34  ;;  %v4308_v30 = vld [vmem:[#allocation2 + $0xca] sm:$0xff] }
 0x15a   : > { %3338 = vrcp.f32 %v2193_v20  ;;  %v1862_v45 = vmul.f32 %v3926_v53, %v4280_v44  ;;  %v1794_v23 = vadd.f32 %v1762_v13, %v1693_v3  ;;  %v1992_v40 = vadd.f32 %v1960_v54, %v1892_v2 }
 0x15b   : > { %v3317_v14 = vpop.eup %3316  ;;  %v1763_v57 = vmul.f32 %v3915_v35, %v4289_v26  ;;  %v1694_v43 = vadd.f32 %v1662_v17, %v1594_v52  ;;  %v1893_v21 = vadd.f32 %v1861_v59, %v1793_v8  ;;  %v1961_v0 = vmul.f32 %v3977_v12, %v4275_v41 }
 0x15c   : > { %v3319_v28 = vpop.eup %3318  ;;  %v2194_v51 = vadd.f32 1.0, %v3315_v25  ;;  %v1962_v20 = vmul.f32 %v3977_v12, %v4294_v16  ;;  %v1894_v55 = vadd.f32 %v1862_v45, %v1794_v23  ;;  %v2031_v13 = vmul.f32 %v4005_v27, %v1992_v40  ;;  %v706_v40 = vpop.f32.mrf.mxu0 }
 0x15d   : > { %v3321_v2 = vpop.eup %3320  ;;  %v1863_v3 = vmul.f32 %v3926_v53, %v4302_v49  ;;  %v1795_v54 = vadd.f32 %v1763_v57, %v1694_v43  ;;  %v1993_v52 = vadd.f32 %v1961_v0, %v1893_v21  ;;  %v4317_v17 = vadd.f32 %v4220_v58, %v4231_v1  ;;  %v3224_v57 = vld [vmem:[%s5268_s7] sm:$0xff]  }
 0x15e   : > { %v3323_v8 = vpop.eup %3322  ;;  %v4320_v25 = vmul.f32 %v3317_v14, %v4037_v31  ;;  %v2317_v59 = vsel %vm1036_vm2, %v4268_v37, 0.0  ;;  %v1994_v45 = vadd.f32 %v1962_v20, %v1894_v55  ;;  %v4325_v23 = vadd.f32 %v4023_v39, %v2031_v13  ;;  %3167 = vmatpush3.bf16.msra.mxu0 %v3224_v57 }
 0x15f   : > { %5319 = vst [vmem:[#allocation9_spill] sm:$0xff] %v4317_v17  ;;  %v3325_v43 = vpop.eup %3324  ;;  %v2195_v21 = vadd.f32 1.0, %v3319_v28  ;;  %v1963_v1 = vmul.f32 %v3977_v12, %v4308_v30  ;;  %v1895_v0 = vadd.f32 %v1863_v3, %v1795_v54  ;;  %v2032_v31 = vmul.f32 %v4005_v27, %v1993_v52 }
 0x160   : > { %5320 = vst [vmem:[#allocation10_spill] sm:$0xff] %v4320_v25  ;;  %v3327_v14 = vpop.eup %3326  ;;  %v4334_v37 = vmul.f32 %v3321_v2, %v4071_v11  ;;  %3340 = vrcp.f32 %v2194_v51  ;;  %v2033_v55 = vmul.f32 %v4005_v27, %v1994_v45  ;;  %v3044_v20 = vmul.f32 -1.442695, %v4325_v23  ;;  %v3164_v45 = vpop.f32.mrf.mxu0 }
 0x161   : > { %v3329_v13 = vpop.eup %3328  ;;  %v1995_v53 = vadd.f32 %v1963_v1, %v1895_v0  ;;  %v4339_v28 = vadd.f32 %v4023_v39, %v2032_v31  ;;  %v4343_v12 = vadd.f32 %v4220_v58, %v4242_v18  ;;  %v766_v3 = vmul.f32 %v4228_v47, %v706_v40 }
 0x162   : > { %5321 = vst [vmem:[#allocation11_spill] sm:$0xff] %v4334_v37  ;;  %v3331_v54 = vpop.eup %3330  ;;  %v2316_v11 = vsel %vm1036_vm2, %v4320_v25, 0.0  ;;  %v2196_v51 = vadd.f32 1.0, %v3325_v43  ;;  %v4349_v2 = vadd.f32 %v4023_v39, %v2033_v55  ;;  %v4353_v52 = vadd.f32 %v4220_v58, %v4245_v22 }
 0x163   : > { %v3333_v57 = vpop.eup %3332  ;;  %v2318_v1 = vadd.f32 %v2317_v59, %v2316_v11  ;;  %v2197_v0 = vadd.f32 1.0, %v3327_v14  ;;  %3342 = vrcp.f32 %v2195_v21  ;;  %v2034_v18 = vmul.f32 %v4005_v27, %v1995_v53  ;;  %v719_v14 = vpop.f32.mrf.mxu0 }
 0x164   : > { %5322 = vst [vmem:[#allocation12_spill] sm:$0xff] %v4349_v2  ;;  %v3335_v40 = vpop.eup %3334  ;;  %v4357_v31 = vmul.f32 %v3323_v8, %v4083_v33  ;;  %v2319_v43 = vsel %vm1036_vm2, %v4334_v37, 0.0  ;;  %3344 = vpow2.f32 %v3044_v20  ;;  %v3045_v55 = vmul.f32 -1.442695, %v4339_v28 }
 0x165   : > { %v3337_v25 = vpop.eup %3336  ;;  %v4363_v22 = vadd.f32 %v4023_v39, %v2034_v18  ;;  %v3046_v59 = vmul.f32 -1.442695, %v4349_v2  ;;  %v3020_v21 = vmul.f32 -1.442695, %v4317_v17  ;;  %v4369_v53 = vadd.f32 %v4220_v58, %v4261_v48  ;;  %v5324_v18 = vld [vmem:[#allocation6_spill] sm:$0xff] }
 0x166   : > { %5323 = vst [vmem:[#allocation13_spill] sm:$0xff] %v4357_v31  ;;  %3346 = vrcp.f32 %v2196_v51  ;;  %v1165_v27 = vmul.f32 %v3857_v24, %v4270_v29  ;;  %v1265_v33 = vmul.f32 %v3860_v5, %v4280_v44  ;;  %v771_v8 = vmul.f32 %v4228_v47, %v3164_v45 }
 0x167   : > { %v3339_v39 = vpop.eup %3338  ;;  %v2320_v20 = vadd.f32 %v2319_v43, %v2318_v1  ;;  %3348 = vrcp.f32 %v2197_v0  ;;  %v1163_v11 = vmul.f32 %v3857_v24, %v4193_v38  ;;  %v1023_v37 = vmul.f32 %v3331_v54, %v5324_v18 }
 0x168   : > { %v2321_v48 = vsel %vm1036_vm2, %v4357_v31, 0.0  ;;  %3350 = vpow2.f32 %v3045_v55  ;;  %v925_v51 = vadd.f32 1.0, %v3333_v57  ;;  %v930_v17 = vadd.f32 1.0, %v3335_v40  ;;  %v3165_v57 = vpop.f32.mrf.mxu0 }
 0x169   : > { %v1263_v2 = vmul.f32 %v3860_v5, %v4237_v61  ;;  %3352 = vpow2.f32 %v3046_v59  ;;  %v3047_v45 = vmul.f32 -1.442695, %v4363_v22  ;;  %1098 = vst.msk [vmem:[#allocation2 + $0xf9] sm:$0xff] %vm1036_vm2, %v1023_v37  ;;  %v928_v1 = vadd.f32 1.0, %v3337_v25 }
 0x16a   : > { %v4386_v0 = vmul.f32 %v3329_v13, %v4097_v4  ;;  %v1463_v38 = vmul.f32 %v3889_v6, %v4270_v29  ;;  %3354 = vrcp.f32 %v925_v51  ;;  %v4391_v54 = vadd.f32 %v4220_v58, %v766_v3  ;;  %v722_v59 = vpop.f32.mrf.mxu0 }
 0x16b   : > { %v2322_v40 = vadd.f32 %v2321_v48, %v2320_v20  ;;  %v1297_v43 = vadd.f32 %v1265_v33, %v1165_v27  ;;  %3356 = vrcp.f32 %v930_v17  ;;  %v4394_v61 = vmul.f32 %v3339_v39, %v4131_v46 }
 0x16c   : > { %5325 = vst [vmem:[#allocation6_spill] sm:$0xff] %v4386_v0  ;;  %v1363_v37 = vmul.f32 %v3876_v50, %v4255_v62  ;;  %3358 = vrcp.f32 %v928_v1  ;;  %v3025_v4 = vmul.f32 -1.442695, %v4343_v12  ;;  %v5327_v25 = vmov 0.0  }
 0x16d   : > { %5326 = vst [vmem:[#allocation14_spill] sm:$0xff] %v4394_v61  ;;  %3168 = vmatprep.mubr.msk.bf16.mxu0 %vm3536_vm5, %v5327_v25  ;;  %3174 = vmatprep.mubr.msk.bf16.mxu1 %vm3536_vm5, %v5327_v25  ;;  %v3341_v29 = vpop.eup %3340  ;;  %v1295_v13 = vadd.f32 %v1263_v2, %v1163_v11  ;;  %3360 = vpow2.f32 %v3047_v45  ;;  %v3023_v3 = vmul.f32 -1.442695, %v4353_v52  ;;  %v4403_v17 = vadd.f32 %v4220_v58, %v771_v8 }
 0x16e   : > { %v2323_v46 = vsel %vm1036_vm2, %v4386_v0, 0.0  ;;  %v1164_v62 = vmul.f32 %v3857_v24, %v4251_v15  ;;  %v1264_v55 = vmul.f32 %v3860_v5, %v4265_v34  ;;  %3362 = vpow2.f32 %v4258_v7 }
 0x16f   : > { %v2324_v27 = vadd.f32 %v2323_v46, %v2322_v40  ;;  %3364 = vpow2.f32 %v3020_v21  ;;  %v769_v2 = vmul.f32 %v4228_v47, %v719_v14  ;;  %v772_v33 = vmul.f32 %v4228_v47, %v3165_v57 }
 0x170   : > { %v3343_v8 = vpop.eup %3342  ;;  %v4415_v39 = vmul.f32 %v3341_v29, %v4159_v56  ;;  %v2325_v20 = vsel %vm1036_vm2, %v4394_v61, 0.0  ;;  %v1395_v15 = vadd.f32 %v1363_v37, %v1295_v13  ;;  %3366 = vpow2.f32 %v3025_v4  ;;  %v4444_v29 = vld [vmem:[#allocation2 + $0xf0] sm:$0xff]  ;;  %v5338_v61 = vld [vmem:[#allocation5_spill] sm:$0xff] }
 0x171   : > { %v3345_v11 = vpop.eup %3344  ;;  %v1166_v7 = vmul.f32 %v3857_v24, %v4289_v26  ;;  %v1266_v34 = vmul.f32 %v3860_v5, %v4302_v49  ;;  %3368 = vpow2.f32 %v3023_v3  ;;  %v770_v21 = vmul.f32 %v4228_v47, %v722_v59 }
 0x172   : > { %5328 = vst [vmem:[#allocation15_spill] sm:$0xff] %v4415_v39  ;;  %v1563_v14 = vmul.f32 %v3910_v9, %v4280_v44  ;;  %v1365_v56 = vmul.f32 %v3876_v50, %v4294_v16  ;;  %v1296_v18 = vadd.f32 %v1264_v55, %v1164_v62  ;;  %v4429_v48 = vmul.f32 -1.442695, %v4369_v53 }
 0x173   : > { %v3347_v51 = vpop.eup %3346  ;;  %v4432_v45 = vmul.f32 %v3343_v8, %v4182_v60  ;;  %v2326_v1 = vadd.f32 %v2325_v20, %v2324_v27  ;;  %v4435_v57 = vmul.f32 -1.442695, %v4391_v54  ;;  %v4438_v47 = vmul.f32 -1.442695, %v4403_v17  ;;  %v4446_v60 = vld [vmem:[#allocation2 + $0xf1] sm:$0xff] }
 0x174   : > { %v3349_v40 = vpop.eup %3348  ;;  %v2327_v44 = vsel %vm1036_vm2, %v4415_v39, 0.0  ;;  %v1364_v37 = vmul.f32 %v3876_v50, %v4275_v41  ;;  %v1495_v4 = vadd.f32 %v1463_v38, %v1395_v15  ;;  %v2198_v25 = vadd.f32 1.0, %v3345_v11  ;;  %v1131_v11 = vld [vmem:[#allocation2 + $0xd8] sm:$0xff] }
 0x175   : > { %5329 = vst [vmem:[#allocation16_spill] sm:$0xff] %v4432_v45  ;;  %v3351_v13 = vpop.eup %3350  ;;  %v1298_v3 = vadd.f32 %v1266_v34, %v1166_v7  ;;  %v4449_v46 = vadd.f32 %v4220_v58, %v769_v2  ;;  %v4452_v62 = vadd.f32 %v4220_v58, %v772_v33  ;;  %v4455_v55 = vadd.f32 %v4220_v58, %v770_v21 }
 0x176   : > { %v3353_v59 = vpop.eup %3352  ;;  %v1366_v41 = vmul.f32 %v3876_v50, %v4308_v30  ;;  %v1397_v38 = vadd.f32 %v1365_v56, %v1297_v43  ;;  %v1464_v27 = vmul.f32 %v3889_v6, %v4289_v26  ;;  %v1396_v8 = vadd.f32 %v1364_v37, %v1296_v18 }
 0x177   : > { %v3355_v20 = vpop.eup %3354  ;;  %v2328_v15 = vadd.f32 %v2327_v44, %v2326_v1  ;;  %v2329_v2 = vsel %vm1036_vm2, %v4432_v45, 0.0  ;;  %v1169_v33 = vmul.f32 %v3857_v24, %v4444_v29  ;;  %v1269_v58 = vmul.f32 %v3860_v5, %v4446_v60 }
 0x178   : > { %v3357_v7 = vpop.eup %3356  ;;  %v2199_v34 = vadd.f32 1.0, %v3351_v13  ;;  %3370 = vrcp.f32 %v2198_v25  ;;  %v1595_v43 = vadd.f32 %v1563_v14, %v1495_v4  ;;  %v1021_v21 = vmul.f32 %v3355_v20, %v4114_v32  ;;  %v1231_v4 = vld [vmem:[#allocation2 + $0xd9] sm:$0xff] }
 0x179   : > { %v3359_v26 = vpop.eup %3358  ;;  %v4468_v56 = vadd.f32 %v1366_v41, %v1298_v3  ;;  %v1564_v18 = vmul.f32 %v3910_v9, %v4302_v49  ;;  %v1663_v1 = vmul.f32 %v3931_v63, %v4294_v16  ;;  %v1026_v44 = vmul.f32 %v3357_v7, %v4163_v19 }
 0x17a   : > { %v3361_v37 = vpop.eup %3360  ;;  %v4476_v45 = vmul.f32 %v3347_v51, %v4203_v10  ;;  %v1664_v14 = vmul.f32 %v3931_v63, %v4308_v30  ;;  %v1465_v32 = vmul.f32 %v3889_v6, %v1131_v11  ;;  %1096 = vst.msk [vmem:[#allocation2 + $0xe1] sm:$0xff] %vm1036_vm2, %v1021_v21  ;;  %v1024_v25 = vmul.f32 %v3359_v26, %v4166_v42 }
 0x17b   : > { %v3363_v49 = vpop.eup %3362  ;;  %v4484_v13 = vmul.f32 %v3349_v40, %v4210_v36  ;;  %v2330_v16 = vadd.f32 %v2329_v2, %v2328_v15  ;;  %v1496_v19 = vadd.f32 %v1464_v27, %v1396_v8  ;;  %v4488_v10 = vmul.f32 %v3889_v6, %v4444_v29  ;;  %1101 = vst.msk [vmem:[#allocation2 + $0x121] sm:$0xff] %vm1036_vm2, %v1026_v44 }
 0x17c   : > { %5330 = vst [vmem:[#allocation17_spill] sm:$0xff] %v4476_v45  ;;  %v3365_v30 = vpop.eup %3364  ;;  %v2200_v51 = vadd.f32 1.0, %v3353_v59  ;;  %3372 = vrcp.f32 %v2199_v34  ;;  %v4491_v3 = vadd.f32 %v1269_v58, %v1169_v33  ;;  %v1695_v41 = vadd.f32 %v1663_v1, %v1595_v43  ;;  %1099 = vst.msk [vmem:[#allocation2 + $0x109] sm:$0xff] %vm1036_vm2, %v1024_v25 }
 0x17d   : > { %5331 = vst [vmem:[#allocation18_spill] sm:$0xff] %v4484_v13  ;;  %v3367_v42 = vpop.eup %3366  ;;  %v2201_v20 = vadd.f32 1.0, %v3361_v37  ;;  %v4496_v36 = vmul.f32 %v3910_v9, %v4446_v60  ;;  %v1167_v40 = vmul.f32 %v3857_v24, %v1131_v11  ;;  %v1267_v27 = vmul.f32 %v3860_v5, %v1231_v4 }
 0x17e   : > { %v3369_v8 = vpop.eup %3368  ;;  %v2331_v59 = vsel %vm1036_vm2, %v4476_v45, 0.0  ;;  %v1497_v15 = vadd.f32 %v1465_v32, %v1397_v38  ;;  %v1764_v2 = vmul.f32 %v3915_v35, %v1131_v11  ;;  %v931_v33 = vadd.f32 1.0, %v3363_v49  ;;  %v5332_v38 = vld [vmem:[#allocation7_spill] sm:$0xff] }
 0x17f   : > { %v2332_v58 = vadd.f32 %v2331_v59, %v2330_v16  ;;  %v2333_v7 = vsel %vm1036_vm2, %v4484_v13, 0.0  ;;  %v1565_v34 = vmul.f32 %v3910_v9, %v1231_v4  ;;  %v929_v43 = vadd.f32 1.0, %v3365_v30 }
 0x180   : > { %3374 = vrcp.f32 %v2200_v51  ;;  %v1796_v21 = vadd.f32 %v1764_v2, %v1695_v41  ;;  %v1596_v26 = vadd.f32 %v1564_v18, %v1496_v19  ;;  %v934_v1 = vadd.f32 1.0, %v3367_v42  ;;  %v4519_v19 = vld [vmem:[#allocation2 + $0xf8] sm:$0xff] }
 0x181   : > { %3376 = vrcp.f32 %v2201_v20  ;;  %v1766_v44 = vmul.f32 %v3915_v35, %v4444_v29  ;;  %v1866_v37 = vmul.f32 %v5332_v38, %v4446_v60  ;;  %v4510_v11 = vld [vmem:[#allocation2 + $0xe0] sm:$0xff]  ;;  %v932_v32 = vadd.f32 1.0, %v3369_v8  ;;  %v1744_v41 = vld [vmem:[#allocation2 + $0x198] sm:$0xff] }
 0x182   : > { %v4512_v25 = vadd.f32 %v1267_v27, %v1167_v40  ;;  %v1597_v49 = vadd.f32 %v1565_v34, %v1497_v15  ;;  %v1864_v16 = vmul.f32 %v5332_v38, %v1231_v4  ;;  %v4515_v30 = vld [vmem:[#allocation2 + $0xe1] sm:$0xff]  ;;  %3378 = vrcp.f32 %v931_v33  ;;  %v4527_v8 = vld [vmem:[#allocation2 + $0xf9] sm:$0xff] }
 0x183   : > { %v1331_v51 = vld [vmem:[#allocation2 + $0xda] sm:$0xff]  ;;  %v4517_v18 = vadd.f32 %v2333_v7, %v2332_v58  ;;  %v1466_v29 = vmul.f32 %v3889_v6, %v4510_v11  ;;  %3380 = vrcp.f32 %v929_v43  ;;  %v3027_v60 = vmul.f32 -1.442695, %v4449_v46  ;;  %v4524_v20 = vld [vmem:[#allocation2 + $0xe2] sm:$0xff]  ;;  %v4540_v7 = vld [vmem:[#allocation2 + $0xf2] sm:$0xff] }
 0x184   : > { %v1896_v42 = vadd.f32 %v1864_v16, %v1796_v21  ;;  %v1696_v40 = vadd.f32 %v1664_v14, %v1596_v26  ;;  %3382 = vrcp.f32 %v934_v1  ;;  %v3030_v4 = vmul.f32 -1.442695, %v4452_v62  ;;  %v4542_v34 = vld [vmem:[#allocation2 + $0xfa] sm:$0xff] }
 0x185   : > { %v3371_v27 = vpop.eup %3370  ;;  %v1498_v59 = vadd.f32 %v1466_v29, %v4468_v56  ;;  %v1566_v15 = vmul.f32 %v3910_v9, %v4515_v30  ;;  %v1665_v2 = vmul.f32 %v3931_v63, %v1331_v51  ;;  %3384 = vrcp.f32 %v932_v32  ;;  %v4556_v32 = vld [vmem:[%s5265_s4 + $0x8] ss:$0 sm:$0xff] }
 0x186   : > { %v1767_v33 = vmul.f32 %v3915_v35, %v4519_v19  ;;  %3386 = vpow2.f32 %v4429_v48  ;;  %v3028_v14 = vmul.f32 -1.442695, %v4455_v55  ;;  %v4538_v58 = vmul.f32 %v3915_v35, %v1744_v41 }
 0x187   : > { %v1598_v56 = vadd.f32 %v1566_v15, %v1498_v59  ;;  %v1666_v43 = vmul.f32 %v3931_v63, %v4524_v20  ;;  %v1697_v21 = vadd.f32 %v1665_v2, %v1597_v49  ;;  %v1765_v26 = vmul.f32 %v3915_v35, %v4510_v11 }
 0x188   : > { %v4549_v1 = vmul.f32 %v3371_v27, %v4325_v23  ;;  %v1867_v48 = vmul.f32 %v5332_v38, %v4527_v8  ;;  %v1964_v16 = vmul.f32 %v4556_v32, %v1331_v51  ;;  %3388 = vpow2.f32 %v4435_v57 }
 0x189   : > { %v3373_v29 = vpop.eup %3372  ;;  %v1698_v49 = vadd.f32 %v1666_v43, %v1598_v56  ;;  %v1797_v41 = vadd.f32 %v1765_v26, %v1696_v40  ;;  %v1798_v59 = vadd.f32 %v1766_v44, %v1697_v21  ;;  %v1865_v23 = vmul.f32 %v5332_v38, %v4515_v30  ;;  %v1745_v40 = vld [vmem:[#allocation2 + $0x1a0] sm:$0xff] }
 0x18a   : > { %5333 = vst [vmem:[#allocation7_spill] sm:$0xff] %v4549_v1  ;;  %v1966_v27 = vmul.f32 %v4556_v32, %v4540_v7  ;;  %v1967_v15 = vmul.f32 %v4556_v32, %v4542_v34  ;;  %v1996_v2 = vadd.f32 %v1964_v16, %v1896_v42  ;;  %3390 = vpow2.f32 %v4438_v47  ;;  %v4578_v42 = vld [vmem:[%s5266_s5] ss:$0 sm:$0xff] }
 0x18b   : > { %v1799_v13 = vadd.f32 %v1767_v33, %v1698_v49  ;;  %v1897_v45 = vadd.f32 %v1865_v23, %v1797_v41  ;;  %v1898_v39 = vadd.f32 %v1866_v37, %v1798_v59  ;;  %v1965_v57 = vmul.f32 %v4556_v32, %v4524_v20  ;;  %v1944_v59 = vld [vmem:[#allocation2 + $0x19a] sm:$0xff] }
 0x18c   : > { %v4570_v44 = vmul.f32 %v3373_v29, %v4339_v28  ;;  %v2335_v56 = vsel %vm1036_vm2, %v4549_v1, 0.0  ;;  %v1367_v43 = vmul.f32 %v3876_v50, %v1331_v51  ;;  %v2035_v47 = vmul.f32 %v4578_v42, %v1996_v2  ;;  %v4586_v51 = vld [vmem:[%s5267_s6] ss:$0 sm:$0xff] }
 0x18d   : > { %v3375_v37 = vpop.eup %3374  ;;  %v1899_v33 = vadd.f32 %v1867_v48, %v1799_v13  ;;  %v1997_v21 = vadd.f32 %v1965_v57, %v1897_v45  ;;  %v1998_v26 = vadd.f32 %v1966_v27, %v1898_v39  ;;  %3392 = vpow2.f32 %v3027_v60  ;;  %v1844_v13 = vld [vmem:[#allocation2 + $0x199] sm:$0xff]  ;;  %v1845_v45 = vld [vmem:[#allocation2 + $0x1a1] sm:$0xff] }
 0x18e   : > { %5334 = vst [vmem:[#allocation19_spill] sm:$0xff] %v4570_v44  ;;  %v3377_v16 = vpop.eup %3376  ;;  %v1168_v28 = vmul.f32 %v3857_v24, %v4510_v11  ;;  %v4589_v29 = vadd.f32 %v4586_v51, %v2035_v47  ;;  %3394 = vpow2.f32 %v3030_v4  ;;  %v4592_v49 = vmul.f32 %v3915_v35, %v1745_v40 }
 0x18f   : > { %v3379_v39 = vpop.eup %3378  ;;  %v2336_v60 = vadd.f32 %v2335_v56, %v4517_v18  ;;  %v1268_v11 = vmul.f32 %v3860_v5, %v4515_v30  ;;  %v1999_v48 = vadd.f32 %v1967_v15, %v1899_v33  ;;  %v2036_v41 = vmul.f32 %v4578_v42, %v1997_v21  ;;  %v5336_v33 = vld [vmem:[#allocation12_spill] sm:$0xff] }
 0x190   : > { %v3381_v23 = vpop.eup %3380  ;;  %v2337_v27 = vsel %vm1036_vm2, %v4570_v44, 0.0  ;;  %v1399_v4 = vadd.f32 %v1367_v43, %v4512_v25  ;;  %v3048_v2 = vmul.f32 -1.442695, %v4589_v29  ;;  %3396 = vpow2.f32 %v3028_v14 }
 0x191   : > { %v3383_v57 = vpop.eup %3382  ;;  %v2037_v40 = vmul.f32 %v4578_v42, %v1998_v26  ;;  %v4604_v18 = vadd.f32 %v4586_v51, %v2036_v41  ;;  %v4607_v30 = vmul.f32 %v5332_v38, %v1844_v13  ;;  %v4610_v15 = vmul.f32 %v5332_v38, %v1845_v45  ;;  %v1945_v41 = vld [vmem:[#allocation2 + $0x1a2] sm:$0xff] }
 0x192   : > { %v3385_v56 = vpop.eup %3384  ;;  %v1170_v47 = vmul.f32 %v3857_v24, %v4519_v19  ;;  %v2038_v25 = vmul.f32 %v4578_v42, %v1999_v48  ;;  %3398 = vpow2.f32 %v3048_v2  ;;  %v4616_v14 = vmul.f32 %v4556_v32, %v1944_v59  ;;  %v5339_v2 = vld [vmem:[#allocation9_spill] sm:$0xff] }
 0x193   : > { %v3387_v43 = vpop.eup %3386  ;;  %v4619_v21 = vmul.f32 %v3375_v37, %v5336_v33  ;;  %v2338_v26 = vadd.f32 %v2337_v27, %v2336_v60  ;;  %v1270_v13 = vmul.f32 %v3860_v5, %v4527_v8  ;;  %v1300_v45 = vadd.f32 %v1268_v11, %v1168_v28 }
 0x194   : > { %5335 = vst [vmem:[#allocation20_spill] sm:$0xff] %v4616_v14  ;;  %v1499_v44 = vadd.f32 %v4488_v10, %v1399_v4  ;;  %v3049_v1 = vmul.f32 -1.442695, %v4604_v18  ;;  %v1027_v48 = vmul.f32 %v3379_v39, %v5338_v61  ;;  %v1025_v0 = vmul.f32 %v3381_v23, %v5339_v2  ;;  %v1137_v39 = vld [vmem:[#allocation2 + $0x120] sm:$0xff]  ;;  %v1135_v4 = vld [vmem:[#allocation2 + $0x108] sm:$0xff] }
 0x195   : > { %5337 = vst [vmem:[#allocation12_spill] sm:$0xff] %v4619_v21  ;;  %v3389_v59 = vpop.eup %3388  ;;  %v4628_v31 = vmul.f32 %v3377_v16, %v4363_v22  ;;  %v4631_v37 = vadd.f32 %v4586_v51, %v2037_v40  ;;  %v1030_v60 = vmul.f32 %v3383_v57, %v4343_v12  ;;  %v1028_v28 = vmul.f32 %v3385_v56, %v4353_v52  ;;  %v4642_v23 = vld [vmem:[#allocation2 + $0x121] sm:$0xff] }
 0x196   : > { %v1369_v10 = vmul.f32 %v3876_v50, %v4540_v7  ;;  %v1368_v11 = vmul.f32 %v3876_v50, %v4524_v20  ;;  %v4640_v61 = vadd.f32 %v4586_v51, %v2038_v25  ;;  %1102 = vst.msk [vmem:[#allocation2 + $0x129] sm:$0xff] %vm1036_vm2, %v1027_v48  ;;  %1100 = vst.msk [vmem:[#allocation2 + $0x111] sm:$0xff] %vm1036_vm2, %v1025_v0  ;;  %v2339_v22 = vsel %vm1036_vm2, %v4619_v21, 0.0 }
 0x197   : > { %5340 = vst [vmem:[#allocation5_spill] sm:$0xff] %v4628_v31  ;;  %5341 = vst [vmem:[#allocation9_spill] sm:$0xff] %v4631_v37  ;;  %v4647_v12 = vmul.f32 %v4556_v32, %v1945_v41  ;;  %v3391_v52 = vpop.eup %3390  ;;  %v1302_v16 = vadd.f32 %v1270_v13, %v1170_v47  ;;  %v1370_v20 = vmul.f32 %v3876_v50, %v4542_v34  ;;  %3400 = vpow2.f32 %v3049_v1 }
 0x198   : > { %5342 = vst [vmem:[#allocation21_spill] sm:$0xff] %v4640_v61  ;;  %v1468_v27 = vmul.f32 %v3889_v6, %v4519_v19  ;;  %1105 = vst.msk [vmem:[#allocation2 + $0x151] sm:$0xff] %vm1036_vm2, %v1030_v60  ;;  %v2340_v0 = vadd.f32 %v2339_v22, %v2338_v26  ;;  %v1400_v57 = vadd.f32 %v1368_v11, %v1300_v45  ;;  %v3050_v56 = vmul.f32 -1.442695, %v4631_v37  ;;  %v1235_v11 = vld [vmem:[#allocation2 + $0x109] sm:$0xff] }
 0x199   : > { %5343 = vst [vmem:[#allocation22_spill] sm:$0xff] %v4647_v12  ;;  %1103 = vst.msk [vmem:[#allocation2 + $0x139] sm:$0xff] %vm1036_vm2, %v1028_v28  ;;  %v1599_v40 = vadd.f32 %v4496_v36, %v1499_v44  ;;  %v2341_v47 = vsel %vm1036_vm2, %v4628_v31, 0.0  ;;  %v1173_v25 = vmul.f32 %v3857_v24, %v1137_v39  ;;  %v1273_v19 = vmul.f32 %v3860_v5, %v4642_v23 }
 0x19a   : > { %v3393_v33 = vpop.eup %3392  ;;  %v1568_v13 = vmul.f32 %v3910_v9, %v4527_v8  ;;  %v1667_v26 = vmul.f32 %v3931_v63, %v4540_v7  ;;  %v3051_v1 = vmul.f32 -1.442695, %v4640_v61  ;;  %v1469_v36 = vmul.f32 %v3889_v6, %v1135_v4 }
 0x19b   : > { %v3395_v44 = vpop.eup %3394  ;;  %v1401_v45 = vadd.f32 %v1369_v10, %v4491_v3  ;;  %v1402_v41 = vadd.f32 %v1370_v20, %v1302_v16  ;;  %v1668_v48 = vmul.f32 %v3931_v63, %v4542_v34  ;;  %v935_v2 = vadd.f32 1.0, %v3387_v43 }
 0x19c   : > { %v1500_v60 = vadd.f32 %v1468_v27, %v1400_v57  ;;  %v4673_v28 = vadd.f32 %v2341_v47, %v2340_v0  ;;  %v1699_v8 = vadd.f32 %v1667_v26, %v1599_v40  ;;  %v933_v22 = vadd.f32 1.0, %v3389_v59 }
 0x19d   : > { %v3397_v31 = vpop.eup %3396  ;;  %3402 = vpow2.f32 %v3050_v56  ;;  %v4675_v7 = vadd.f32 %v1273_v19, %v1173_v25  ;;  %v1171_v21 = vmul.f32 %v3857_v24, %v1135_v4  ;;  %v938_v61 = vadd.f32 1.0, %v3391_v52  ;;  %v1136_v0 = vld [vmem:[#allocation2 + $0x110] sm:$0xff]  ;;  %v1138_v26 = vld [vmem:[#allocation2 + $0x128] sm:$0xff] }
 0x19e   : > { %5344 = vst [vmem:[#allocation23_spill] sm:$0xff] %v4673_v28  ;;  %3404 = vpow2.f32 %v3051_v1  ;;  %v1501_v3 = vadd.f32 %v1469_v36, %v1401_v45  ;;  %v1768_v10 = vmul.f32 %v3915_v35, %v1135_v4  ;;  %v936_v16 = vadd.f32 1.0, %v3393_v33  ;;  %v1335_v47 = vld [vmem:[#allocation2 + $0x10a] sm:$0xff] }
 0x19f   : > { %v3399_v34 = vpop.eup %3398  ;;  %v1271_v43 = vmul.f32 %v3860_v5, %v1235_v11  ;;  %v1569_v20 = vmul.f32 %v3910_v9, %v1235_v11  ;;  %3406 = vrcp.f32 %v935_v2  ;;  %v939_v27 = vadd.f32 1.0, %v3395_v44  ;;  %v1236_v1 = vld [vmem:[#allocation2 + $0x111] sm:$0xff]  ;;  %v1238_v45 = vld [vmem:[#allocation2 + $0x129] sm:$0xff] }
 0x1a0   : > { %v1800_v59 = vadd.f32 %v1768_v10, %v1699_v8  ;;  %v1600_v57 = vadd.f32 %v1568_v13, %v1500_v60  ;;  %3408 = vrcp.f32 %v933_v22  ;;  %v937_v40 = vadd.f32 1.0, %v3397_v31  ;;  %v1336_v2 = vld [vmem:[#allocation2 + $0x112] sm:$0xff] }
 0x1a1   : > { %v1471_v56 = vmul.f32 %v3889_v6, %v1137_v39  ;;  %v4684_v52 = vmul.f32 %v3910_v9, %v4642_v23  ;;  %v1770_v4 = vmul.f32 %v3915_v35, %v1137_v39  ;;  %3410 = vrcp.f32 %v938_v61 }
 0x1a2   : > { %v2202_v25 = vadd.f32 1.0, %v3399_v34  ;;  %v1601_v19 = vadd.f32 %v1569_v20, %v1501_v3  ;;  %v1868_v33 = vmul.f32 %v5332_v38, %v1235_v11  ;;  %3412 = vrcp.f32 %v936_v16  ;;  %v1337_v34 = vld [vmem:[#allocation2 + $0x122] sm:$0xff] }
 0x1a3   : > { %v1870_v31 = vmul.f32 %v5332_v38, %v4642_v23  ;;  %v1303_v13 = vadd.f32 %v1271_v43, %v1171_v21  ;;  %v1470_v36 = vmul.f32 %v3889_v6, %v1136_v0  ;;  %3414 = vrcp.f32 %v939_v27 }
 0x1a4   : > { %v1900_v44 = vadd.f32 %v1868_v33, %v1800_v59  ;;  %v1669_v39 = vmul.f32 %v3931_v63, %v1335_v47  ;;  %v1700_v61 = vadd.f32 %v1668_v48, %v1600_v57  ;;  %3416 = vrcp.f32 %v937_v40  ;;  %v3401_v60 = vpop.eup %3400 }
 0x1a5   : > { %v1174_v11 = vmul.f32 %v3857_v24, %v1138_v26  ;;  %v1371_v8 = vmul.f32 %v3876_v50, %v1335_v47  ;;  %v1502_v22 = vadd.f32 %v1470_v36, %v1402_v41  ;;  %v1570_v3 = vmul.f32 %v3910_v9, %v1236_v1 }
 0x1a6   : > { %3418 = vrcp.f32 %v2202_v25  ;;  %v1172_v21 = vmul.f32 %v3857_v24, %v1136_v0  ;;  %v1272_v23 = vmul.f32 %v3860_v5, %v1236_v1  ;;  %v1701_v10 = vadd.f32 %v1669_v39, %v1601_v19 }
 0x1a7   : > { %v1274_v16 = vmul.f32 %v3860_v5, %v1238_v45  ;;  %v1602_v43 = vadd.f32 %v1570_v3, %v1502_v22  ;;  %v1670_v48 = vmul.f32 %v3931_v63, %v1336_v2  ;;  %v1769_v20 = vmul.f32 %v3915_v35, %v1136_v0  ;;  %v1338_v0 = vld [vmem:[#allocation2 + $0x12a] sm:$0xff] }
 0x1a8   : > { %v2203_v27 = vadd.f32 1.0, %v3401_v60  ;;  %v1771_v59 = vmul.f32 %v3915_v35, %v1138_v26  ;;  %v1802_v41 = vadd.f32 %v1770_v4, %v1701_v10  ;;  %v1968_v57 = vmul.f32 %v4556_v32, %v1335_v47 }
 0x1a9   : > { %v1403_v40 = vadd.f32 %v1371_v8, %v1303_v13  ;;  %v1702_v25 = vadd.f32 %v1670_v48, %v1602_v43  ;;  %v1801_v33 = vadd.f32 %v1769_v20, %v1700_v61  ;;  %v1869_v36 = vmul.f32 %v5332_v38, %v1236_v1 }
 0x1aa   : > { %v3403_v19 = vpop.eup %3402  ;;  %v1373_v39 = vmul.f32 %v3876_v50, %v1337_v34  ;;  %v1871_v22 = vmul.f32 %v5332_v38, %v1238_v45  ;;  %v1304_v3 = vadd.f32 %v1272_v23, %v1172_v21  ;;  %v2000_v37 = vadd.f32 %v1968_v57, %v1900_v44 }
 0x1ab   : > { %v3405_v28 = vpop.eup %3404  ;;  %v1803_v60 = vadd.f32 %v1771_v59, %v1702_v25  ;;  %v1901_v12 = vadd.f32 %v1869_v36, %v1801_v33  ;;  %v1902_v14 = vadd.f32 %v1870_v31, %v1802_v41  ;;  %v1969_v4 = vmul.f32 %v4556_v32, %v1336_v2 }
 0x1ac   : > { %v3407_v47 = vpop.eup %3406  ;;  %3420 = vrcp.f32 %v2203_v27  ;;  %v1472_v13 = vmul.f32 %v3889_v6, %v1138_v26  ;;  %v1970_v1 = vmul.f32 %v4556_v32, %v1337_v34  ;;  %v2039_v61 = vmul.f32 %v4578_v42, %v2000_v37 }
 0x1ad   : > { %v3409_v8 = vpop.eup %3408  ;;  %v1372_v10 = vmul.f32 %v3876_v50, %v1336_v2  ;;  %v1503_v21 = vadd.f32 %v1471_v56, %v1403_v40  ;;  %v1903_v44 = vadd.f32 %v1871_v22, %v1803_v60  ;;  %v2001_v23 = vadd.f32 %v1969_v4, %v1901_v12  ;;  %v1139_v2 = vld [vmem:[#allocation2 + $0x138] sm:$0xff] }
 0x1ae   : > { %v3411_v43 = vpop.eup %3410  ;;  %v2204_v48 = vadd.f32 1.0, %v3403_v19  ;;  %v1374_v31 = vmul.f32 %v3876_v50, %v1338_v0  ;;  %v1572_v20 = vmul.f32 %v3910_v9, %v1238_v45  ;;  %v4713_v27 = vadd.f32 %v4586_v51, %v2039_v61 }
 0x1af   : > { %v3413_v26 = vpop.eup %3412  ;;  %v1971_v59 = vmul.f32 %v4556_v32, %v1338_v0  ;;  %v1404_v41 = vadd.f32 %v1372_v10, %v1304_v3  ;;  %v2002_v37 = vadd.f32 %v1970_v1, %v1902_v14  ;;  %v2040_v57 = vmul.f32 %v4578_v42, %v2001_v23  ;;  %v1141_v14 = vld [vmem:[#allocation2 + $0x150] sm:$0xff] }
 0x1b0   : > { %5345 = vst [vmem:[#allocation24_spill] sm:$0xff] %v4713_v27  ;;  %v3415_v56 = vpop.eup %3414  ;;  %v1306_v40 = vadd.f32 %v1274_v16, %v1174_v11  ;;  %v1671_v12 = vmul.f32 %v3931_v63, %v1337_v34  ;;  %v4719_v25 = vmul.f32 %v3931_v63, %v1338_v0  ;;  %v3052_v45 = vmul.f32 -1.442695, %v4713_v27  ;;  %v1241_v3 = vld [vmem:[#allocation2 + $0x151] sm:$0xff] }
 0x1b1   : > { %v3417_v33 = vpop.eup %3416  ;;  %v1405_v36 = vadd.f32 %v1373_v39, %v4675_v7  ;;  %v2003_v19 = vadd.f32 %v1971_v59, %v1903_v44  ;;  %v4724_v22 = vadd.f32 %v4586_v51, %v2040_v57  ;;  %v1603_v60 = vadd.f32 %v4684_v52, %v1503_v21  ;;  %v1239_v39 = vld [vmem:[#allocation2 + $0x139] sm:$0xff] }
 0x1b2   : > { %v2205_v4 = vadd.f32 1.0, %v3405_v28  ;;  %3422 = vrcp.f32 %v2204_v48  ;;  %v1473_v11 = vmul.f32 %v3889_v6, %v1139_v2  ;;  %v1031_v16 = vmul.f32 %v3407_v47, %v4369_v53 }
 0x1b3   : > { %5346 = vst [vmem:[#allocation25_spill] sm:$0xff] %v4724_v22  ;;  %v3419_v34 = vpop.eup %3418  ;;  %v1504_v0 = vadd.f32 %v1472_v13, %v1404_v41  ;;  %v2041_v1 = vmul.f32 %v4578_v42, %v2002_v37  ;;  %v3053_v7 = vmul.f32 -1.442695, %v4724_v22  ;;  %v1029_v61 = vmul.f32 %v3409_v8, %v4391_v54 }
 0x1b4   : > { %3424 = vpow2.f32 %v3052_v45  ;;  %v1177_v10 = vmul.f32 %v3857_v24, %v1141_v14  ;;  %v1277_v52 = vmul.f32 %v3860_v5, %v1241_v3  ;;  %1106 = vst.msk [vmem:[#allocation2 + $0x159] sm:$0xff] %vm1036_vm2, %v1031_v16  ;;  %v1034_v28 = vmul.f32 %v3411_v43, %v4403_v17 }
 0x1b5   : > { %v2042_v53 = vmul.f32 %v4578_v42, %v2003_v19  ;;  %v1175_v47 = vmul.f32 %v3857_v24, %v1139_v2  ;;  %v1703_v13 = vadd.f32 %v1671_v12, %v1603_v60  ;;  %1104 = vst.msk [vmem:[#allocation2 + $0x141] sm:$0xff] %vm1036_vm2, %v1029_v61  ;;  %v1032_v21 = vmul.f32 %v3413_v26, %v4449_v46 }
 0x1b6   : > { %v4741_v54 = vmul.f32 %v3419_v34, %v4589_v29  ;;  %v1275_v8 = vmul.f32 %v3860_v5, %v1239_v39  ;;  %v1505_v44 = vadd.f32 %v1473_v11, %v1405_v36  ;;  %1109 = vst.msk [vmem:[#allocation2 + $0x181] sm:$0xff] %vm1036_vm2, %v1034_v28  ;;  %v1035_v23 = vmul.f32 %v3415_v56, %v4452_v62 }
 0x1b7   : > { %3426 = vpow2.f32 %v3053_v7  ;;  %v1772_v17 = vmul.f32 %v3915_v35, %v1139_v2  ;;  %1107 = vst.msk [vmem:[#allocation2 + $0x169] sm:$0xff] %vm1036_vm2, %v1032_v21  ;;  %v1033_v43 = vmul.f32 %v3417_v33, %v4455_v55  ;;  %v4750_v48 = vadd.f32 %v4586_v51, %v2041_v1 }
 0x1b8   : > { %5347 = vst [vmem:[#allocation26_spill] sm:$0xff] %v4741_v54  ;;  %3428 = vrcp.f32 %v2205_v4  ;;  %v1406_v46 = vadd.f32 %v1374_v31, %v1306_v40  ;;  %v4753_v29 = vmul.f32 %v3889_v6, %v1141_v14  ;;  %v1573_v26 = vmul.f32 %v3910_v9, %v1239_v39  ;;  %1110 = vst.msk [vmem:[#allocation2 + $0x189] sm:$0xff] %vm1036_vm2, %v1035_v23 }
 0x1b9   : > { %5348 = vst [vmem:[#allocation27_spill] sm:$0xff] %v4750_v48  ;;  %v3421_v62 = vpop.eup %3420  ;;  %v1804_v59 = vadd.f32 %v1772_v17, %v1703_v13  ;;  %v1604_v41 = vadd.f32 %v1572_v20, %v1504_v0  ;;  %1108 = vst.msk [vmem:[#allocation2 + $0x171] sm:$0xff] %vm1036_vm2, %v1033_v43  ;;  %v4759_v37 = vadd.f32 %v4586_v51, %v2042_v53  ;;  %v3054_v55 = vmul.f32 -1.442695, %v4750_v48 }
 0x1ba   : > { %v1309_v57 = vadd.f32 %v1277_v52, %v1177_v10  ;;  %v4763_v31 = vmul.f32 %v3910_v9, %v1241_v3  ;;  %v1774_v2 = vmul.f32 %v3915_v35, %v1141_v14  ;;  %v4767_v56 = vmul.f32 %v5332_v38, %v1241_v3 }
 0x1bb   : > { %5349 = vst [vmem:[#allocation28_spill] sm:$0xff] %v4759_v37  ;;  %v4771_v40 = vsel %vm1036_vm2, %v4741_v54, 0.0  ;;  %v1307_v20 = vadd.f32 %v1275_v8, %v1175_v47  ;;  %v1605_v12 = vadd.f32 %v1573_v26, %v1505_v44  ;;  %v1872_v45 = vmul.f32 %v5332_v38, %v1239_v39  ;;  %v1142_v33 = vld [vmem:[#allocation2 + $0x158] sm:$0xff] }
 0x1bc   : > { %v1242_v36 = vld [vmem:[#allocation2 + $0x159] sm:$0xff]  ;;  %v4775_v60 = vmul.f32 %v3421_v62, %v4604_v18  ;;  %v1178_v4 = vmul.f32 %v3857_v24, %v1142_v33  ;;  %v1240_v34 = vld [vmem:[#allocation2 + $0x141] sm:$0xff]  ;;  %v1704_v7 = vadd.f32 %v4719_v25, %v1604_v41  ;;  %3430 = vpow2.f32 %v3054_v55 }
 0x1bd   : > { %v1341_v19 = vld [vmem:[#allocation2 + $0x152] sm:$0xff]  ;;  %v1278_v14 = vmul.f32 %v3860_v5, %v1242_v36  ;;  %v1342_v3 = vld [vmem:[#allocation2 + $0x15a] sm:$0xff]  ;;  %v1904_v0 = vadd.f32 %v1872_v45, %v1804_v59  ;;  %v4782_v39 = vmul.f32 -1.442695, %v4759_v37  ;;  %v1476_v61 = vmul.f32 %v3889_v6, %v1142_v33  ;;  %v1340_v28 = vld [vmem:[#allocation2 + $0x142] sm:$0xff] }
 0x1be   : > { %v1377_v11 = vmul.f32 %v3876_v50, %v1341_v19  ;;  %v1140_v16 = vld [vmem:[#allocation2 + $0x140] sm:$0xff]  ;;  %v1378_v18 = vmul.f32 %v3876_v50, %v1342_v3  ;;  %v4787_v10 = vmul.f32 %v3910_v9, %v1242_v36  ;;  %v4790_v52 = vmul.f32 %v3931_v63, %v1341_v19 }
 0x1bf   : > { %v1339_v1 = vld [vmem:[#allocation2 + $0x13a] sm:$0xff]  ;;  %v4792_v53 = vpop.eup %3422  ;;  %v1310_v47 = vadd.f32 %v1278_v14, %v1178_v4  ;;  %v4795_v25 = vmul.f32 %v3931_v63, %v1342_v3  ;;  %v1176_v13 = vmul.f32 %v3857_v24, %v1140_v16  ;;  %v1276_v21 = vmul.f32 %v3860_v5, %v1240_v34 }
 0x1c0   : > { %5350 = vst [vmem:[#allocation29_spill] sm:$0xff] %v4792_v53  ;;  %v1409_v8 = vadd.f32 %v1377_v11, %v1309_v57  ;;  %v1775_v44 = vmul.f32 %v3915_v35, %v1142_v33  ;;  %v1875_v23 = vmul.f32 %v5332_v38, %v1242_v36  ;;  %v1375_v17 = vmul.f32 %v3876_v50, %v1339_v1  ;;  %v1443_v48 = vld [vmem:[#allocation2 + $0x180] sm:$0xff] }
 0x1c1   : > { %v3425_v43 = vpop.eup %3424  ;;  %v1308_v26 = vadd.f32 %v1276_v21, %v1176_v13  ;;  %v1376_v62 = vmul.f32 %v3876_v50, %v1340_v28  ;;  %v1474_v59 = vmul.f32 %v3889_v6, %v1140_v16  ;;  %v1673_v41 = vmul.f32 %v3931_v63, %v1339_v1 }
 0x1c2   : > { %v4806_v55 = vmul.f32 %v4556_v32, %v1341_v19  ;;  %v4809_v45 = vmul.f32 %v4556_v32, %v1342_v3  ;;  %v1407_v57 = vadd.f32 %v1375_v17, %v1307_v20  ;;  %v1773_v33 = vmul.f32 %v3915_v35, %v1140_v16  ;;  %v1143_v17 = vld [vmem:[#allocation2 + $0x168] sm:$0xff] }
 0x1c3   : > { %v1408_v36 = vadd.f32 %v1376_v62, %v1308_v26  ;;  %v1506_v4 = vadd.f32 %v1474_v59, %v1406_v46  ;;  %v1574_v14 = vmul.f32 %v3910_v9, %v1240_v34  ;;  %v1705_v11 = vadd.f32 %v1673_v41, %v1605_v12  ;;  %v1543_v62 = vld [vmem:[#allocation2 + $0x181] sm:$0xff] }
 0x1c4   : > { %v3427_v13 = vpop.eup %3426  ;;  %v4813_v21 = vadd.f32 1.0, %v3425_v43  ;;  %v1805_v54 = vadd.f32 %v1773_v33, %v1704_v7  ;;  %v1873_v37 = vmul.f32 %v5332_v38, %v1240_v34  ;;  %v1972_v19 = vmul.f32 %v4556_v32, %v1339_v1  ;;  %v1243_v34 = vld [vmem:[#allocation2 + $0x169] sm:$0xff] }
 0x1c5   : > { %v4817_v22 = vpop.eup %3428  ;;  %v4819_v3 = vadd.f32 %v1378_v18, %v1310_v47  ;;  %v1606_v20 = vadd.f32 %v1574_v14, %v1506_v4  ;;  %v1674_v16 = vmul.f32 %v3931_v63, %v1340_v28  ;;  %v1806_v46 = vadd.f32 %v1774_v2, %v1705_v11  ;;  %v1444_v14 = vld [vmem:[#allocation2 + $0x188] sm:$0xff] }
 0x1c6   : > { %5351 = vst [vmem:[#allocation30_spill] sm:$0xff] %v4817_v22  ;;  %v1507_v12 = vadd.f32 %v4753_v29, %v1407_v57  ;;  %v1905_v26 = vadd.f32 %v1873_v37, %v1805_v54  ;;  %v1973_v43 = vmul.f32 %v4556_v32, %v1340_v28  ;;  %v2004_v7 = vadd.f32 %v1972_v19, %v1904_v0 }
 0x1c7   : > { %v4824_v59 = vadd.f32 1.0, %v3427_v13  ;;  %v1508_v1 = vadd.f32 %v1476_v61, %v1408_v36  ;;  %v1706_v41 = vadd.f32 %v1674_v16, %v1606_v20  ;;  %v1479_v18 = vmul.f32 %v3889_v6, %v1443_v48  ;;  %v1643_v16 = vld [vmem:[#allocation2 + $0x182] sm:$0xff] }
 0x1c8   : > { %v4828_v47 = vadd.f32 %v4767_v56, %v1806_v46  ;;  %v2005_v33 = vadd.f32 %v1973_v43, %v1905_v26  ;;  %v2043_v2 = vmul.f32 %v4578_v42, %v2004_v7  ;;  %v1179_v29 = vmul.f32 %v3857_v24, %v1143_v17  ;;  %v1644_v46 = vld [vmem:[#allocation2 + $0x18a] sm:$0xff] }
 0x1c9   : > { %v1807_v54 = vadd.f32 %v1775_v44, %v1706_v41  ;;  %v1579_v37 = vmul.f32 %v3910_v9, %v1543_v62  ;;  %v1279_v0 = vmul.f32 %v3860_v5, %v1243_v34  ;;  %v1477_v28 = vmul.f32 %v3889_v6, %v1143_v17  ;;  %v4835_v57 = vpop.eup %3430  ;;  %v1544_v44 = vld [vmem:[#allocation2 + $0x189] sm:$0xff] }
 0x1ca   : > { %v4838_v61 = vadd.f32 %v4586_v51, %v2043_v2  ;;  %v1778_v56 = vmul.f32 %v3915_v35, %v1443_v48  ;;  %v4842_v36 = vmul.f32 %v5332_v38, %v1543_v62  ;;  %v1607_v4 = vadd.f32 %v4763_v31, %v1507_v12  ;;  %v1144_v62 = vld [vmem:[#allocation2 + $0x170] sm:$0xff] }
 0x1cb   : > { %v4846_v11 = vmul.f32 %v4578_v42, %v2005_v33  ;;  %v1509_v13 = vadd.f32 %v1477_v28, %v1409_v8  ;;  %v1577_v19 = vmul.f32 %v3910_v9, %v1243_v34  ;;  %v1776_v20 = vmul.f32 %v3915_v35, %v1143_v17  ;;  %v1244_v31 = vld [vmem:[#allocation2 + $0x171] sm:$0xff] }
 0x1cc   : > { %5352 = vst [vmem:[#allocation31_spill] sm:$0xff] %v4838_v61  ;;  %v1907_v26 = vadd.f32 %v1875_v23, %v1807_v54  ;;  %v3056_v48 = vmul.f32 -1.442695, %v4838_v61  ;;  %v1311_v43 = vadd.f32 %v1279_v0, %v1179_v29  ;;  %v1707_v7 = vadd.f32 %v4790_v52, %v1607_v4  ;;  %v1343_v12 = vld [vmem:[#allocation2 + $0x16a] sm:$0xff]  ;;  %v1344_v28 = vld [vmem:[#allocation2 + $0x172] sm:$0xff] }
 0x1cd   : > { %v1609_v41 = vadd.f32 %v1577_v19, %v1509_v13  ;;  %v1876_v33 = vmul.f32 %v5332_v38, %v1243_v34  ;;  %v1480_v8 = vmul.f32 %v3889_v6, %v1444_v14  ;;  %v1580_v2 = vmul.f32 %v3910_v9, %v1544_v44 }
 0x1ce   : > { %v1808_v17 = vadd.f32 %v1776_v20, %v1707_v7  ;;  %v1679_v27 = vmul.f32 %v3931_v63, %v1643_v16  ;;  %v1680_v23 = vmul.f32 %v3931_v63, %v1644_v46  ;;  %v1779_v29 = vmul.f32 %v3915_v35, %v1444_v14 }
 0x1cf   : > { %3432 = vpow2.f32 %v3056_v48  ;;  %v1180_v52 = vmul.f32 %v3857_v24, %v1144_v62  ;;  %v1280_v54 = vmul.f32 %v3860_v5, %v1244_v31  ;;  %v1379_v0 = vmul.f32 %v3876_v50, %v1343_v12 }
 0x1d0   : > { %v1879_v34 = vmul.f32 %v5332_v38, %v1544_v44  ;;  %v1978_v4 = vmul.f32 %v4556_v32, %v1643_v16  ;;  %v1380_v13 = vmul.f32 %v3876_v50, %v1344_v28  ;;  %v1478_v19 = vmul.f32 %v3889_v6, %v1144_v62 }
 0x1d1   : > { %v1312_v20 = vadd.f32 %v1280_v54, %v1180_v52  ;;  %v1411_v7 = vadd.f32 %v1379_v0, %v1311_v43  ;;  %v1608_v61 = vadd.f32 %v4787_v10, %v1508_v1  ;;  %v1677_v14 = vmul.f32 %v3931_v63, %v1343_v12 }
 0x1d2   : > { %v1908_v48 = vadd.f32 %v1876_v33, %v1808_v17  ;;  %v1510_v24 = vadd.f32 %v1478_v19, %v4819_v3  ;;  %v1578_v5 = vmul.f32 %v3910_v9, %v1244_v31  ;;  %v1678_v22 = vmul.f32 %v3931_v63, %v1344_v28 }
 0x1d3   : > { %v1412_v44 = vadd.f32 %v1380_v13, %v1312_v20  ;;  %v1511_v53 = vadd.f32 %v1479_v18, %v1411_v7  ;;  %v1708_v16 = vadd.f32 %v4795_v25, %v1608_v61  ;;  %v1777_v50 = vmul.f32 %v3915_v35, %v1144_v62 }
 0x1d4   : > { %v1610_v6 = vadd.f32 %v1578_v5, %v1510_v24  ;;  %v1709_v52 = vadd.f32 %v1677_v14, %v1609_v41  ;;  %v1877_v43 = vmul.f32 %v5332_v38, %v1244_v31  ;;  %v1976_v10 = vmul.f32 %v4556_v32, %v1343_v12 }
 0x1d5   : > { %v1809_v1 = vadd.f32 %v1777_v50, %v1708_v16  ;;  %v1977_v33 = vmul.f32 %v4556_v32, %v1344_v28  ;;  %v1512_v3 = vadd.f32 %v1480_v8, %v1412_v44  ;;  %v1611_v17 = vadd.f32 %v1579_v37, %v1511_v53  ;;  %v5353_v28 = vld [vmem:[#allocation20_spill] sm:$0xff]  ;;  %v5355_v50 = vld [vmem:[#allocation23_spill] sm:$0xff] }
 0x1d6   : > { %v1710_v9 = vadd.f32 %v1678_v22, %v1610_v6  ;;  %v2008_v54 = vadd.f32 %v1976_v10, %v1908_v48  ;;  %v1810_v63 = vadd.f32 %v1778_v56, %v1709_v52  ;;  %v1979_v18 = vmul.f32 %v4556_v32, %v1644_v46  ;;  %v5356_v10 = vld [vmem:[#allocation9_spill] sm:$0xff] }
 0x1d7   : > { %v1909_v0 = vadd.f32 %v1877_v43, %v1809_v1  ;;  %v1612_v25 = vadd.f32 %v1580_v2, %v1512_v3  ;;  %v1711_v61 = vadd.f32 %v1679_v27, %v1611_v17  ;;  %v2006_v35 = vadd.f32 %v4806_v55, %v4828_v47  ;;  %v5357_v1 = vld [vmem:[#allocation29_spill] sm:$0xff] }
 0x1d8   : > { %v1811_v62 = vadd.f32 %v1779_v29, %v1710_v9  ;;  %v1910_v38 = vadd.f32 %v4842_v36, %v1810_v63  ;;  %v2007_v31 = vadd.f32 %v4809_v45, %v1907_v26  ;;  %v2047_v12 = vmul.f32 %v4578_v42, %v2008_v54  ;;  %v5359_v9 = vld [vmem:[#allocation30_spill] sm:$0xff] }
 0x1d9   : > { %v1712_v41 = vadd.f32 %v1680_v23, %v1612_v25  ;;  %v1812_v22 = vadd.f32 %v4538_v58, %v1711_v61  ;;  %v2009_v53 = vadd.f32 %v1977_v33, %v1909_v0  ;;  %v2045_v37 = vmul.f32 %v4578_v42, %v2006_v35  ;;  %v5360_v61 = vld [vmem:[#allocation24_spill] sm:$0xff] }
 0x1da   : > { %v1911_v32 = vadd.f32 %v1879_v34, %v1811_v62  ;;  %v2010_v56 = vadd.f32 %v1978_v4, %v1910_v38  ;;  %v2046_v27 = vmul.f32 %v4578_v42, %v2007_v31  ;;  %v4886_v55 = vadd.f32 %v4586_v51, %v4846_v11  ;;  %v5354_v4 = vld [vmem:[#allocation22_spill] sm:$0xff] }
 0x1db   : > { %v1813_v47 = vadd.f32 %v4592_v49, %v1712_v41  ;;  %v1912_v45 = vadd.f32 %v4607_v30, %v1812_v22  ;;  %v2048_v36 = vmul.f32 %v4578_v42, %v2009_v53  ;;  %v4892_v46 = vadd.f32 %v4586_v51, %v2045_v37 }
 0x1dc   : > { %v3433_v58 = vpop.eup %3432  ;;  %3434 = vrcp.f32 %v4813_v21  ;;  %v2011_v26 = vadd.f32 %v1979_v18, %v1911_v32  ;;  %v2049_v8 = vmul.f32 %v4578_v42, %v2010_v56  ;;  %v4897_v2 = vadd.f32 %v4586_v51, %v2046_v27  ;;  %v5361_v27 = vld [vmem:[#allocation25_spill] sm:$0xff] }
 0x1dd   : > { %v1913_v11 = vadd.f32 %v4610_v15, %v1813_v47  ;;  %v2012_v49 = vadd.f32 %v5353_v28, %v1912_v45  ;;  %v4902_v30 = vadd.f32 %v4586_v51, %v2047_v12  ;;  %v4905_v23 = vadd.f32 %v4586_v51, %v2048_v36 }
 0x1de   : > { %3436 = vrcp.f32 %v4824_v59  ;;  %v2050_v21 = vmul.f32 %v4578_v42, %v2011_v26  ;;  %v4910_v29 = vadd.f32 %v4586_v51, %v2049_v8  ;;  %v3057_v34 = vmul.f32 -1.442695, %v4886_v55 }
 0x1df   : > { %v2013_v13 = vadd.f32 %v5354_v4, %v1913_v11  ;;  %v2051_v15 = vmul.f32 %v4578_v42, %v2012_v49  ;;  %3438 = vpow2.f32 %v4782_v39  ;;  %v3058_v19 = vmul.f32 -1.442695, %v4892_v46 }
 0x1e0   : > { %v4918_v20 = vadd.f32 %v4586_v51, %v2050_v21  ;;  %3440 = vpow2.f32 %v3057_v34  ;;  %v3059_v59 = vmul.f32 -1.442695, %v4897_v2  ;;  %v3060_v7 = vmul.f32 -1.442695, %v4902_v30 }
 0x1e1   : > { %v2052_v14 = vmul.f32 %v4578_v42, %v2013_v13  ;;  %v4924_v48 = vadd.f32 %v4586_v51, %v2051_v15  ;;  %3442 = vpow2.f32 %v3058_v19  ;;  %v3061_v24 = vmul.f32 -1.442695, %v4905_v23  ;;  %v5362_v19 = vld [vmem:[#allocation27_spill] sm:$0xff] }
 0x1e2   : > { %3444 = vpow2.f32 %v3059_v59  ;;  %v3062_v39 = vmul.f32 -1.442695, %v4910_v29  ;;  %v3063_v5 = vmul.f32 -1.442695, %v4918_v20  ;;  %v2344_v42 = vadd.f32 %v4771_v40, %v5355_v50  ;;  %v5358_v40 = vld [vmem:[#allocation21_spill] sm:$0xff] }
 0x1e3   : > { %v4930_v44 = vadd.f32 %v4586_v51, %v2052_v14  ;;  %3446 = vpow2.f32 %v3060_v7  ;;  %v3064_v16 = vmul.f32 -1.442695, %v4924_v48  ;;  %v2345_v6 = vsel %vm1036_vm2, %v4775_v60, 0.0 }
 0x1e4   : > { %3448 = vpow2.f32 %v3061_v24  ;;  %v2208_v43 = vadd.f32 1.0, %v4835_v57  ;;  %v4941_v51 = vmul.f32 %v5357_v1, %v5356_v10  ;;  %v2210_v33 = vadd.f32 1.0, %v3433_v58 }
 0x1e5   : > { %3450 = vpow2.f32 %v3062_v39  ;;  %v3065_v52 = vmul.f32 -1.442695, %v4930_v44  ;;  %v2346_v3 = vadd.f32 %v2345_v6, %v2344_v42  ;;  %v4945_v54 = vmul.f32 %v5359_v9, %v5358_v40  ;;  %v5363_v39 = vld [vmem:[#allocation31_spill] sm:$0xff] }
 0x1e6   : > { %3452 = vpow2.f32 %v3063_v5  ;;  %v2347_v18 = vsel %vm1036_vm2, %v4941_v51, 0.0 }
 0x1e7   : > { %3454 = vpow2.f32 %v3064_v16  ;;  %v2348_v0 = vadd.f32 %v2347_v18, %v2346_v3  ;;  %v2349_v38 = vsel %vm1036_vm2, %v4945_v54, 0.0 }
 0x1e8   : > { %3456 = vpow2.f32 %v3065_v52  ;;  %v5364_v52 = vld [vmem:[#allocation28_spill] sm:$0xff] }
 0x1e9   : > { %v3435_v17 = vpop.eup %3434  ;;  %3458 = vrcp.f32 %v2208_v43  ;;  %v2350_v32 = vadd.f32 %v2349_v38, %v2348_v0 }
 0x1ea   : > { %3460 = vrcp.f32 %v2210_v33  ;;  %v4950_v35 = vmul.f32 %v3435_v17, %v5360_v61 }
 0x1eb   : > { %v3437_v63 = vpop.eup %3436 }
 0x1ec   : > { %v3439_v57 = vpop.eup %3438  ;;  %v4955_v47 = vmul.f32 %v3437_v63, %v5361_v27  ;;  %v2351_v45 = vsel %vm1036_vm2, %v4950_v35, 0.0 }
 0x1ed   : > { %v3441_v25 = vpop.eup %3440  ;;  %v2209_v62 = vadd.f32 1.0, %v3439_v57  ;;  %v2352_v49 = vadd.f32 %v2351_v45, %v2350_v32 }
 0x1ee   : > { %v3443_v31 = vpop.eup %3442  ;;  %v2211_v12 = vadd.f32 1.0, %v3441_v25  ;;  %v2353_v4 = vsel %vm1036_vm2, %v4955_v47, 0.0 }
 0x1ef   : > { %v3445_v41 = vpop.eup %3444  ;;  %v2212_v22 = vadd.f32 1.0, %v3443_v31  ;;  %3462 = vrcp.f32 %v2209_v62  ;;  %v2354_v14 = vadd.f32 %v2353_v4, %v2352_v49 }
 0x1f0   : > { %v3447_v53 = vpop.eup %3446  ;;  %v2213_v37 = vadd.f32 1.0, %v3445_v41  ;;  %3464 = vrcp.f32 %v2211_v12 }
 0x1f1   : > { %v3449_v56 = vpop.eup %3448  ;;  %v2214_v36 = vadd.f32 1.0, %v3447_v53  ;;  %3466 = vrcp.f32 %v2212_v22 }
 0x1f2   : > { %v3451_v58 = vpop.eup %3450  ;;  %v2215_v26 = vadd.f32 1.0, %v3449_v56  ;;  %3468 = vrcp.f32 %v2213_v37 }
 0x1f3   : > { %v3453_v8 = vpop.eup %3452  ;;  %3470 = vrcp.f32 %v2214_v36  ;;  %v2216_v28 = vadd.f32 1.0, %v3451_v58 }
 0x1f4   : > { %v3455_v11 = vpop.eup %3454  ;;  %v2217_v34 = vadd.f32 1.0, %v3453_v8  ;;  %3472 = vrcp.f32 %v2215_v26 }
 0x1f5   : > { %v3457_v21 = vpop.eup %3456  ;;  %v2218_v15 = vadd.f32 1.0, %v3455_v11  ;;  %3474 = vrcp.f32 %v2216_v28 }
 0x1f6   : > { %v3459_v13 = vpop.eup %3458  ;;  %v2219_v24 = vadd.f32 1.0, %v3457_v21  ;;  %3476 = vrcp.f32 %v2217_v34 }
 0x1f7   : > { %v4962_v59 = vmul.f32 %v3459_v13, %v5362_v19  ;;  %v3461_v7 = vpop.eup %3460  ;;  %3478 = vrcp.f32 %v2218_v15 }
 0x1f8   : > { %v4965_v5 = vmul.f32 %v3461_v7, %v5363_v39  ;;  %3480 = vrcp.f32 %v2219_v24  ;;  %v2448_v7 = vld [vmem:[%s5270_s9] sm:$0x1] }
 0x1f9   : > { %v2355_v16 = vsel %vm1036_vm2, %v4962_v59, 0.0 }
 0x1fa   : > { %v2356_v42 = vadd.f32 %v2355_v16, %v2354_v14  ;;  %v2359_v17 = vsel %vm1036_vm2, %v4965_v5, 0.0  ;;  %v3537_v14 = vmov 0   ;;  %v2390_v16 = vld [vmem:[#allocation3] sm:$0x1] }
 0x1fb   : > { %v2456_v24 = vsel %vm2454_vm6, 65535, %v3537_v14 }
 0x1fc   : > { %v3463_v50 = vpop.eup %3462  ;;  %v2458_v39 = vand.u32 %v2456_v24, %v2448_v7  ;;  %v5374_v7 = vld [vmem:[#allocation16_spill] sm:$0xff]  ;;  %v5375_v24 = vld [vmem:[#allocation17_spill] sm:$0xff] }
 0x1fd   : > { %v3465_v6 = vpop.eup %3464  ;;  %v4970_v43 = vmul.f32 %v3463_v50, %v5364_v52 }
 0x1fe   : > { %v3467_v10 = vpop.eup %3466  ;;  %v4973_v1 = vmul.f32 %v3465_v6, %v4886_v55  ;;  %3173 = vmatpush3.bf16.msra.mxu1 %v2458_v39 }
 0x1ff   : > { %v3469_v33 = vpop.eup %3468  ;;  %v2357_v3 = vsel %vm1036_vm2, %v4970_v43, 0.0  ;;  %v4980_v63 = vmul.f32 %v3467_v10, %v4892_v46 }
 0x200   : > { %v3471_v40 = vpop.eup %3470  ;;  %v2358_v9 = vadd.f32 %v2357_v3, %v2356_v42  ;;  %v4983_v18 = vmul.f32 %v3469_v33, %v4897_v2  ;;  %v2361_v57 = vsel %vm1036_vm2, %v4973_v1, 0.0 }
 0x201   : > { %v3473_v55 = vpop.eup %3472  ;;  %v4988_v25 = vmul.f32 %v3471_v40, %v4902_v30  ;;  %v2363_v46 = vsel %vm1036_vm2, %v4980_v63, 0.0 }
 0x202   : > { %v2360_v0 = vadd.f32 %v2359_v17, %v2358_v9  ;;  %v3475_v62 = vpop.eup %3474  ;;  %v4991_v38 = vmul.f32 %v3473_v55, %v4905_v23  ;;  %v2365_v2 = vsel %vm1036_vm2, %v4983_v18, 0.0  ;;  %v3225_v55 = vld [vmem:[%s5272_s11] sm:$0xff]  }
 0x203   : > { %v3477_v31 = vpop.eup %3476  ;;  %v2367_v41 = vsel %vm1036_vm2, %v4988_v25, 0.0  ;;  %v5000_v30 = vmul.f32 %v3475_v62, %v4910_v29  ;;  %3178 = vmatprep.subr.bf16.mxu1 %v3225_v55 }
 0x204   : > { %v2362_v61 = vadd.f32 %v2361_v57, %v2360_v0  ;;  %v3479_v22 = vpop.eup %3478  ;;  %v5003_v37 = vmul.f32 %v3477_v31, %v4918_v20  ;;  %v2369_v23 = vsel %vm1036_vm2, %v4991_v38, 0.0  ;;  %v2449_v0 = vld [vmem:[%s5271_s10] sm:$0x1] }
 0x205   : > { %v3481_v32 = vpop.eup %3480  ;;  %v5008_v27 = vmul.f32 %v3479_v22, %v4924_v48  ;;  %v2371_v58 = vsel %vm1036_vm2, %v5000_v30, 0.0 }
 0x206   : > { %v2364_v12 = vadd.f32 %v2363_v46, %v2362_v61  ;;  %v5011_v36 = vmul.f32 %v3481_v32, %v4930_v44  ;;  %v2373_v29 = vsel %vm1036_vm2, %v5003_v37, 0.0 }
 0x207   : > { %v2375_v26 = vsel %vm1036_vm2, %v5008_v27, 0.0 }
 0x208   : > { %v2366_v53 = vadd.f32 %v2365_v2, %v2364_v12  ;;  %v2377_v11 = vsel %vm1036_vm2, %v5011_v36, 0.0 }
 0x20a   : > { %v2368_v56 = vadd.f32 %v2367_v41, %v2366_v53 }
 0x20c   : > { %v2370_v45 = vadd.f32 %v2369_v23, %v2368_v56  ;;  %v5365_v23 = vld [vmem:[#allocation4_spill] sm:$0xff] }
 0x20d   : > { %v5366_v32 = vsub.s32 0, %v5365_v23 }
 0x20e   : > { %v2372_v20 = vadd.f32 %v2371_v58, %v2370_v45  ;;  %v5367_v45 = vld [vmem:[#allocation10_spill] sm:$0xff] }
 0x210   : > { %v2374_v8 = vadd.f32 %v2373_v29, %v2372_v20  ;;  %v5368_v29 = vld [vmem:[#allocation8_spill] sm:$0xff] }
 0x212   : > { %v2376_v48 = vadd.f32 %v2375_v26, %v2374_v8  ;;  %v5369_v26 = vld [vmem:[#allocation11_spill] sm:$0xff] }
 0x214   : > { %v2378_v28 = vadd.f32 %v2377_v11, %v2376_v48  ;;  %v5370_v11 = vld [vmem:[#allocation13_spill] sm:$0xff] }
 0x216   : > { %v2379_v49 = vrot.slane %v2378_v28, 4 }
 0x218   : > { %v2380_v21 = vadd.f32 %v2379_v49, %v2378_v28  ;;  %v5371_v28 = vld [vmem:[#allocation6_spill] sm:$0xff] }
 0x21a   : > { %v2381_v44 = vrot.slane %v2380_v21, 2 }
 0x21c   : > { %v2382_v34 = vadd.f32 %v2381_v44, %v2380_v21  ;;  %v5372_v21 = vld [vmem:[#allocation14_spill] sm:$0xff] }
 0x21e   : > { %v2383_v4 = vrot.slane %v2382_v34, 1 }
 0x220   : > { %v2384_v13 = vadd.f32 %v2383_v4, %v2382_v34 }
 0x222   : > { %v2386_v15 = vmul.f32 0.00390625, %v2384_v13 }
 0x224   : > { %v2387_v19 = vpack.c.bf16 %v2386_v15, %v2386_v15  ;;  %v5373_v15 = vld [vmem:[#allocation15_spill] sm:$0xff] }
 0x226   : > { %3169 = vmatmul.mubr.msk.bf16.vlgmr.msra.gmra.mxu0 %vm1036_vm2, %v2387_v19 }
 0x2e6   : > { %v2434_v50 = vpop.f32.mrf.mxu0 }
 0x2e7   : > { %v2435_v42 = vadd.f32 %v2434_v50, %v2390_v16  ;;  %v5376_v16 = vld [vmem:[#allocation18_spill] sm:$0xff] }
 0x2e8   : > { %v3170_v6 = vpop.f32.mrf.mxu0 }
 0x2e9   : > { %v3068_v52 = vmul.f32 -1.442695, %v2435_v42 }
 0x2ea   : > { %v2437_v10 = vpop.f32.mrf.mxu0 }
 0x2eb   : > { %3482 = vpow2.f32 %v3068_v52  ;;  %v5377_v52 = vld [vmem:[#allocation7_spill] sm:$0xff] }
 0x2ec   : > { %v3171_v33 = vpop.f32.mrf.mxu0 }
 0x2ed   : > { %v5378_v33 = vld [vmem:[#allocation19_spill] sm:$0xff] }
 0x2f8   : > { %v3483_v3 = vpop.eup %3482 }
 0x2f9   : > { %v2443_v17 = vadd.f32 1.0, %v3483_v3 }
 0x2fb   : > { %3484 = vrcp.f32 %v2443_v17  ;;  %v5379_v17 = vld [vmem:[#allocation12_spill] sm:$0xff] }
 0x308   : > { %v3485_v40 = vpop.eup %3484 }
 0x309   : > { %v2446_v9 = vmul.f32 %v3485_v40, %v2435_v42 }
 0x30b   : > { %v2447_v57 = vpack.c.bf16 %v2446_v9, %v2446_v9  ;;  %v5380_v9 = vld [vmem:[#allocation5_spill] sm:$0xff] }
 0x30d   : > { %3175 = vmatmul.mubr.msk.bf16.vlgmr.msra.gmra.mxu1 %vm2450_vm7, %v2447_v57 }
 0x30e   : > { %3179 = vmatpush3.bf16.msra.mxu1 %v3225_v55 }
 0x3cd   : > { %v2494_v61 = vpop.f32.mrf.mxu1 }
 0x3ce   : > { %v2495_v62 = vadd.f32 %v2494_v61, %v2449_v0  ;;  %v5381_v61 = vld [vmem:[#allocation26_spill] sm:$0xff] }
 0x3cf   : > { %v3176_v46 = vpop.f32.mrf.mxu1 }
 0x3d0   : > { %v3070_v2 = vmul.f32 -1.442695, %v2495_v62 }
 0x3d1   : > { %v2497_v31 = vpop.f32.mrf.mxu1 }
 0x3d2   : > { %3486 = vpow2.f32 %v3070_v2 }
 0x3d3   : > { %v3177_v12 = vpop.f32.mrf.mxu1 }
 0x3df   : > { %v3487_v41 = vpop.eup %3486 }
 0x3e0   : > { %v2503_v22 = vadd.f32 1.0, %v3487_v41 }
 0x3e2   : > { %3488 = vrcp.f32 %v2503_v22 }
 0x3ef   : > { %v3489_v53 = vpop.eup %3488 }
 0x3f0   : > { %v2509_v56 = vrot.slane %v3489_v53, %v5366_v32 }
 0x3f2   : > { %v2510_v58 = vmul.f32 %v2509_v56, %v5367_v45  ;;  %v2511_v20 = vmul.f32 %v2509_v56, %v5368_v29  ;;  %v2512_v8 = vmul.f32 %v2509_v56, %v5369_v26  ;;  %v2513_v48 = vmul.f32 %v2509_v56, %v5370_v11 }
 0x3f3   : > { %v2514_v49 = vmul.f32 %v2509_v56, %v5371_v28  ;;  %v2515_v44 = vmul.f32 %v2509_v56, %v5372_v21  ;;  %v2516_v19 = vmul.f32 %v2509_v56, %v5373_v15  ;;  %v2517_v14 = vmul.f32 %v2509_v56, %v5374_v7  ;;  %v3497_v7 = vld [vmem:[%s3635_s21 + $0x18] sm:$0xff] }
 0x3f4   : > { %v2542_v34 = vpack.c.bf16 %v2511_v20, %v2510_v58  ;;  %v2543_v4 = vpack.c.bf16 %v2513_v48, %v2512_v8  ;;  %v2518_v39 = vmul.f32 %v2509_v56, %v5375_v24  ;;  %v2519_v50 = vmul.f32 %v2509_v56, %v5376_v16  ;;  %v3495_v48 = vld [vmem:[%s3635_s21 + $0x10] sm:$0xff] }
 0x3f5   : > { %v2544_v13 = vpack.c.bf16 %v2515_v44, %v2514_v49  ;;  %v2545_v42 = vpack.c.bf16 %v2517_v14, %v2516_v19  ;;  %v2520_v10 = vmul.f32 %v2509_v56, %v5377_v52  ;;  %v2521_v3 = vmul.f32 %v2509_v56, %v5378_v33  ;;  %v3499_v33 = vld [vmem:[%s3635_s21 + $0x30] sm:$0xff] }
 0x3f6   : > { %3180 = vmatprep.mubr.msk.bf16.mxu1 %vm1036_vm2, %v2542_v34  ;;  %v2546_v6 = vpack.c.bf16 %v2519_v50, %v2518_v39  ;;  %v2522_v40 = vmul.f32 %v2509_v56, %v5379_v17  ;;  %v2523_v57 = vmul.f32 %v2509_v56, %v5380_v9  ;;  %v2524_v62 = vmul.f32 %v2509_v56, %v5381_v61  ;;  %v3496_v34 = vld [vmem:[%s3635_s21] sm:$0xff]  ;;  %v3498_v50 = vld [vmem:[%s3635_s21 + $0x8] sm:$0xff] }
 0x3f7   : > { %3181 = vmatmul.mubr.msk.bf16.vlgmr.msra.gmra.mxu1 %vm1036_vm2, %v2543_v4  ;;  %v2547_v55 = vpack.c.bf16 %v2521_v3, %v2520_v10  ;;  %v2525_v46 = vmul.f32 %v2509_v56, %v4775_v60  ;;  %v2526_v2 = vmul.f32 %v2509_v56, %v4941_v51  ;;  %v2527_v31 = vmul.f32 %v2509_v56, %v4945_v54 }
 0x3f8   : > { %3184 = vmatprep.mubr.msk.bf16.mxu1 %vm1036_vm2, %v2544_v13  ;;  %v2548_v0 = vpack.c.bf16 %v2523_v57, %v2522_v40  ;;  %v2528_v22 = vmul.f32 %v2509_v56, %v4950_v35  ;;  %v2529_v53 = vmul.f32 %v2509_v56, %v4955_v47  ;;  %v2530_v23 = vmul.f32 %v2509_v56, %v4962_v59  ;;  %v3500_v57 = vld [vmem:[%s3635_s21 + $0x20] sm:$0xff] }
 0x3f9   : > { %v2549_v12 = vpack.c.bf16 %v2525_v46, %v2524_v62  ;;  %v2550_v41 = vpack.c.bf16 %v2527_v31, %v2526_v2  ;;  %v2531_v32 = vmul.f32 %v2509_v56, %v4970_v43  ;;  %v2532_v51 = vmul.f32 %v2509_v56, %v4965_v5  ;;  %v3501_v46 = vld [vmem:[%s3635_s21 + $0x38] sm:$0xff] }
 0x3fa   : > { %v2551_v45 = vpack.c.bf16 %v2529_v53, %v2528_v22  ;;  %v2533_v54 = vmul.f32 %v2509_v56, %v4973_v1  ;;  %v2534_v58 = vmul.f32 %v2509_v56, %v4980_v63  ;;  %v2535_v35 = vmul.f32 %v2509_v56, %v4983_v18  ;;  %v3502_v22 = vld [vmem:[%s3635_s21 + $0x28] sm:$0xff] }
 0x3fb   : > { %v2552_v60 = vpack.c.bf16 %v2531_v32, %v2530_v23  ;;  %v2536_v59 = vmul.f32 %v2509_v56, %v4988_v25  ;;  %v2537_v43 = vmul.f32 %v2509_v56, %v4991_v38  ;;  %v2538_v20 = vmul.f32 %v2509_v56, %v5000_v30  ;;  %v5084_v25 = vld [vmem:[%s5273_s12] ss:$0 sm:$0xff] }
 0x3fc   : > { %v2553_v29 = vpack.c.bf16 %v2533_v54, %v2532_v51  ;;  %v2554_v47 = vpack.c.bf16 %v2535_v35, %v2534_v58  ;;  %v2539_v5 = vmul.f32 %v2509_v56, %v5003_v37  ;;  %v2540_v63 = vmul.f32 %v2509_v56, %v5008_v27  ;;  %v5089_v30 = vld [vmem:[%s5274_s13] ss:$0 sm:$0xff] }
 0x3fd   : > { %v2555_v1 = vpack.c.bf16 %v2537_v43, %v2536_v59  ;;  %v2541_v18 = vmul.f32 %v2509_v56, %v5011_v36 }
 0x3fe   : > { %v2556_v26 = vpack.c.bf16 %v2539_v5, %v2538_v20  ;;  %v3505_v5 = vld [vmem:[%s3635_s21 + $0x58] sm:$0xff] }
 0x3ff   : > { %3185 = vmatmul.mubr.msk.bf16.gmra.mxu1 %vm1036_vm2, %v2545_v42  ;;  %v2557_v8 = vpack.c.bf16 %v2541_v18, %v2540_v63 }
 0x400   : > { %3188 = vmatprep.mubr.msk.bf16.mxu1 %vm1036_vm2, %v2546_v6 }
 0x407   : > { %3189 = vmatmul.mubr.msk.bf16.gmra.mxu1 %vm1036_vm2, %v2547_v55 }
 0x408   : > { %3192 = vmatprep.mubr.msk.bf16.mxu1 %vm1036_vm2, %v2548_v0 }
 0x40f   : > { %3193 = vmatmul.mubr.msk.bf16.gmra.mxu1 %vm1036_vm2, %v2549_v12 }
 0x410   : > { %3196 = vmatprep.mubr.msk.bf16.mxu1 %vm1036_vm2, %v2550_v41 }
 0x417   : > { %3197 = vmatmul.mubr.msk.bf16.gmra.mxu1 %vm1036_vm2, %v2551_v45 }
 0x418   : > { %3200 = vmatprep.mubr.msk.bf16.mxu1 %vm1036_vm2, %v2552_v60  ;;  %v3503_v60 = vld [vmem:[%s3635_s21 + $0x50] sm:$0xff] }
 0x41f   : > { %3201 = vmatmul.mubr.msk.bf16.gmra.mxu1 %vm1036_vm2, %v2553_v29  ;;  %v3504_v29 = vld [vmem:[%s3635_s21 + $0x40] sm:$0xff] }
 0x420   : > { %3204 = vmatprep.mubr.msk.bf16.mxu1 %vm1036_vm2, %v2554_v47 }
 0x427   : > { %3205 = vmatmul.mubr.msk.bf16.gmra.mxu1 %vm1036_vm2, %v2555_v1 }
 0x428   : > { %3208 = vmatprep.mubr.msk.bf16.mxu1 %vm1036_vm2, %v2556_v26 }
 0x42f   : > { %3209 = vmatmul.mubr.msk.bf16.gmra.mxu1 %vm1036_vm2, %v2557_v8  ;;  %v3506_v8 = vld [vmem:[%s3635_s21 + $0x48] sm:$0xff] }
 0x4b7   : > { %v3182_v38 = vpop.f32.mrf.mxu1 }
 0x4b8   : > { %v2784_v37 = vmul.f32 %v3182_v38, %v5084_v25 }
 0x4b9   : > { %v2648_v27 = vpop.f32.mrf.mxu1 }
 0x4ba   : > { %v2823_v36 = vadd.f32 %v5089_v30, %v2784_v37  ;;  %v2782_v56 = vmul.f32 %v5084_v25, %v2648_v27 }
 0x4bb   : > { %v3183_v11 = vpop.f32.mrf.mxu1 }
 0x4bc   : > { %v2855_v28 = vadd.f32 %v3495_v48, %v2823_v36  ;;  %v2821_v49 = vadd.f32 %v5089_v30, %v2782_v56  ;;  %v2785_v21 = vmul.f32 %v3183_v11, %v5084_v25  ;;  %v3507_v56 = vld [vmem:[%s3635_s21 + $0x70] sm:$0xff] }
 0x4bd   : > { %v2651_v44 = vpop.f32.mrf.mxu1 }
 0x4be   : > { %2887 = vst.msk [vmem:[%s5099_s18 + $0x10] sm:$0xff] %vm520_vm1, %v2855_v28  ;;  %v2853_v4 = vadd.f32 %v3496_v34, %v2821_v49  ;;  %v2824_v13 = vadd.f32 %v5089_v30, %v2785_v21  ;;  %v2783_v15 = vmul.f32 %v5084_v25, %v2651_v44  ;;  %v3508_v21 = vld [vmem:[%s3635_s21 + $0x60] sm:$0xff] }
 0x4bf   : > { %v3186_v19 = vpop.f32.mrf.mxu1 }
 0x4c0   : > { %2885 = vst.msk [vmem:[%s5099_s18] sm:$0xff] %vm520_vm1, %v2853_v4  ;;  %v2856_v14 = vadd.f32 %v3497_v7, %v2824_v13  ;;  %v2822_v24 = vadd.f32 %v5089_v30, %v2783_v15  ;;  %v2788_v39 = vmul.f32 %v3186_v19, %v5084_v25  ;;  %v3509_v15 = vld [vmem:[%s3635_s21 + $0x78] sm:$0xff] }
 0x4c1   : > { %v2664_v16 = vpop.f32.mrf.mxu1 }
 0x4c2   : > { %2888 = vst.msk [vmem:[%s5099_s18 + $0x18] sm:$0xff] %vm520_vm1, %v2856_v14  ;;  %v2854_v42 = vadd.f32 %v3498_v50, %v2822_v24  ;;  %v2827_v6 = vadd.f32 %v5089_v30, %v2788_v39  ;;  %v2786_v52 = vmul.f32 %v5084_v25, %v2664_v16  ;;  %v3510_v39 = vld [vmem:[%s3635_s21 + $0x68] sm:$0xff] }
 0x4c3   : > { %v3187_v10 = vpop.f32.mrf.mxu1 }
 0x4c4   : > { %2886 = vst.msk [vmem:[%s5099_s18 + $0x8] sm:$0xff] %vm520_vm1, %v2854_v42  ;;  %v2859_v3 = vadd.f32 %v3499_v33, %v2827_v6  ;;  %v2825_v17 = vadd.f32 %v5089_v30, %v2786_v52  ;;  %v2789_v40 = vmul.f32 %v3187_v10, %v5084_v25  ;;  %v3511_v52 = vld [vmem:[%s3635_s21 + $0x90] sm:$0xff] }
 0x4c5   : > { %v2667_v9 = vpop.f32.mrf.mxu1 }
 0x4c6   : > { %2891 = vst.msk [vmem:[%s5099_s18 + $0x30] sm:$0xff] %vm520_vm1, %v2859_v3  ;;  %v2857_v55 = vadd.f32 %v3500_v57, %v2825_v17  ;;  %v2828_v0 = vadd.f32 %v5089_v30, %v2789_v40  ;;  %v2787_v61 = vmul.f32 %v5084_v25, %v2667_v9  ;;  %v3512_v40 = vld [vmem:[%s3635_s21 + $0x80] sm:$0xff] }
 0x4c7   : > { %v3190_v62 = vpop.f32.mrf.mxu1 }
 0x4c8   : > { %2889 = vst.msk [vmem:[%s5099_s18 + $0x20] sm:$0xff] %vm520_vm1, %v2857_v55  ;;  %v2860_v2 = vadd.f32 %v3501_v46, %v2828_v0  ;;  %v2826_v31 = vadd.f32 %v5089_v30, %v2787_v61  ;;  %v2792_v12 = vmul.f32 %v3190_v62, %v5084_v25  ;;  %v3513_v61 = vld [vmem:[%s3635_s21 + $0x98] sm:$0xff] }
 0x4c9   : > { %v2680_v41 = vpop.f32.mrf.mxu1 }
 0x4ca   : > { %2892 = vst.msk [vmem:[%s5099_s18 + $0x38] sm:$0xff] %vm520_vm1, %v2860_v2  ;;  %v2858_v53 = vadd.f32 %v3502_v22, %v2826_v31  ;;  %v2831_v23 = vadd.f32 %v5089_v30, %v2792_v12  ;;  %v2790_v32 = vmul.f32 %v5084_v25, %v2680_v41  ;;  %v3514_v12 = vld [vmem:[%s3635_s21 + $0x88] sm:$0xff] }
 0x4cb   : > { %v3191_v45 = vpop.f32.mrf.mxu1 }
 0x4cc   : > { %2890 = vst.msk [vmem:[%s5099_s18 + $0x28] sm:$0xff] %vm520_vm1, %v2858_v53  ;;  %v2863_v51 = vadd.f32 %v3503_v60, %v2831_v23  ;;  %v2829_v54 = vadd.f32 %v5089_v30, %v2790_v32  ;;  %v2793_v58 = vmul.f32 %v3191_v45, %v5084_v25  ;;  %v3515_v32 = vld [vmem:[%s3635_s21 + $0xb0] sm:$0xff] }
 0x4cd   : > { %v2683_v35 = vpop.f32.mrf.mxu1 }
 0x4ce   : > { %2895 = vst.msk [vmem:[%s5099_s18 + $0x50] sm:$0xff] %vm520_vm1, %v2863_v51  ;;  %v2861_v47 = vadd.f32 %v3504_v29, %v2829_v54  ;;  %v2832_v59 = vadd.f32 %v5089_v30, %v2793_v58  ;;  %v2791_v43 = vmul.f32 %v5084_v25, %v2683_v35  ;;  %v3516_v58 = vld [vmem:[%s3635_s21 + $0xa0] sm:$0xff] }
 0x4cf   : > { %v3194_v20 = vpop.f32.mrf.mxu1 }
 0x4d0   : > { %2893 = vst.msk [vmem:[%s5099_s18 + $0x40] sm:$0xff] %vm520_vm1, %v2861_v47  ;;  %v2864_v1 = vadd.f32 %v3505_v5, %v2832_v59  ;;  %v2830_v26 = vadd.f32 %v5089_v30, %v2791_v43  ;;  %v2796_v63 = vmul.f32 %v3194_v20, %v5084_v25  ;;  %v3517_v43 = vld [vmem:[%s3635_s21 + $0xb8] sm:$0xff] }
 0x4d1   : > { %v2696_v18 = vpop.f32.mrf.mxu1 }
 0x4d2   : > { %2896 = vst.msk [vmem:[%s5099_s18 + $0x58] sm:$0xff] %vm520_vm1, %v2864_v1  ;;  %v2862_v38 = vadd.f32 %v3506_v8, %v2830_v26  ;;  %v2835_v37 = vadd.f32 %v5089_v30, %v2796_v63  ;;  %v2794_v27 = vmul.f32 %v5084_v25, %v2696_v18  ;;  %v3518_v63 = vld [vmem:[%s3635_s21 + $0xa8] sm:$0xff] }
 0x4d3   : > { %v3195_v36 = vpop.f32.mrf.mxu1 }
 0x4d4   : > { %2894 = vst.msk [vmem:[%s5099_s18 + $0x48] sm:$0xff] %vm520_vm1, %v2862_v38  ;;  %v2867_v11 = vadd.f32 %v3507_v56, %v2835_v37  ;;  %v2833_v48 = vadd.f32 %v5089_v30, %v2794_v27  ;;  %v2797_v28 = vmul.f32 %v3195_v36, %v5084_v25  ;;  %v3519_v27 = vld [vmem:[%s3635_s21 + $0xd0] sm:$0xff] }
 0x4d5   : > { %v2699_v49 = vpop.f32.mrf.mxu1 }
 0x4d6   : > { %2899 = vst.msk [vmem:[%s5099_s18 + $0x70] sm:$0xff] %vm520_vm1, %v2867_v11  ;;  %v2865_v44 = vadd.f32 %v3508_v21, %v2833_v48  ;;  %v2836_v34 = vadd.f32 %v5089_v30, %v2797_v28  ;;  %v2795_v4 = vmul.f32 %v5084_v25, %v2699_v49  ;;  %v3520_v28 = vld [vmem:[%s3635_s21 + $0xc0] sm:$0xff] }
 0x4d7   : > { %v3198_v13 = vpop.f32.mrf.mxu1 }
 0x4d8   : > { %2897 = vst.msk [vmem:[%s5099_s18 + $0x60] sm:$0xff] %vm520_vm1, %v2865_v44  ;;  %v2868_v19 = vadd.f32 %v3509_v15, %v2836_v34  ;;  %v2834_v7 = vadd.f32 %v5089_v30, %v2795_v4  ;;  %v2800_v14 = vmul.f32 %v3198_v13, %v5084_v25  ;;  %v3521_v4 = vld [vmem:[%s3635_s21 + $0xd8] sm:$0xff] }
 0x4d9   : > { %v2712_v24 = vpop.f32.mrf.mxu1 }
 0x4da   : > { %2900 = vst.msk [vmem:[%s5099_s18 + $0x78] sm:$0xff] %vm520_vm1, %v2868_v19  ;;  %v2866_v16 = vadd.f32 %v3510_v39, %v2834_v7  ;;  %v2839_v50 = vadd.f32 %v5089_v30, %v2800_v14  ;;  %v2798_v42 = vmul.f32 %v5084_v25, %v2712_v24  ;;  %v3522_v14 = vld [vmem:[%s3635_s21 + $0xc8] sm:$0xff] }
 0x4db   : > { %v3199_v6 = vpop.f32.mrf.mxu1 }
 0x4dc   : > { %2898 = vst.msk [vmem:[%s5099_s18 + $0x68] sm:$0xff] %vm520_vm1, %v2866_v16  ;;  %v2871_v10 = vadd.f32 %v3511_v52, %v2839_v50  ;;  %v2837_v33 = vadd.f32 %v5089_v30, %v2798_v42  ;;  %v2801_v3 = vmul.f32 %v3199_v6, %v5084_v25  ;;  %v3523_v42 = vld [vmem:[%s3635_s21 + $0xf0] sm:$0xff] }
 0x4dd   : > { %v2715_v17 = vpop.f32.mrf.mxu1 }
 0x4de   : > { %2903 = vst.msk [vmem:[%s5099_s18 + $0x90] sm:$0xff] %vm520_vm1, %v2871_v10  ;;  %v2869_v9 = vadd.f32 %v3512_v40, %v2837_v33  ;;  %v2840_v57 = vadd.f32 %v5089_v30, %v2801_v3  ;;  %v2799_v55 = vmul.f32 %v5084_v25, %v2715_v17  ;;  %v3524_v3 = vld [vmem:[%s3635_s21 + $0xe0] sm:$0xff] }
 0x4df   : > { %v3202_v0 = vpop.f32.mrf.mxu1 }
 0x4e0   : > { %2901 = vst.msk [vmem:[%s5099_s18 + $0x80] sm:$0xff] %vm520_vm1, %v2869_v9  ;;  %v2872_v62 = vadd.f32 %v3513_v61, %v2840_v57  ;;  %v2838_v46 = vadd.f32 %v5089_v30, %v2799_v55  ;;  %v2804_v2 = vmul.f32 %v3202_v0, %v5084_v25  ;;  %v3525_v57 = vld [vmem:[%s3635_s21 + $0xf8] sm:$0xff]  ;;  %v3526_v61 = vld [vmem:[%s3635_s21 + $0xe8] sm:$0xff] }
 0x4e1   : > { %v2728_v31 = vpop.f32.mrf.mxu1 }
 0x4e2   : > { %2904 = vst.msk [vmem:[%s5099_s18 + $0x98] sm:$0xff] %vm520_vm1, %v2872_v62  ;;  %v2870_v41 = vadd.f32 %v3514_v12, %v2838_v46  ;;  %v2843_v22 = vadd.f32 %v5089_v30, %v2804_v2  ;;  %v2802_v53 = vmul.f32 %v5084_v25, %v2728_v31 }
 0x4e3   : > { %v3203_v23 = vpop.f32.mrf.mxu1 }
 0x4e4   : > { %2902 = vst.msk [vmem:[%s5099_s18 + $0x88] sm:$0xff] %vm520_vm1, %v2870_v41  ;;  %v2875_v45 = vadd.f32 %v3515_v32, %v2843_v22  ;;  %v2841_v60 = vadd.f32 %v5089_v30, %v2802_v53  ;;  %v2805_v51 = vmul.f32 %v3203_v23, %v5084_v25 }
 0x4e5   : > { %v2731_v54 = vpop.f32.mrf.mxu1 }
 0x4e6   : > { %2907 = vst.msk [vmem:[%s5099_s18 + $0xb0] sm:$0xff] %vm520_vm1, %v2875_v45  ;;  %v2873_v35 = vadd.f32 %v3516_v58, %v2841_v60  ;;  %v2844_v29 = vadd.f32 %v5089_v30, %v2805_v51  ;;  %v2803_v47 = vmul.f32 %v5084_v25, %v2731_v54 }
 0x4e7   : > { %v3206_v59 = vpop.f32.mrf.mxu1 }
 0x4e8   : > { %2905 = vst.msk [vmem:[%s5099_s18 + $0xa0] sm:$0xff] %vm520_vm1, %v2873_v35  ;;  %v2876_v20 = vadd.f32 %v3517_v43, %v2844_v29  ;;  %v2842_v5 = vadd.f32 %v5089_v30, %v2803_v47  ;;  %v2808_v1 = vmul.f32 %v3206_v59, %v5084_v25 }
 0x4e9   : > { %v2744_v26 = vpop.f32.mrf.mxu1 }
 0x4ea   : > { %2908 = vst.msk [vmem:[%s5099_s18 + $0xb8] sm:$0xff] %vm520_vm1, %v2876_v20  ;;  %v2874_v18 = vadd.f32 %v3518_v63, %v2842_v5  ;;  %v2847_v8 = vadd.f32 %v5089_v30, %v2808_v1  ;;  %v2806_v38 = vmul.f32 %v5084_v25, %v2744_v26 }
 0x4eb   : > { %v3207_v37 = vpop.f32.mrf.mxu1 }
 0x4ec   : > { %2906 = vst.msk [vmem:[%s5099_s18 + $0xa8] sm:$0xff] %vm520_vm1, %v2874_v18  ;;  %v2879_v36 = vadd.f32 %v3519_v27, %v2847_v8  ;;  %v2845_v56 = vadd.f32 %v5089_v30, %v2806_v38  ;;  %v2809_v11 = vmul.f32 %v3207_v37, %v5084_v25 }
 0x4ed   : > { %v2747_v48 = vpop.f32.mrf.mxu1 }
 0x4ee   : > { %2911 = vst.msk [vmem:[%s5099_s18 + $0xd0] sm:$0xff] %vm520_vm1, %v2879_v36  ;;  %v2877_v49 = vadd.f32 %v3520_v28, %v2845_v56  ;;  %v2848_v21 = vadd.f32 %v5089_v30, %v2809_v11  ;;  %v2807_v44 = vmul.f32 %v5084_v25, %v2747_v48 }
 0x4ef   : > { %v3210_v34 = vpop.f32.mrf.mxu1 }
 0x4f0   : > { %2909 = vst.msk [vmem:[%s5099_s18 + $0xc0] sm:$0xff] %vm520_vm1, %v2877_v49  ;;  %v2880_v13 = vadd.f32 %v3521_v4, %v2848_v21  ;;  %v2846_v15 = vadd.f32 %v5089_v30, %v2807_v44  ;;  %v2812_v19 = vmul.f32 %v3210_v34, %v5084_v25 }
 0x4f1   : > { %v2760_v7 = vpop.f32.mrf.mxu1 }
 0x4f2   : > { %2912 = vst.msk [vmem:[%s5099_s18 + $0xd8] sm:$0xff] %vm520_vm1, %v2880_v13  ;;  %v2878_v24 = vadd.f32 %v3522_v14, %v2846_v15  ;;  %v2851_v39 = vadd.f32 %v5089_v30, %v2812_v19  ;;  %v2810_v16 = vmul.f32 %v5084_v25, %v2760_v7 }
 0x4f3   : > { %v3211_v50 = vpop.f32.mrf.mxu1 }
 0x4f4   : > { %2910 = vst.msk [vmem:[%s5099_s18 + $0xc8] sm:$0xff] %vm520_vm1, %v2878_v24  ;;  %v2883_v6 = vadd.f32 %v3523_v42, %v2851_v39  ;;  %v2849_v52 = vadd.f32 %v5089_v30, %v2810_v16  ;;  %v2813_v10 = vmul.f32 %v3211_v50, %v5084_v25 }
 0x4f5   : > { %v2763_v33 = vpop.f32.mrf.mxu1 }
 0x4f6   : > { %2915 = vst.msk [vmem:[%s5099_s18 + $0xf0] sm:$0xff] %vm520_vm1, %v2883_v6  ;;  %v2881_v17 = vadd.f32 %v3524_v3, %v2849_v52  ;;  %v2852_v40 = vadd.f32 %v5089_v30, %v2813_v10  ;;  %v2811_v9 = vmul.f32 %v5084_v25, %v2763_v33 }
 0x4f8   : > { %2913 = vst.msk [vmem:[%s5099_s18 + $0xe0] sm:$0xff] %vm520_vm1, %v2881_v17  ;;  %v2884_v55 = vadd.f32 %v3525_v57, %v2852_v40  ;;  %v2850_v0 = vadd.f32 %v5089_v30, %v2811_v9 }
 0x4fa   : > { %2916 = vst.msk [vmem:[%s5099_s18 + $0xf8] sm:$0xff] %vm520_vm1, %v2884_v55  ;;  %v2882_v62 = vadd.f32 %v3526_v61, %v2850_v0 }
 0x4fc   : > { %2914 = vst.msk [vmem:[%s5099_s18 + $0xe8] sm:$0xff] %vm520_vm1, %v2882_v62 }
 0x4fd PF: > { %s26_s15 = sadd.s32 1, %s3533_s15  }
 0x4fe   : > { %p23_p4 = scmp.ge.s32.totalorder %s26_s15, 4  }
 0x500   :  { %25 = sbr.rel (!%p23_p4) target bundleno = 3 (0x3), region = 109 }

</bundles_post_ra>
